<compile_context>
chip_gen: v5e
topology: v5e:2x2
jax: 0.10.0
libtpu: 0.0.40
codegen_flags: <defaults>
</compile_context>

<pallas_src>
import jax
import jax.numpy as jnp
from jax import lax
from jax.experimental import pallas as pl
from jax.experimental.pallas import tpu as pltpu

# ----------------------------- configuration --------------------------------

B = 2                  # number of instances (hypernet embeddings)
N = 128                # number of xyt query points per instance (= one full lane width)
XYT_DIM, UV_DIM, RGB_DIM = 3, 2, 3

NUM_IMG_LAYERS = 3     # number of MappingNetwork layers in VDNetwork

MAP_LAYERS, MAP_HID = 2, 32       # mapping_net:  3 -> 32 -> 2
TEX_LAYERS, TEX_HID = 2, 32       # texture_net:  2 -> 32 -> 3
RES_LAYERS, RES_HID = 2, 32       # residual_net: 3 -> 32 -> 3
ALPHA_LAYERS, ALPHA_HID = 2, 32   # alpha_net:    3 -> 32 -> (NUM_IMG_LAYERS-1)

HN_IN, HN_HID = 16, 32            # hypernet head: HN_IN -> HN_HID (ReLU) -> out*in
HEAD_PAD = 128                    # per-head predictions padded to one lane width (max real = 96)

OUT_CH = 32                       # packed output channels (27 used, padded to 32)
EPS = 1e-5

assert NUM_IMG_LAYERS == 3 and HN_HID == 32 and MAP_HID == 32  # stacking below assumes this


# --------------------------- hypo-module layout -------------------------------

def _mlp_weight_shapes(in_dim, out_dim, num_layers, hidden):
    shapes = []
    for l in range(num_layers):
        ind = in_dim if l == 0 else hidden
        outd = out_dim if l == num_layers - 1 else hidden
        shapes.append((outd, ind))
    return shapes


NET_DEFS = []
for _i in range(NUM_IMG_LAYERS):
    NET_DEFS.append((f"layer_{_i}.mapping_net",
                     _mlp_weight_shapes(XYT_DIM, UV_DIM, MAP_LAYERS, MAP_HID)))
    NET_DEFS.append((f"layer_{_i}.texture_net",
                     _mlp_weight_shapes(UV_DIM, RGB_DIM, TEX_LAYERS, TEX_HID)))
    NET_DEFS.append((f"layer_{_i}.residual_net",
                     _mlp_weight_shapes(UV_DIM + 1, RGB_DIM, RES_LAYERS, RES_HID)))
NET_DEFS.append(("alpha.alpha_net",
                 _mlp_weight_shapes(XYT_DIM, NUM_IMG_LAYERS - 1, ALPHA_LAYERS, ALPHA_HID)))

HEAD_META = []
for _name, _shapes in NET_DEFS:
    for _l, _shp in enumerate(_shapes):
        HEAD_META.append((_name, _l, _shp))
NUM_HEADS = len(HEAD_META)         # = 20
# head index layout: image layer i -> [6i]=map_l0, [6i+1]=map_l1, [6i+2]=tex_l0,
# [6i+3]=tex_l1, [6i+4]=res_l0, [6i+5]=res_l1;  alpha -> [18]=l0, [19]=l1.


# ------------------------------ fused Pallas kernel ----------------------------

def _hyper_vdn_kernel(emb_ref, xyt_ref, w1_ref, b1_ref, w2_ref, b2_ref, o_ref,
                      flat, sAT, sB, t1T, t2m, uvt, out_scr):
    """Whole HyperVDN forward in one launch.

    emb [B,16]; xyt [B,N,3] (native layout); w1 [H,16,32]; b1 [H,1,32];
    w2 [H,32,128]; b2 [H,1,128]; output [B,N,32] packed
    (uv0,uv1,uv2 | rgb0,rgb1,rgb2 | res0,res1,res2 | alpha | pad).
    """
    L = NUM_IMG_LAYERS
    H = NUM_HEADS

    # Zero the block-diagonal / padded scratch ONCE; only the (fixed) block
    # positions are rewritten per (instance, layer), so zeros persist.
    sB[...] = jnp.zeros_like(sB)
    t1T[...] = jnp.zeros_like(t1T)
    t2m[...] = jnp.zeros_like(t2m)
    out_scr[...] = jnp.zeros_like(out_scr)

    # ---------------- hypernet: all 20 heads in two batched matmuls ----------------
    e = jnp.broadcast_to(emb_ref[...], (H, B, HN_IN))                    # [H,B,16]
    hid = lax.dot_general(e, w1_ref[...], (((2,), (1,)), ((0,), (0,))),
                          preferred_element_type=jnp.float32) + b1_ref[...]
    hid = jnp.maximum(hid, 0.0)                                          # [H,B,32]
    # predicted flat params stay in a VMEM scratch; slices are read lazily below
    flat[...] = lax.dot_general(hid, w2_ref[...], (((2,), (1,)), ((0,), (0,))),
                                preferred_element_type=jnp.float32) + b2_ref[...]

    def mm_ta(a, b_):            # A^T @ B   (contract leading dims)
        return lax.dot_general(a, b_, (((0,), (0,)), ((), ())),
                               preferred_element_type=jnp.float32)

    def mm_abt(a, b_):           # A @ B^T
        return lax.dot_general(a, b_, (((1,), (1,)), ((), ())),
                               preferred_element_type=jnp.float32)

    def eye(n):                  # exact identity, used as an MXU-based transpose
        r = lax.broadcasted_iota(jnp.int32, (n, n), 0)
        c = lax.broadcasted_iota(jnp.int32, (n, n), 1)
        return (r == c).astype(jnp.float32)

    for b in range(B):           # B = 2, statically unrolled
        # native [N,3] tile -> [3,N] via exact identity matmul (MXU slot is idle)
        x = mm_abt(eye(XYT_DIM), xyt_ref[b])                             # [3, N]
        uvt[2:3, :] = x[1:2, :]                 # t channel (== xyt[:, :, -2:-1])

        # ---- stage 1: stacked first layers of (mapping x3, alpha): one matmul ----
        # sAT[c, 32*j + o] = W_{head j, layer0}[o, c]
        for c in range(XYT_DIM):
            for j, hh in enumerate((0, 6, 12, 18)):
                sAT[c:c + 1, 32 * j:32 * (j + 1)] = flat[hh, b:b + 1, 32 * c:32 * (c + 1)]
        hA = jnp.maximum(mm_ta(sAT[...], x), 0.0)                        # [128, N]

        # ---- stage 2: stacked second layers (block-diagonal): one matmul ----
        # sB[2*j + r, 32*j + k] = W_{head j, layer1}[r, k]
        for j, hh in enumerate((1, 7, 13, 19)):
            for r in range(2):
                sB[2 * j + r:2 * j + r + 1, 32 * j:32 * (j + 1)] = \
                    flat[hh, b:b + 1, 32 * r:32 * (r + 1)]
        s1 = jnp.dot(sB[...], hA, preferred_element_type=jnp.float32)    # [8, N]

        alpha_pre = (jnp.tanh(s1[6:8, :]) + 1.0) * 0.5                   # [2, N]

        # ---- per image layer: texture + residual stacked (2 matmuls each) ----
        for i in range(L):
            uv = jnp.tanh(s1[2 * i:2 * i + 2, :])                        # [2, N]
            out_scr[2 * i:2 * i + 2, :] = uv
            uvt[0:2, :] = uv

            # texture_l0 (cols 0:32, uv rows only; t row stays zero) +
            # residual_l0 (cols 32:64, uv+t rows)
            for c in range(UV_DIM):
                t1T[c:c + 1, 0:32] = flat[6 * i + 2, b:b + 1, 32 * c:32 * (c + 1)]
            for c in range(XYT_DIM):
                t1T[c:c + 1, 32:64] = flat[6 * i + 4, b:b + 1, 32 * c:32 * (c + 1)]
            h1 = jnp.maximum(mm_ta(t1T[...], uvt[...]), 0.0)             # [64, N]

            # texture_l1 (rows 0:3 / cols 0:32) + residual_l1 (rows 3:6 / cols 32:64)
            for r in range(RGB_DIM):
                t2m[r:r + 1, 0:32] = flat[6 * i + 3, b:b + 1, 32 * r:32 * (r + 1)]
                t2m[3 + r:4 + r, 32:64] = flat[6 * i + 5, b:b + 1, 32 * r:32 * (r + 1)]
            o2 = jnp.dot(t2m[...], h1, preferred_element_type=jnp.float32)   # [6, N]

            out_scr[6 + 3 * i:9 + 3 * i, :] = (jnp.tanh(o2[0:3, :]) + 1.0) * 0.5   # rgb_i
            out_scr[15 + 3 * i:18 + 3 * i, :] = jax.nn.softplus(o2[3:6, :])        # residual_i

        # ---- hierarchical alpha (coeff uses UNCLIPPED alphas; clamp the results) ----
        a0 = alpha_pre[0:1, :]
        a1 = alpha_pre[1:2, :]
        coeff = 1.0 - a0
        out_scr[24:25, :] = jnp.clip(a0, EPS, 1.0 - EPS)
        out_scr[25:26, :] = jnp.clip(a1 * coeff, EPS, 1.0 - EPS)
        out_scr[26:27, :] = jnp.clip(coeff * (1.0 - a1), EPS, 1.0 - EPS)

        # ---- single packed store per instance, flipped to [N, C] via MXU identity ----
        o_ref[b] = mm_abt(eye(N), out_scr[...])                          # [N, 32]


# ------------------------------ HyperVDN forward -------------------------------

def hyper_vdn_forward(xyt, emb, packed_params):
    """HyperVDN.forward: params = hypernet(emb); out = VDNetwork(xyt, params)."""
    w1, b1, w2, b2 = packed_params
    out = pl.pallas_call(
        _hyper_vdn_kernel,
        out_shape=jax.ShapeDtypeStruct((B, N, OUT_CH), jnp.float32),
        scratch_shapes=[
            pltpu.VMEM((NUM_HEADS, B, HEAD_PAD), jnp.float32),  # predicted flat params
            pltpu.VMEM((XYT_DIM, 128), jnp.float32),            # stage-1 stacked W^T
            pltpu.VMEM((8, 128), jnp.float32),                  # stage-1 block-diag W2
            pltpu.VMEM((XYT_DIM, 64), jnp.float32),             # texture+residual stacked W^T
            pltpu.VMEM((6, 64), jnp.float32),                   # texture+residual block-diag W2
            pltpu.VMEM((XYT_DIM, N), jnp.float32),              # [uv, t] input rows
            pltpu.VMEM((OUT_CH, N), jnp.float32),               # packed channel-major results
        ],
    )(emb, xyt, w1, b1, w2, b2)

    # API-required split back into the PyTorch dict-of-[B, N, C] convention
    # (static slices only -- no transposes, no extra pallas/XLA round-trips).
    L = NUM_IMG_LAYERS
    uvs = [out[:, :, 2 * i:2 * i + 2] for i in range(L)]
    rgbs = [out[:, :, 6 + 3 * i:9 + 3 * i] for i in range(L)]
    residuals = [out[:, :, 15 + 3 * i:18 + 3 * i] for i in range(L)]
    alpha = out[:, :, 24:27]
    return {"uv": uvs, "rgb": rgbs, "residual": residuals, "alpha": alpha}


# --------------------------- parameter construction ----------------------------

def build_head_params(key):
    """Canonical per-head hypernet params [(W1 [32,16], b1 [32], W2 [out*in,32], b2 [out*in])]."""
    canon = []
    for (_name, _l, (od, idim)) in HEAD_META:
        key, k1w, k1b, k2w, k2b = jax.random.split(key, 5)
        s1 = 1.0 / float(HN_IN) ** 0.5
        s2 = 1.0 / float(HN_HID) ** 0.5
        W1 = jax.random.uniform(k1w, (HN_HID, HN_IN), jnp.float32, -s1, s1)
        b1 = jax.random.uniform(k1b, (HN_HID,), jnp.float32, -s1, s1)
        # small init of the last hypernet layer (std=0.01 convention)
        W2 = jax.random.uniform(k2w, (od * idim, HN_HID), jnp.float32, -s2, s2) * 0.01
        b2 = jax.random.uniform(k2b, (od * idim,), jnp.float32, -s2, s2) * 0.01
        canon.append((W1, b1, W2, b2))
    return canon


def pack_head_params(canon):
    """Kernel layout: w1 [H,16,32], b1 [H,1,32], w2 [H,32,128], b2 [H,1,128].

    Per-head lane layout of the predicted flat params (zero-padded to 128 lanes):
      * first layers  ([32, in]):  column-major -> lane c*32 + o holds W[o, c]
      * second layers ([out, 32]): row-major    -> lane r*32 + k holds W[r, k]
    This is exactly what the in-kernel stacked-weight assembly expects.
    """
    w1s, b1s, w2s, b2s = [], [], [], []
    for idx, (_name, l, (od, idim)) in enumerate(HEAD_META):
        W1, b1, W2, b2 = canon[idx]
        w1s.append(W1.T)                                     # [16, 32]
        b1s.append(b1[None, :])                              # [1, 32]
        if l == 0:
            perm = [o * idim + c for c in range(idim) for o in range(od)]
        else:
            perm = list(range(od * idim))
        perm = jnp.array(perm, dtype=jnp.int32)
        w2k = jnp.zeros((HN_HID, HEAD_PAD), jnp.float32).at[:, :perm.shape[0]].set(W2[perm, :].T)
        b2k = jnp.zeros((1, HEAD_PAD), jnp.float32).at[:, :perm.shape[0]].set(b2[perm][None, :])
        w2s.append(w2k)
        b2s.append(b2k)
    return jnp.stack(w1s), jnp.stack(b1s), jnp.stack(w2s), jnp.stack(b2s)


# ------------------------------ plain-JAX reference ----------------------------

def reference_forward(xyt, emb, canon):
    """Pure-JAX mirror of the PyTorch forward, for numerical validation."""
    bsz = emb.shape[0]
    pred = {name: [None] * len(shapes) for name, shapes in NET_DEFS}
    for idx, (name, l, (od, idim)) in enumerate(HEAD_META):
        W1, b1, W2, b2 = canon[idx]
        hid = jnp.maximum(jnp.matmul(emb, W1.T, precision="highest") + b1, 0.0)
        flat = jnp.matmul(hid, W2.T, precision="highest") + b2
        pred[name][l] = flat.reshape(bsz, od, idim)

    def run_mlp(x, ws):     # BatchLinear chain, bias=False, ReLU between layers
        h = x
        for j, wm in enumerate(ws):
            h = jnp.einsum("bni,boi->bno", h, wm, precision="highest")
            if j != len(ws) - 1:
                h = jnp.maximum(h, 0.0)
        return h

    t = xyt[:, :, -2:-1]
    uvs, rgbs, residuals = [], [], []
    for i in range(NUM_IMG_LAYERS):
        uv = jnp.tanh(run_mlp(xyt, pred[f"layer_{i}.mapping_net"]))
        rgb = (jnp.tanh(run_mlp(uv, pred[f"layer_{i}.texture_net"])) + 1.0) * 0.5
        uvt_in = jnp.concatenate([uv, t], axis=2)
        res = jax.nn.softplus(run_mlp(uvt_in, pred[f"layer_{i}.residual_net"]))
        uvs.append(uv); rgbs.append(rgb); residuals.append(res)

    a = (jnp.tanh(run_mlp(xyt, pred["alpha.alpha_net"])) + 1.0) * 0.5
    hie = [a[:, :, 0:1]]
    coeff = 1.0 - a[:, :, 0:1]
    for i in range(1, a.shape[-1]):
        hie.append(a[:, :, i:i + 1] * coeff)
        coeff = coeff * (1.0 - a[:, :, i:i + 1])
    hie.append(coeff)
    alpha = jnp.clip(jnp.concatenate(hie, axis=2), EPS, 1.0 - EPS)
    return {"uv": uvs, "rgb": rgbs, "residual": residuals, "alpha": alpha}


# ----------------------------------- main --------------------------------------

if __name__ == "__main__":
    root = jax.random.PRNGKey(0)
    k_params, k_xyt, k_emb = jax.random.split(root, 3)

    canon = build_head_params(k_params)
    packed = pack_head_params(canon)

    xyt = jax.random.uniform(k_xyt, (B, N, XYT_DIM), jnp.float32, -1.0, 1.0)
    emb = jax.random.normal(k_emb, (B, HN_IN), jnp.float32)

    fwd = jax.jit(hyper_vdn_forward)
    out = jax.block_until_ready(fwd(xyt, emb, packed))

    # shape / range sanity checks
    assert len(out["uv"]) == NUM_IMG_LAYERS
    assert out["uv"][0].shape == (B, N, UV_DIM)
    assert out["rgb"][0].shape == (B, N, RGB_DIM)
    assert out["residual"][0].shape == (B, N, RGB_DIM)
    assert out["alpha"].shape == (B, N, NUM_IMG_LAYERS)
    assert bool(jnp.all(jnp.isfinite(out["alpha"])))
    assert bool(jnp.all((out["alpha"] >= EPS) & (out["alpha"] <= 1 - EPS)))

    # numerical check against the plain-JAX reference
    ref = reference_forward(xyt, emb, canon)

    def _close(a, b):
        return bool(jnp.allclose(a, b, atol=5e-3, rtol=5e-3))

    for name in ("uv", "rgb", "residual"):
        for i in range(NUM_IMG_LAYERS):
            assert _close(out[name][i], ref[name][i]), f"mismatch in {name}[{i}]"
    assert _close(out["alpha"], ref["alpha"]), "mismatch in alpha"

    print("KERNEL_OK")
</pallas_src>

<mosaic_0001>
module attributes {stable_mosaic.version = 11 : i64} {
  func.func @_hyper_vdn_kernel(%arg0: memref<2x16xf32, #tpu.memory_space<vmem>>, %arg1: memref<2x128x3xf32, #tpu.memory_space<vmem>>, %arg2: memref<20x16x32xf32, #tpu.memory_space<vmem>>, %arg3: memref<20x1x32xf32, #tpu.memory_space<vmem>>, %arg4: memref<20x32x128xf32, #tpu.memory_space<vmem>>, %arg5: memref<20x1x128xf32, #tpu.memory_space<vmem>>, %arg6: memref<2x128x32xf32, #tpu.memory_space<vmem>>, %arg7: memref<20x2x128xf32, #tpu.memory_space<vmem>>, %arg8: memref<3x128xf32, #tpu.memory_space<vmem>>, %arg9: memref<8x128xf32, #tpu.memory_space<vmem>>, %arg10: memref<3x64xf32, #tpu.memory_space<vmem>>, %arg11: memref<6x64xf32, #tpu.memory_space<vmem>>, %arg12: memref<3x128xf32, #tpu.memory_space<vmem>>, %arg13: memref<32x128xf32, #tpu.memory_space<vmem>>) attributes {dimension_semantics = [], scalar_prefetch = 0 : i64, scratch_operands = 7 : i64, tpu.core_type = #tpu.core_type<tc>} {
    %cst = arith.constant 0.000000e+00 : f32
    %0 = vector.broadcast %cst : f32 to vector<8x128xf32>
    %c0 = arith.constant 0 : index
    %c0_0 = arith.constant 0 : index
    %1 = vector.load %arg9[%c0, %c0_0] : memref<8x128xf32, #tpu.memory_space<vmem>>, vector<8x128xf32>
    tpu.vector_store %arg9[%c0, %c0_0], %0 {strides = array<i32>} : memref<8x128xf32, #tpu.memory_space<vmem>>, vector<8x128xf32>,
    %cst_1 = arith.constant 0.000000e+00 : f32
    %2 = vector.broadcast %cst_1 : f32 to vector<3x64xf32>
    %c0_2 = arith.constant 0 : index
    %c0_3 = arith.constant 0 : index
    %3 = vector.load %arg10[%c0_2, %c0_3] : memref<3x64xf32, #tpu.memory_space<vmem>>, vector<3x64xf32>
    tpu.vector_store %arg10[%c0_2, %c0_3], %2 {strides = array<i32>} : memref<3x64xf32, #tpu.memory_space<vmem>>, vector<3x64xf32>,
    %cst_4 = arith.constant 0.000000e+00 : f32
    %4 = vector.broadcast %cst_4 : f32 to vector<6x64xf32>
    %c0_5 = arith.constant 0 : index
    %c0_6 = arith.constant 0 : index
    %5 = vector.load %arg11[%c0_5, %c0_6] : memref<6x64xf32, #tpu.memory_space<vmem>>, vector<6x64xf32>
    tpu.vector_store %arg11[%c0_5, %c0_6], %4 {strides = array<i32>} : memref<6x64xf32, #tpu.memory_space<vmem>>, vector<6x64xf32>,
    %cst_7 = arith.constant 0.000000e+00 : f32
    %6 = vector.broadcast %cst_7 : f32 to vector<32x128xf32>
    %c0_8 = arith.constant 0 : index
    %c0_9 = arith.constant 0 : index
    %7 = vector.load %arg13[%c0_8, %c0_9] : memref<32x128xf32, #tpu.memory_space<vmem>>, vector<32x128xf32>
    tpu.vector_store %arg13[%c0_8, %c0_9], %6 {strides = array<i32>} : memref<32x128xf32, #tpu.memory_space<vmem>>, vector<32x128xf32>,
    %c0_10 = arith.constant 0 : index
    %c0_11 = arith.constant 0 : index
    %8 = vector.load %arg0[%c0_10, %c0_11] : memref<2x16xf32, #tpu.memory_space<vmem>>, vector<2x16xf32>
    %9 = vector.shape_cast %8 : vector<2x16xf32> to vector<1x2x16xf32>
    %10 = vector.broadcast %9 : vector<1x2x16xf32> to vector<20x2x16xf32>
    %c0_12 = arith.constant 0 : index
    %c0_13 = arith.constant 0 : index
    %c0_14 = arith.constant 0 : index
    %11 = vector.load %arg2[%c0_12, %c0_13, %c0_14] : memref<20x16x32xf32, #tpu.memory_space<vmem>>, vector<20x16x32xf32>
    %cst_15 = arith.constant dense<0.000000e+00> : vector<20x2x32xf32>
    %12 = tpu.matmul %10, %11, %cst_15 {dimension_numbers = #tpu.dot_dimension_numbers<[2], [1], [1], [2], [0, 0, 0, 1, 1, 2], [0], [0]>} : vector<20x2x16xf32>, vector<20x16x32xf32>, vector<20x2x32xf32> -> vector<20x2x32xf32>
    %c0_16 = arith.constant 0 : index
    %c0_17 = arith.constant 0 : index
    %c0_18 = arith.constant 0 : index
    %13 = vector.load %arg3[%c0_16, %c0_17, %c0_18] : memref<20x1x32xf32, #tpu.memory_space<vmem>>, vector<20x1x32xf32>
    %14 = vector.broadcast %13 : vector<20x1x32xf32> to vector<20x2x32xf32>
    %15 = arith.addf %12, %14 : vector<20x2x32xf32>
    %cst_19 = arith.constant 0.000000e+00 : f32
    %16 = vector.broadcast %cst_19 : f32 to vector<20x2x32xf32>
    %17 = arith.maximumf %15, %16 : vector<20x2x32xf32>
    %c0_20 = arith.constant 0 : index
    %c0_21 = arith.constant 0 : index
    %c0_22 = arith.constant 0 : index
    %18 = vector.load %arg4[%c0_20, %c0_21, %c0_22] : memref<20x32x128xf32, #tpu.memory_space<vmem>>, vector<20x32x128xf32>
    %cst_23 = arith.constant dense<0.000000e+00> : vector<20x2x128xf32>
    %19 = tpu.matmul %17, %18, %cst_23 {dimension_numbers = #tpu.dot_dimension_numbers<[2], [1], [1], [2], [0, 0, 0, 1, 1, 2], [0], [0]>} : vector<20x2x32xf32>, vector<20x32x128xf32>, vector<20x2x128xf32> -> vector<20x2x128xf32>
    %c0_24 = arith.constant 0 : index
    %c0_25 = arith.constant 0 : index
    %c0_26 = arith.constant 0 : index
    %20 = vector.load %arg5[%c0_24, %c0_25, %c0_26] : memref<20x1x128xf32, #tpu.memory_space<vmem>>, vector<20x1x128xf32>
    %21 = vector.broadcast %20 : vector<20x1x128xf32> to vector<20x2x128xf32>
    %22 = arith.addf %19, %21 : vector<20x2x128xf32>
    %c0_27 = arith.constant 0 : index
    %c0_28 = arith.constant 0 : index
    %c0_29 = arith.constant 0 : index
    %23 = vector.load %arg7[%c0_27, %c0_28, %c0_29] : memref<20x2x128xf32, #tpu.memory_space<vmem>>, vector<20x2x128xf32>
    tpu.vector_store %arg7[%c0_27, %c0_28, %c0_29], %22 {strides = array<i32>} : memref<20x2x128xf32, #tpu.memory_space<vmem>>, vector<20x2x128xf32>,
    %24 = tpu.iota {dimensions = array<i32: 0>} : vector<3x3xi32>
    %25 = tpu.iota {dimensions = array<i32: 1>} : vector<3x3xi32>
    %26 = arith.cmpi eq, %24, %25 : vector<3x3xi32>
    %27 = arith.extui %26 : vector<3x3xi1> to vector<3x3xi32>
    %28 = arith.sitofp %27 : vector<3x3xi32> to vector<3x3xf32>
    %c0_30 = arith.constant 0 : index
    %c0_31 = arith.constant 0 : index
    %c0_32 = arith.constant 0 : index
    %29 = vector.load %arg1[%c0_30, %c0_31, %c0_32] : memref<2x128x3xf32, #tpu.memory_space<vmem>>, vector<1x128x3xf32>
    %30 = vector.shape_cast %29 : vector<1x128x3xf32> to vector<128x3xf32>
    %cst_33 = arith.constant dense<0.000000e+00> : vector<3x128xf32>
    %31 = tpu.matmul %28, %30, %cst_33 {dimension_numbers = #tpu.dot_dimension_numbers<[1], [1], [0], [0], [0, 0, 1, 0], [], []>} : vector<3x3xf32>, vector<128x3xf32>, vector<3x128xf32> -> vector<3x128xf32>
    %32 = vector.extract_strided_slice %31 {offsets = [1, 0], sizes = [1, 128], strides = [1, 1]} : vector<3x128xf32> to vector<1x128xf32>
    %c2 = arith.constant 2 : index
    %c0_34 = arith.constant 0 : index
    %33 = vector.load %arg12[%c2, %c0_34] : memref<3x128xf32, #tpu.memory_space<vmem>>, vector<1x128xf32>
    tpu.vector_store %arg12[%c2, %c0_34], %32 {strides = array<i32>} : memref<3x128xf32, #tpu.memory_space<vmem>>, vector<1x128xf32>,
    %c0_35 = arith.constant 0 : index
    %c0_36 = arith.constant 0 : index
    %c0_37 = arith.constant 0 : index
    %34 = vector.load %arg7[%c0_35, %c0_36, %c0_37] : memref<20x2x128xf32, #tpu.memory_space<vmem>>, vector<1x1x32xf32>
    %35 = vector.shape_cast %34 : vector<1x1x32xf32> to vector<1x32xf32>
    %c0_38 = arith.constant 0 : index
    %c0_39 = arith.constant 0 : index
    %36 = vector.load %arg8[%c0_38, %c0_39] : memref<3x128xf32, #tpu.memory_space<vmem>>, vector<1x32xf32>
    tpu.vector_store %arg8[%c0_38, %c0_39], %35 {strides = array<i32>} : memref<3x128xf32, #tpu.memory_space<vmem>>, vector<1x32xf32>,
    %c6 = arith.constant 6 : index
    %c0_40 = arith.constant 0 : index
    %c0_41 = arith.constant 0 : index
    %37 = vector.load %arg7[%c6, %c0_40, %c0_41] : memref<20x2x128xf32, #tpu.memory_space<vmem>>, vector<1x1x32xf32>
    %38 = vector.shape_cast %37 : vector<1x1x32xf32> to vector<1x32xf32>
    %c0_42 = arith.constant 0 : index
    %c32 = arith.constant 32 : index
    %39 = vector.load %arg8[%c0_42, %c32] : memref<3x128xf32, #tpu.memory_space<vmem>>, vector<1x32xf32>
    tpu.vector_store %arg8[%c0_42, %c32], %38 {strides = array<i32>} : memref<3x128xf32, #tpu.memory_space<vmem>>, vector<1x32xf32>,
    %c12 = arith.constant 12 : index
    %c0_43 = arith.constant 0 : index
    %c0_44 = arith.constant 0 : index
    %40 = vector.load %arg7[%c12, %c0_43, %c0_44] : memref<20x2x128xf32, #tpu.memory_space<vmem>>, vector<1x1x32xf32>
    %41 = vector.shape_cast %40 : vector<1x1x32xf32> to vector<1x32xf32>
    %c0_45 = arith.constant 0 : index
    %c64 = arith.constant 64 : index
    %42 = vector.load %arg8[%c0_45, %c64] : memref<3x128xf32, #tpu.memory_space<vmem>>, vector<1x32xf32>
    tpu.vector_store %arg8[%c0_45, %c64], %41 {strides = array<i32>} : memref<3x128xf32, #tpu.memory_space<vmem>>, vector<1x32xf32>,
    %c18 = arith.constant 18 : index
    %c0_46 = arith.constant 0 : index
    %c0_47 = arith.constant 0 : index
    %43 = vector.load %arg7[%c18, %c0_46, %c0_47] : memref<20x2x128xf32, #tpu.memory_space<vmem>>, vector<1x1x32xf32>
    %44 = vector.shape_cast %43 : vector<1x1x32xf32> to vector<1x32xf32>
    %c0_48 = arith.constant 0 : index
    %c96 = arith.constant 96 : index
    %45 = vector.load %arg8[%c0_48, %c96] : memref<3x128xf32, #tpu.memory_space<vmem>>, vector<1x32xf32>
    tpu.vector_store %arg8[%c0_48, %c96], %44 {strides = array<i32>} : memref<3x128xf32, #tpu.memory_space<vmem>>, vector<1x32xf32>,
    %c0_49 = arith.constant 0 : index
    %c0_50 = arith.constant 0 : index
    %c32_51 = arith.constant 32 : index
    %46 = vector.load %arg7[%c0_49, %c0_50, %c32_51] : memref<20x2x128xf32, #tpu.memory_space<vmem>>, vector<1x1x32xf32>
    %47 = vector.shape_cast %46 : vector<1x1x32xf32> to vector<1x32xf32>
    %c1 = arith.constant 1 : index
    %c0_52 = arith.constant 0 : index
    %48 = vector.load %arg8[%c1, %c0_52] : memref<3x128xf32, #tpu.memory_space<vmem>>, vector<1x32xf32>
    tpu.vector_store %arg8[%c1, %c0_52], %47 {strides = array<i32>} : memref<3x128xf32, #tpu.memory_space<vmem>>, vector<1x32xf32>,
    %c6_53 = arith.constant 6 : index
    %c0_54 = arith.constant 0 : index
    %c32_55 = arith.constant 32 : index
    %49 = vector.load %arg7[%c6_53, %c0_54, %c32_55] : memref<20x2x128xf32, #tpu.memory_space<vmem>>, vector<1x1x32xf32>
    %50 = vector.shape_cast %49 : vector<1x1x32xf32> to vector<1x32xf32>
    %c1_56 = arith.constant 1 : index
    %c32_57 = arith.constant 32 : index
    %51 = vector.load %arg8[%c1_56, %c32_57] : memref<3x128xf32, #tpu.memory_space<vmem>>, vector<1x32xf32>
    tpu.vector_store %arg8[%c1_56, %c32_57], %50 {strides = array<i32>} : memref<3x128xf32, #tpu.memory_space<vmem>>, vector<1x32xf32>,
    %c12_58 = arith.constant 12 : index
    %c0_59 = arith.constant 0 : index
    %c32_60 = arith.constant 32 : index
    %52 = vector.load %arg7[%c12_58, %c0_59, %c32_60] : memref<20x2x128xf32, #tpu.memory_space<vmem>>, vector<1x1x32xf32>
    %53 = vector.shape_cast %52 : vector<1x1x32xf32> to vector<1x32xf32>
    %c1_61 = arith.constant 1 : index
    %c64_62 = arith.constant 64 : index
    %54 = vector.load %arg8[%c1_61, %c64_62] : memref<3x128xf32, #tpu.memory_space<vmem>>, vector<1x32xf32>
    tpu.vector_store %arg8[%c1_61, %c64_62], %53 {strides = array<i32>} : memref<3x128xf32, #tpu.memory_space<vmem>>, vector<1x32xf32>,
    %c18_63 = arith.constant 18 : index
    %c0_64 = arith.constant 0 : index
    %c32_65 = arith.constant 32 : index
    %55 = vector.load %arg7[%c18_63, %c0_64, %c32_65] : memref<20x2x128xf32, #tpu.memory_space<vmem>>, vector<1x1x32xf32>
    %56 = vector.shape_cast %55 : vector<1x1x32xf32> to vector<1x32xf32>
    %c1_66 = arith.constant 1 : index
    %c96_67 = arith.constant 96 : index
    %57 = vector.load %arg8[%c1_66, %c96_67] : memref<3x128xf32, #tpu.memory_space<vmem>>, vector<1x32xf32>
    tpu.vector_store %arg8[%c1_66, %c96_67], %56 {strides = array<i32>} : memref<3x128xf32, #tpu.memory_space<vmem>>, vector<1x32xf32>,
    %c0_68 = arith.constant 0 : index
    %c0_69 = arith.constant 0 : index
    %c64_70 = arith.constant 64 : index
    %58 = vector.load %arg7[%c0_68, %c0_69, %c64_70] : memref<20x2x128xf32, #tpu.memory_space<vmem>>, vector<1x1x32xf32>
    %59 = vector.shape_cast %58 : vector<1x1x32xf32> to vector<1x32xf32>
    %c2_71 = arith.constant 2 : index
    %c0_72 = arith.constant 0 : index
    %60 = vector.load %arg8[%c2_71, %c0_72] : memref<3x128xf32, #tpu.memory_space<vmem>>, vector<1x32xf32>
    tpu.vector_store %arg8[%c2_71, %c0_72], %59 {strides = array<i32>} : memref<3x128xf32, #tpu.memory_space<vmem>>, vector<1x32xf32>,
    %c6_73 = arith.constant 6 : index
    %c0_74 = arith.constant 0 : index
    %c64_75 = arith.constant 64 : index
    %61 = vector.load %arg7[%c6_73, %c0_74, %c64_75] : memref<20x2x128xf32, #tpu.memory_space<vmem>>, vector<1x1x32xf32>
    %62 = vector.shape_cast %61 : vector<1x1x32xf32> to vector<1x32xf32>
    %c2_76 = arith.constant 2 : index
    %c32_77 = arith.constant 32 : index
    %63 = vector.load %arg8[%c2_76, %c32_77] : memref<3x128xf32, #tpu.memory_space<vmem>>, vector<1x32xf32>
    tpu.vector_store %arg8[%c2_76, %c32_77], %62 {strides = array<i32>} : memref<3x128xf32, #tpu.memory_space<vmem>>, vector<1x32xf32>,
    %c12_78 = arith.constant 12 : index
    %c0_79 = arith.constant 0 : index
    %c64_80 = arith.constant 64 : index
    %64 = vector.load %arg7[%c12_78, %c0_79, %c64_80] : memref<20x2x128xf32, #tpu.memory_space<vmem>>, vector<1x1x32xf32>
    %65 = vector.shape_cast %64 : vector<1x1x32xf32> to vector<1x32xf32>
    %c2_81 = arith.constant 2 : index
    %c64_82 = arith.constant 64 : index
    %66 = vector.load %arg8[%c2_81, %c64_82] : memref<3x128xf32, #tpu.memory_space<vmem>>, vector<1x32xf32>
    tpu.vector_store %arg8[%c2_81, %c64_82], %65 {strides = array<i32>} : memref<3x128xf32, #tpu.memory_space<vmem>>, vector<1x32xf32>,
    %c18_83 = arith.constant 18 : index
    %c0_84 = arith.constant 0 : index
    %c64_85 = arith.constant 64 : index
    %67 = vector.load %arg7[%c18_83, %c0_84, %c64_85] : memref<20x2x128xf32, #tpu.memory_space<vmem>>, vector<1x1x32xf32>
    %68 = vector.shape_cast %67 : vector<1x1x32xf32> to vector<1x32xf32>
    %c2_86 = arith.constant 2 : index
    %c96_87 = arith.constant 96 : index
    %69 = vector.load %arg8[%c2_86, %c96_87] : memref<3x128xf32, #tpu.memory_space<vmem>>, vector<1x32xf32>
    tpu.vector_store %arg8[%c2_86, %c96_87], %68 {strides = array<i32>} : memref<3x128xf32, #tpu.memory_space<vmem>>, vector<1x32xf32>,
    %c0_88 = arith.constant 0 : index
    %c0_89 = arith.constant 0 : index
    %70 = vector.load %arg8[%c0_88, %c0_89] : memref<3x128xf32, #tpu.memory_space<vmem>>, vector<3x128xf32>
    %cst_90 = arith.constant dense<0.000000e+00> : vector<128x128xf32>
    %71 = tpu.matmul %70, %31, %cst_90 {dimension_numbers = #tpu.dot_dimension_numbers<[0], [0], [1], [1], [0, 1, 1, 1], [], []>} : vector<3x128xf32>, vector<3x128xf32>, vector<128x128xf32> -> vector<128x128xf32>
    %cst_91 = arith.constant 0.000000e+00 : f32
    %72 = vector.broadcast %cst_91 : f32 to vector<128x128xf32>
    %73 = arith.maximumf %71, %72 : vector<128x128xf32>
    %c1_92 = arith.constant 1 : index
    %c0_93 = arith.constant 0 : index
    %c0_94 = arith.constant 0 : index
    %74 = vector.load %arg7[%c1_92, %c0_93, %c0_94] : memref<20x2x128xf32, #tpu.memory_space<vmem>>, vector<1x1x32xf32>
    %75 = vector.shape_cast %74 : vector<1x1x32xf32> to vector<1x32xf32>
    %c0_95 = arith.constant 0 : index
    %c0_96 = arith.constant 0 : index
    %76 = vector.load %arg9[%c0_95, %c0_96] : memref<8x128xf32, #tpu.memory_space<vmem>>, vector<1x32xf32>
    tpu.vector_store %arg9[%c0_95, %c0_96], %75 {strides = array<i32>} : memref<8x128xf32, #tpu.memory_space<vmem>>, vector<1x32xf32>,
    %c1_97 = arith.constant 1 : index
    %c0_98 = arith.constant 0 : index
    %c32_99 = arith.constant 32 : index
    %77 = vector.load %arg7[%c1_97, %c0_98, %c32_99] : memref<20x2x128xf32, #tpu.memory_space<vmem>>, vector<1x1x32xf32>
    %78 = vector.shape_cast %77 : vector<1x1x32xf32> to vector<1x32xf32>
    %c1_100 = arith.constant 1 : index
    %c0_101 = arith.constant 0 : index
    %79 = vector.load %arg9[%c1_100, %c0_101] : memref<8x128xf32, #tpu.memory_space<vmem>>, vector<1x32xf32>
    tpu.vector_store %arg9[%c1_100, %c0_101], %78 {strides = array<i32>} : memref<8x128xf32, #tpu.memory_space<vmem>>, vector<1x32xf32>,
    %c7 = arith.constant 7 : index
    %c0_102 = arith.constant 0 : index
    %c0_103 = arith.constant 0 : index
    %80 = vector.load %arg7[%c7, %c0_102, %c0_103] : memref<20x2x128xf32, #tpu.memory_space<vmem>>, vector<1x1x32xf32>
    %81 = vector.shape_cast %80 : vector<1x1x32xf32> to vector<1x32xf32>
    %c2_104 = arith.constant 2 : index
    %c32_105 = arith.constant 32 : index
    %82 = vector.load %arg9[%c2_104, %c32_105] : memref<8x128xf32, #tpu.memory_space<vmem>>, vector<1x32xf32>
    tpu.vector_store %arg9[%c2_104, %c32_105], %81 {strides = array<i32>} : memref<8x128xf32, #tpu.memory_space<vmem>>, vector<1x32xf32>,
    %c7_106 = arith.constant 7 : index
    %c0_107 = arith.constant 0 : index
    %c32_108 = arith.constant 32 : index
    %83 = vector.load %arg7[%c7_106, %c0_107, %c32_108] : memref<20x2x128xf32, #tpu.memory_space<vmem>>, vector<1x1x32xf32>
    %84 = vector.shape_cast %83 : vector<1x1x32xf32> to vector<1x32xf32>
    %c3 = arith.constant 3 : index
    %c32_109 = arith.constant 32 : index
    %85 = vector.load %arg9[%c3, %c32_109] : memref<8x128xf32, #tpu.memory_space<vmem>>, vector<1x32xf32>
    tpu.vector_store %arg9[%c3, %c32_109], %84 {strides = array<i32>} : memref<8x128xf32, #tpu.memory_space<vmem>>, vector<1x32xf32>,
    %c13 = arith.constant 13 : index
    %c0_110 = arith.constant 0 : index
    %c0_111 = arith.constant 0 : index
    %86 = vector.load %arg7[%c13, %c0_110, %c0_111] : memref<20x2x128xf32, #tpu.memory_space<vmem>>, vector<1x1x32xf32>
    %87 = vector.shape_cast %86 : vector<1x1x32xf32> to vector<1x32xf32>
    %c4 = arith.constant 4 : index
    %c64_112 = arith.constant 64 : index
    %88 = vector.load %arg9[%c4, %c64_112] : memref<8x128xf32, #tpu.memory_space<vmem>>, vector<1x32xf32>
    tpu.vector_store %arg9[%c4, %c64_112], %87 {strides = array<i32>} : memref<8x128xf32, #tpu.memory_space<vmem>>, vector<1x32xf32>,
    %c13_113 = arith.constant 13 : index
    %c0_114 = arith.constant 0 : index
    %c32_115 = arith.constant 32 : index
    %89 = vector.load %arg7[%c13_113, %c0_114, %c32_115] : memref<20x2x128xf32, #tpu.memory_space<vmem>>, vector<1x1x32xf32>
    %90 = vector.shape_cast %89 : vector<1x1x32xf32> to vector<1x32xf32>
    %c5 = arith.constant 5 : index
    %c64_116 = arith.constant 64 : index
    %91 = vector.load %arg9[%c5, %c64_116] : memref<8x128xf32, #tpu.memory_space<vmem>>, vector<1x32xf32>
    tpu.vector_store %arg9[%c5, %c64_116], %90 {strides = array<i32>} : memref<8x128xf32, #tpu.memory_space<vmem>>, vector<1x32xf32>,
    %c19 = arith.constant 19 : index
    %c0_117 = arith.constant 0 : index
    %c0_118 = arith.constant 0 : index
    %92 = vector.load %arg7[%c19, %c0_117, %c0_118] : memref<20x2x128xf32, #tpu.memory_space<vmem>>, vector<1x1x32xf32>
    %93 = vector.shape_cast %92 : vector<1x1x32xf32> to vector<1x32xf32>
    %c6_119 = arith.constant 6 : index
    %c96_120 = arith.constant 96 : index
    %94 = vector.load %arg9[%c6_119, %c96_120] : memref<8x128xf32, #tpu.memory_space<vmem>>, vector<1x32xf32>
    tpu.vector_store %arg9[%c6_119, %c96_120], %93 {strides = array<i32>} : memref<8x128xf32, #tpu.memory_space<vmem>>, vector<1x32xf32>,
    %c19_121 = arith.constant 19 : index
    %c0_122 = arith.constant 0 : index
    %c32_123 = arith.constant 32 : index
    %95 = vector.load %arg7[%c19_121, %c0_122, %c32_123] : memref<20x2x128xf32, #tpu.memory_space<vmem>>, vector<1x1x32xf32>
    %96 = vector.shape_cast %95 : vector<1x1x32xf32> to vector<1x32xf32>
    %c7_124 = arith.constant 7 : index
    %c96_125 = arith.constant 96 : index
    %97 = vector.load %arg9[%c7_124, %c96_125] : memref<8x128xf32, #tpu.memory_space<vmem>>, vector<1x32xf32>
    tpu.vector_store %arg9[%c7_124, %c96_125], %96 {strides = array<i32>} : memref<8x128xf32, #tpu.memory_space<vmem>>, vector<1x32xf32>,
    %c0_126 = arith.constant 0 : index
    %c0_127 = arith.constant 0 : index
    %98 = vector.load %arg9[%c0_126, %c0_127] : memref<8x128xf32, #tpu.memory_space<vmem>>, vector<8x128xf32>
    %cst_128 = arith.constant dense<0.000000e+00> : vector<8x128xf32>
    %99 = tpu.matmul %98, %73, %cst_128 {dimension_numbers = #tpu.dot_dimension_numbers<[1], [0], [0], [1], [0, 0, 1, 1], [], []>} : vector<8x128xf32>, vector<128x128xf32>, vector<8x128xf32> -> vector<8x128xf32>
    %100 = vector.extract_strided_slice %99 {offsets = [6, 0], sizes = [2, 128], strides = [1, 1]} : vector<8x128xf32> to vector<2x128xf32>
    %101 = math.tanh %100 : vector<2x128xf32>
    %cst_129 = arith.constant 1.000000e+00 : f32
    %102 = vector.broadcast %cst_129 : f32 to vector<2x128xf32>
    %103 = arith.addf %101, %102 : vector<2x128xf32>
    %cst_130 = arith.constant 5.000000e-01 : f32
    %104 = vector.broadcast %cst_130 : f32 to vector<2x128xf32>
    %105 = arith.mulf %103, %104 : vector<2x128xf32>
    %106 = vector.extract_strided_slice %99 {offsets = [0, 0], sizes = [2, 128], strides = [1, 1]} : vector<8x128xf32> to vector<2x128xf32>
    %107 = math.tanh %106 : vector<2x128xf32>
    %c0_131 = arith.constant 0 : index
    %c0_132 = arith.constant 0 : index
    %108 = vector.load %arg13[%c0_131, %c0_132] : memref<32x128xf32, #tpu.memory_space<vmem>>, vector<2x128xf32>
    tpu.vector_store %arg13[%c0_131, %c0_132], %107 {strides = array<i32>} : memref<32x128xf32, #tpu.memory_space<vmem>>, vector<2x128xf32>,
    %c0_133 = arith.constant 0 : index
    %c0_134 = arith.constant 0 : index
    %109 = vector.load %arg12[%c0_133, %c0_134] : memref<3x128xf32, #tpu.memory_space<vmem>>, vector<2x128xf32>
    tpu.vector_store %arg12[%c0_133, %c0_134], %107 {strides = array<i32>} : memref<3x128xf32, #tpu.memory_space<vmem>>, vector<2x128xf32>,
    %c2_135 = arith.constant 2 : index
    %c0_136 = arith.constant 0 : index
    %c0_137 = arith.constant 0 : index
    %110 = vector.load %arg7[%c2_135, %c0_136, %c0_137] : memref<20x2x128xf32, #tpu.memory_space<vmem>>, vector<1x1x32xf32>
    %111 = vector.shape_cast %110 : vector<1x1x32xf32> to vector<1x32xf32>
    %c0_138 = arith.constant 0 : index
    %c0_139 = arith.constant 0 : index
    %112 = vector.load %arg10[%c0_138, %c0_139] : memref<3x64xf32, #tpu.memory_space<vmem>>, vector<1x32xf32>
    tpu.vector_store %arg10[%c0_138, %c0_139], %111 {strides = array<i32>} : memref<3x64xf32, #tpu.memory_space<vmem>>, vector<1x32xf32>,
    %c2_140 = arith.constant 2 : index
    %c0_141 = arith.constant 0 : index
    %c32_142 = arith.constant 32 : index
    %113 = vector.load %arg7[%c2_140, %c0_141, %c32_142] : memref<20x2x128xf32, #tpu.memory_space<vmem>>, vector<1x1x32xf32>
    %114 = vector.shape_cast %113 : vector<1x1x32xf32> to vector<1x32xf32>
    %c1_143 = arith.constant 1 : index
    %c0_144 = arith.constant 0 : index
    %115 = vector.load %arg10[%c1_143, %c0_144] : memref<3x64xf32, #tpu.memory_space<vmem>>, vector<1x32xf32>
    tpu.vector_store %arg10[%c1_143, %c0_144], %114 {strides = array<i32>} : memref<3x64xf32, #tpu.memory_space<vmem>>, vector<1x32xf32>,
    %c4_145 = arith.constant 4 : index
    %c0_146 = arith.constant 0 : index
    %c0_147 = arith.constant 0 : index
    %116 = vector.load %arg7[%c4_145, %c0_146, %c0_147] : memref<20x2x128xf32, #tpu.memory_space<vmem>>, vector<1x1x32xf32>
    %117 = vector.shape_cast %116 : vector<1x1x32xf32> to vector<1x32xf32>
    %c0_148 = arith.constant 0 : index
    %c32_149 = arith.constant 32 : index
    %118 = vector.load %arg10[%c0_148, %c32_149] : memref<3x64xf32, #tpu.memory_space<vmem>>, vector<1x32xf32>
    tpu.vector_store %arg10[%c0_148, %c32_149], %117 {strides = array<i32>} : memref<3x64xf32, #tpu.memory_space<vmem>>, vector<1x32xf32>,
    %c4_150 = arith.constant 4 : index
    %c0_151 = arith.constant 0 : index
    %c32_152 = arith.constant 32 : index
    %119 = vector.load %arg7[%c4_150, %c0_151, %c32_152] : memref<20x2x128xf32, #tpu.memory_space<vmem>>, vector<1x1x32xf32>
    %120 = vector.shape_cast %119 : vector<1x1x32xf32> to vector<1x32xf32>
    %c1_153 = arith.constant 1 : index
    %c32_154 = arith.constant 32 : index
    %121 = vector.load %arg10[%c1_153, %c32_154] : memref<3x64xf32, #tpu.memory_space<vmem>>, vector<1x32xf32>
    tpu.vector_store %arg10[%c1_153, %c32_154], %120 {strides = array<i32>} : memref<3x64xf32, #tpu.memory_space<vmem>>, vector<1x32xf32>,
    %c4_155 = arith.constant 4 : index
    %c0_156 = arith.constant 0 : index
    %c64_157 = arith.constant 64 : index
    %122 = vector.load %arg7[%c4_155, %c0_156, %c64_157] : memref<20x2x128xf32, #tpu.memory_space<vmem>>, vector<1x1x32xf32>
    %123 = vector.shape_cast %122 : vector<1x1x32xf32> to vector<1x32xf32>
    %c2_158 = arith.constant 2 : index
    %c32_159 = arith.constant 32 : index
    %124 = vector.load %arg10[%c2_158, %c32_159] : memref<3x64xf32, #tpu.memory_space<vmem>>, vector<1x32xf32>
    tpu.vector_store %arg10[%c2_158, %c32_159], %123 {strides = array<i32>} : memref<3x64xf32, #tpu.memory_space<vmem>>, vector<1x32xf32>,
    %c0_160 = arith.constant 0 : index
    %c0_161 = arith.constant 0 : index
    %125 = vector.load %arg10[%c0_160, %c0_161] : memref<3x64xf32, #tpu.memory_space<vmem>>, vector<3x64xf32>
    %c0_162 = arith.constant 0 : index
    %c0_163 = arith.constant 0 : index
    %126 = vector.load %arg12[%c0_162, %c0_163] : memref<3x128xf32, #tpu.memory_space<vmem>>, vector<3x128xf32>
    %cst_164 = arith.constant dense<0.000000e+00> : vector<64x128xf32>
    %127 = tpu.matmul %125, %126, %cst_164 {dimension_numbers = #tpu.dot_dimension_numbers<[0], [0], [1], [1], [0, 1, 1, 1], [], []>} : vector<3x64xf32>, vector<3x128xf32>, vector<64x128xf32> -> vector<64x128xf32>
    %cst_165 = arith.constant 0.000000e+00 : f32
    %128 = vector.broadcast %cst_165 : f32 to vector<64x128xf32>
    %129 = arith.maximumf %127, %128 : vector<64x128xf32>
    %c3_166 = arith.constant 3 : index
    %c0_167 = arith.constant 0 : index
    %c0_168 = arith.constant 0 : index
    %130 = vector.load %arg7[%c3_166, %c0_167, %c0_168] : memref<20x2x128xf32, #tpu.memory_space<vmem>>, vector<1x1x32xf32>
    %131 = vector.shape_cast %130 : vector<1x1x32xf32> to vector<1x32xf32>
    %c0_169 = arith.constant 0 : index
    %c0_170 = arith.constant 0 : index
    %132 = vector.load %arg11[%c0_169, %c0_170] : memref<6x64xf32, #tpu.memory_space<vmem>>, vector<1x32xf32>
    tpu.vector_store %arg11[%c0_169, %c0_170], %131 {strides = array<i32>} : memref<6x64xf32, #tpu.memory_space<vmem>>, vector<1x32xf32>,
    %c5_171 = arith.constant 5 : index
    %c0_172 = arith.constant 0 : index
    %c0_173 = arith.constant 0 : index
    %133 = vector.load %arg7[%c5_171, %c0_172, %c0_173] : memref<20x2x128xf32, #tpu.memory_space<vmem>>, vector<1x1x32xf32>
    %134 = vector.shape_cast %133 : vector<1x1x32xf32> to vector<1x32xf32>
    %c3_174 = arith.constant 3 : index
    %c32_175 = arith.constant 32 : index
    %135 = vector.load %arg11[%c3_174, %c32_175] : memref<6x64xf32, #tpu.memory_space<vmem>>, vector<1x32xf32>
    tpu.vector_store %arg11[%c3_174, %c32_175], %134 {strides = array<i32>} : memref<6x64xf32, #tpu.memory_space<vmem>>, vector<1x32xf32>,
    %c3_176 = arith.constant 3 : index
    %c0_177 = arith.constant 0 : index
    %c32_178 = arith.constant 32 : index
    %136 = vector.load %arg7[%c3_176, %c0_177, %c32_178] : memref<20x2x128xf32, #tpu.memory_space<vmem>>, vector<1x1x32xf32>
    %137 = vector.shape_cast %136 : vector<1x1x32xf32> to vector<1x32xf32>
    %c1_179 = arith.constant 1 : index
    %c0_180 = arith.constant 0 : index
    %138 = vector.load %arg11[%c1_179, %c0_180] : memref<6x64xf32, #tpu.memory_space<vmem>>, vector<1x32xf32>
    tpu.vector_store %arg11[%c1_179, %c0_180], %137 {strides = array<i32>} : memref<6x64xf32, #tpu.memory_space<vmem>>, vector<1x32xf32>,
    %c5_181 = arith.constant 5 : index
    %c0_182 = arith.constant 0 : index
    %c32_183 = arith.constant 32 : index
    %139 = vector.load %arg7[%c5_181, %c0_182, %c32_183] : memref<20x2x128xf32, #tpu.memory_space<vmem>>, vector<1x1x32xf32>
    %140 = vector.shape_cast %139 : vector<1x1x32xf32> to vector<1x32xf32>
    %c4_184 = arith.constant 4 : index
    %c32_185 = arith.constant 32 : index
    %141 = vector.load %arg11[%c4_184, %c32_185] : memref<6x64xf32, #tpu.memory_space<vmem>>, vector<1x32xf32>
    tpu.vector_store %arg11[%c4_184, %c32_185], %140 {strides = array<i32>} : memref<6x64xf32, #tpu.memory_space<vmem>>, vector<1x32xf32>,
    %c3_186 = arith.constant 3 : index
    %c0_187 = arith.constant 0 : index
    %c64_188 = arith.constant 64 : index
    %142 = vector.load %arg7[%c3_186, %c0_187, %c64_188] : memref<20x2x128xf32, #tpu.memory_space<vmem>>, vector<1x1x32xf32>
    %143 = vector.shape_cast %142 : vector<1x1x32xf32> to vector<1x32xf32>
    %c2_189 = arith.constant 2 : index
    %c0_190 = arith.constant 0 : index
    %144 = vector.load %arg11[%c2_189, %c0_190] : memref<6x64xf32, #tpu.memory_space<vmem>>, vector<1x32xf32>
    tpu.vector_store %arg11[%c2_189, %c0_190], %143 {strides = array<i32>} : memref<6x64xf32, #tpu.memory_space<vmem>>, vector<1x32xf32>,
    %c5_191 = arith.constant 5 : index
    %c0_192 = arith.constant 0 : index
    %c64_193 = arith.constant 64 : index
    %145 = vector.load %arg7[%c5_191, %c0_192, %c64_193] : memref<20x2x128xf32, #tpu.memory_space<vmem>>, vector<1x1x32xf32>
    %146 = vector.shape_cast %145 : vector<1x1x32xf32> to vector<1x32xf32>
    %c5_194 = arith.constant 5 : index
    %c32_195 = arith.constant 32 : index
    %147 = vector.load %arg11[%c5_194, %c32_195] : memref<6x64xf32, #tpu.memory_space<vmem>>, vector<1x32xf32>
    tpu.vector_store %arg11[%c5_194, %c32_195], %146 {strides = array<i32>} : memref<6x64xf32, #tpu.memory_space<vmem>>, vector<1x32xf32>,
    %c0_196 = arith.constant 0 : index
    %c0_197 = arith.constant 0 : index
    %148 = vector.load %arg11[%c0_196, %c0_197] : memref<6x64xf32, #tpu.memory_space<vmem>>, vector<6x64xf32>
    %cst_198 = arith.constant dense<0.000000e+00> : vector<6x128xf32>
    %149 = tpu.matmul %148, %129, %cst_198 {dimension_numbers = #tpu.dot_dimension_numbers<[1], [0], [0], [1], [0, 0, 1, 1], [], []>} : vector<6x64xf32>, vector<64x128xf32>, vector<6x128xf32> -> vector<6x128xf32>
    %150 = vector.extract_strided_slice %149 {offsets = [0, 0], sizes = [3, 128], strides = [1, 1]} : vector<6x128xf32> to vector<3x128xf32>
    %151 = math.tanh %150 : vector<3x128xf32>
    %cst_199 = arith.constant 1.000000e+00 : f32
    %152 = vector.broadcast %cst_199 : f32 to vector<3x128xf32>
    %153 = arith.addf %151, %152 : vector<3x128xf32>
    %cst_200 = arith.constant 5.000000e-01 : f32
    %154 = vector.broadcast %cst_200 : f32 to vector<3x128xf32>
    %155 = arith.mulf %153, %154 : vector<3x128xf32>
    %c6_201 = arith.constant 6 : index
    %c0_202 = arith.constant 0 : index
    %156 = vector.load %arg13[%c6_201, %c0_202] : memref<32x128xf32, #tpu.memory_space<vmem>>, vector<3x128xf32>
    tpu.vector_store %arg13[%c6_201, %c0_202], %155 {strides = array<i32>} : memref<32x128xf32, #tpu.memory_space<vmem>>, vector<3x128xf32>,
    %157 = vector.extract_strided_slice %149 {offsets = [3, 0], sizes = [3, 128], strides = [1, 1]} : vector<6x128xf32> to vector<3x128xf32>
    %cst_203 = arith.constant 0.000000e+00 : f32
    %158 = vector.broadcast %cst_203 : f32 to vector<3x128xf32>
    %159 = arith.maximumf %157, %158 : vector<3x128xf32>
    %160 = vector.broadcast %cst_203 : f32 to vector<3x128xf32>
    %161 = arith.subf %157, %160 : vector<3x128xf32>
    %162 = arith.cmpf one, %161, %161 : vector<3x128xf32>
    %163 = vector.broadcast %cst_203 : f32 to vector<3x128xf32>
    %164 = arith.addf %157, %163 : vector<3x128xf32>
    %165 = math.absf %161 : vector<3x128xf32>
    %cst_204 = arith.constant 0.000000e+00 : f32
    %166 = vector.broadcast %cst_204 : f32 to vector<3x128xf32>
    %167 = arith.subf %166, %165 : vector<3x128xf32>
    %168 = math.exp %167 : vector<3x128xf32>
    %169 = math.log1p %168 : vector<3x128xf32>
    %170 = arith.addf %159, %169 : vector<3x128xf32>
    %171 = arith.select %162, %164, %170 : vector<3x128xi1>, vector<3x128xf32>
    %c15 = arith.constant 15 : index
    %c0_205 = arith.constant 0 : index
    %172 = vector.load %arg13[%c15, %c0_205] : memref<32x128xf32, #tpu.memory_space<vmem>>, vector<3x128xf32>
    tpu.vector_store %arg13[%c15, %c0_205], %171 {strides = array<i32>} : memref<32x128xf32, #tpu.memory_space<vmem>>, vector<3x128xf32>,
    %173 = vector.extract_strided_slice %99 {offsets = [2, 0], sizes = [2, 128], strides = [1, 1]} : vector<8x128xf32> to vector<2x128xf32>
    %174 = math.tanh %173 : vector<2x128xf32>
    %c2_206 = arith.constant 2 : index
    %c0_207 = arith.constant 0 : index
    %175 = vector.load %arg13[%c2_206, %c0_207] : memref<32x128xf32, #tpu.memory_space<vmem>>, vector<2x128xf32>
    tpu.vector_store %arg13[%c2_206, %c0_207], %174 {strides = array<i32>} : memref<32x128xf32, #tpu.memory_space<vmem>>, vector<2x128xf32>,
    %c0_208 = arith.constant 0 : index
    %c0_209 = arith.constant 0 : index
    %176 = vector.load %arg12[%c0_208, %c0_209] : memref<3x128xf32, #tpu.memory_space<vmem>>, vector<2x128xf32>
    tpu.vector_store %arg12[%c0_208, %c0_209], %174 {strides = array<i32>} : memref<3x128xf32, #tpu.memory_space<vmem>>, vector<2x128xf32>,
    %c8 = arith.constant 8 : index
    %c0_210 = arith.constant 0 : index
    %c0_211 = arith.constant 0 : index
    %177 = vector.load %arg7[%c8, %c0_210, %c0_211] : memref<20x2x128xf32, #tpu.memory_space<vmem>>, vector<1x1x32xf32>
    %178 = vector.shape_cast %177 : vector<1x1x32xf32> to vector<1x32xf32>
    %c0_212 = arith.constant 0 : index
    %c0_213 = arith.constant 0 : index
    %179 = vector.load %arg10[%c0_212, %c0_213] : memref<3x64xf32, #tpu.memory_space<vmem>>, vector<1x32xf32>
    tpu.vector_store %arg10[%c0_212, %c0_213], %178 {strides = array<i32>} : memref<3x64xf32, #tpu.memory_space<vmem>>, vector<1x32xf32>,
    %c8_214 = arith.constant 8 : index
    %c0_215 = arith.constant 0 : index
    %c32_216 = arith.constant 32 : index
    %180 = vector.load %arg7[%c8_214, %c0_215, %c32_216] : memref<20x2x128xf32, #tpu.memory_space<vmem>>, vector<1x1x32xf32>
    %181 = vector.shape_cast %180 : vector<1x1x32xf32> to vector<1x32xf32>
    %c1_217 = arith.constant 1 : index
    %c0_218 = arith.constant 0 : index
    %182 = vector.load %arg10[%c1_217, %c0_218] : memref<3x64xf32, #tpu.memory_space<vmem>>, vector<1x32xf32>
    tpu.vector_store %arg10[%c1_217, %c0_218], %181 {strides = array<i32>} : memref<3x64xf32, #tpu.memory_space<vmem>>, vector<1x32xf32>,
    %c10 = arith.constant 10 : index
    %c0_219 = arith.constant 0 : index
    %c0_220 = arith.constant 0 : index
    %183 = vector.load %arg7[%c10, %c0_219, %c0_220] : memref<20x2x128xf32, #tpu.memory_space<vmem>>, vector<1x1x32xf32>
    %184 = vector.shape_cast %183 : vector<1x1x32xf32> to vector<1x32xf32>
    %c0_221 = arith.constant 0 : index
    %c32_222 = arith.constant 32 : index
    %185 = vector.load %arg10[%c0_221, %c32_222] : memref<3x64xf32, #tpu.memory_space<vmem>>, vector<1x32xf32>
    tpu.vector_store %arg10[%c0_221, %c32_222], %184 {strides = array<i32>} : memref<3x64xf32, #tpu.memory_space<vmem>>, vector<1x32xf32>,
    %c10_223 = arith.constant 10 : index
    %c0_224 = arith.constant 0 : index
    %c32_225 = arith.constant 32 : index
    %186 = vector.load %arg7[%c10_223, %c0_224, %c32_225] : memref<20x2x128xf32, #tpu.memory_space<vmem>>, vector<1x1x32xf32>
    %187 = vector.shape_cast %186 : vector<1x1x32xf32> to vector<1x32xf32>
    %c1_226 = arith.constant 1 : index
    %c32_227 = arith.constant 32 : index
    %188 = vector.load %arg10[%c1_226, %c32_227] : memref<3x64xf32, #tpu.memory_space<vmem>>, vector<1x32xf32>
    tpu.vector_store %arg10[%c1_226, %c32_227], %187 {strides = array<i32>} : memref<3x64xf32, #tpu.memory_space<vmem>>, vector<1x32xf32>,
    %c10_228 = arith.constant 10 : index
    %c0_229 = arith.constant 0 : index
    %c64_230 = arith.constant 64 : index
    %189 = vector.load %arg7[%c10_228, %c0_229, %c64_230] : memref<20x2x128xf32, #tpu.memory_space<vmem>>, vector<1x1x32xf32>
    %190 = vector.shape_cast %189 : vector<1x1x32xf32> to vector<1x32xf32>
    %c2_231 = arith.constant 2 : index
    %c32_232 = arith.constant 32 : index
    %191 = vector.load %arg10[%c2_231, %c32_232] : memref<3x64xf32, #tpu.memory_space<vmem>>, vector<1x32xf32>
    tpu.vector_store %arg10[%c2_231, %c32_232], %190 {strides = array<i32>} : memref<3x64xf32, #tpu.memory_space<vmem>>, vector<1x32xf32>,
    %c0_233 = arith.constant 0 : index
    %c0_234 = arith.constant 0 : index
    %192 = vector.load %arg10[%c0_233, %c0_234] : memref<3x64xf32, #tpu.memory_space<vmem>>, vector<3x64xf32>
    %c0_235 = arith.constant 0 : index
    %c0_236 = arith.constant 0 : index
    %193 = vector.load %arg12[%c0_235, %c0_236] : memref<3x128xf32, #tpu.memory_space<vmem>>, vector<3x128xf32>
    %cst_237 = arith.constant dense<0.000000e+00> : vector<64x128xf32>
    %194 = tpu.matmul %192, %193, %cst_237 {dimension_numbers = #tpu.dot_dimension_numbers<[0], [0], [1], [1], [0, 1, 1, 1], [], []>} : vector<3x64xf32>, vector<3x128xf32>, vector<64x128xf32> -> vector<64x128xf32>
    %cst_238 = arith.constant 0.000000e+00 : f32
    %195 = vector.broadcast %cst_238 : f32 to vector<64x128xf32>
    %196 = arith.maximumf %194, %195 : vector<64x128xf32>
    %c9 = arith.constant 9 : index
    %c0_239 = arith.constant 0 : index
    %c0_240 = arith.constant 0 : index
    %197 = vector.load %arg7[%c9, %c0_239, %c0_240] : memref<20x2x128xf32, #tpu.memory_space<vmem>>, vector<1x1x32xf32>
    %198 = vector.shape_cast %197 : vector<1x1x32xf32> to vector<1x32xf32>
    %c0_241 = arith.constant 0 : index
    %c0_242 = arith.constant 0 : index
    %199 = vector.load %arg11[%c0_241, %c0_242] : memref<6x64xf32, #tpu.memory_space<vmem>>, vector<1x32xf32>
    tpu.vector_store %arg11[%c0_241, %c0_242], %198 {strides = array<i32>} : memref<6x64xf32, #tpu.memory_space<vmem>>, vector<1x32xf32>,
    %c11 = arith.constant 11 : index
    %c0_243 = arith.constant 0 : index
    %c0_244 = arith.constant 0 : index
    %200 = vector.load %arg7[%c11, %c0_243, %c0_244] : memref<20x2x128xf32, #tpu.memory_space<vmem>>, vector<1x1x32xf32>
    %201 = vector.shape_cast %200 : vector<1x1x32xf32> to vector<1x32xf32>
    %c3_245 = arith.constant 3 : index
    %c32_246 = arith.constant 32 : index
    %202 = vector.load %arg11[%c3_245, %c32_246] : memref<6x64xf32, #tpu.memory_space<vmem>>, vector<1x32xf32>
    tpu.vector_store %arg11[%c3_245, %c32_246], %201 {strides = array<i32>} : memref<6x64xf32, #tpu.memory_space<vmem>>, vector<1x32xf32>,
    %c9_247 = arith.constant 9 : index
    %c0_248 = arith.constant 0 : index
    %c32_249 = arith.constant 32 : index
    %203 = vector.load %arg7[%c9_247, %c0_248, %c32_249] : memref<20x2x128xf32, #tpu.memory_space<vmem>>, vector<1x1x32xf32>
    %204 = vector.shape_cast %203 : vector<1x1x32xf32> to vector<1x32xf32>
    %c1_250 = arith.constant 1 : index
    %c0_251 = arith.constant 0 : index
    %205 = vector.load %arg11[%c1_250, %c0_251] : memref<6x64xf32, #tpu.memory_space<vmem>>, vector<1x32xf32>
    tpu.vector_store %arg11[%c1_250, %c0_251], %204 {strides = array<i32>} : memref<6x64xf32, #tpu.memory_space<vmem>>, vector<1x32xf32>,
    %c11_252 = arith.constant 11 : index
    %c0_253 = arith.constant 0 : index
    %c32_254 = arith.constant 32 : index
    %206 = vector.load %arg7[%c11_252, %c0_253, %c32_254] : memref<20x2x128xf32, #tpu.memory_space<vmem>>, vector<1x1x32xf32>
    %207 = vector.shape_cast %206 : vector<1x1x32xf32> to vector<1x32xf32>
    %c4_255 = arith.constant 4 : index
    %c32_256 = arith.constant 32 : index
    %208 = vector.load %arg11[%c4_255, %c32_256] : memref<6x64xf32, #tpu.memory_space<vmem>>, vector<1x32xf32>
    tpu.vector_store %arg11[%c4_255, %c32_256], %207 {strides = array<i32>} : memref<6x64xf32, #tpu.memory_space<vmem>>, vector<1x32xf32>,
    %c9_257 = arith.constant 9 : index
    %c0_258 = arith.constant 0 : index
    %c64_259 = arith.constant 64 : index
    %209 = vector.load %arg7[%c9_257, %c0_258, %c64_259] : memref<20x2x128xf32, #tpu.memory_space<vmem>>, vector<1x1x32xf32>
    %210 = vector.shape_cast %209 : vector<1x1x32xf32> to vector<1x32xf32>
    %c2_260 = arith.constant 2 : index
    %c0_261 = arith.constant 0 : index
    %211 = vector.load %arg11[%c2_260, %c0_261] : memref<6x64xf32, #tpu.memory_space<vmem>>, vector<1x32xf32>
    tpu.vector_store %arg11[%c2_260, %c0_261], %210 {strides = array<i32>} : memref<6x64xf32, #tpu.memory_space<vmem>>, vector<1x32xf32>,
    %c11_262 = arith.constant 11 : index
    %c0_263 = arith.constant 0 : index
    %c64_264 = arith.constant 64 : index
    %212 = vector.load %arg7[%c11_262, %c0_263, %c64_264] : memref<20x2x128xf32, #tpu.memory_space<vmem>>, vector<1x1x32xf32>
    %213 = vector.shape_cast %212 : vector<1x1x32xf32> to vector<1x32xf32>
    %c5_265 = arith.constant 5 : index
    %c32_266 = arith.constant 32 : index
    %214 = vector.load %arg11[%c5_265, %c32_266] : memref<6x64xf32, #tpu.memory_space<vmem>>, vector<1x32xf32>
    tpu.vector_store %arg11[%c5_265, %c32_266], %213 {strides = array<i32>} : memref<6x64xf32, #tpu.memory_space<vmem>>, vector<1x32xf32>,
    %c0_267 = arith.constant 0 : index
    %c0_268 = arith.constant 0 : index
    %215 = vector.load %arg11[%c0_267, %c0_268] : memref<6x64xf32, #tpu.memory_space<vmem>>, vector<6x64xf32>
    %cst_269 = arith.constant dense<0.000000e+00> : vector<6x128xf32>
    %216 = tpu.matmul %215, %196, %cst_269 {dimension_numbers = #tpu.dot_dimension_numbers<[1], [0], [0], [1], [0, 0, 1, 1], [], []>} : vector<6x64xf32>, vector<64x128xf32>, vector<6x128xf32> -> vector<6x128xf32>
    %217 = vector.extract_strided_slice %216 {offsets = [0, 0], sizes = [3, 128], strides = [1, 1]} : vector<6x128xf32> to vector<3x128xf32>
    %218 = math.tanh %217 : vector<3x128xf32>
    %cst_270 = arith.constant 1.000000e+00 : f32
    %219 = vector.broadcast %cst_270 : f32 to vector<3x128xf32>
    %220 = arith.addf %218, %219 : vector<3x128xf32>
    %cst_271 = arith.constant 5.000000e-01 : f32
    %221 = vector.broadcast %cst_271 : f32 to vector<3x128xf32>
    %222 = arith.mulf %220, %221 : vector<3x128xf32>
    %c9_272 = arith.constant 9 : index
    %c0_273 = arith.constant 0 : index
    %223 = vector.load %arg13[%c9_272, %c0_273] : memref<32x128xf32, #tpu.memory_space<vmem>>, vector<3x128xf32>
    tpu.vector_store %arg13[%c9_272, %c0_273], %222 {strides = array<i32>} : memref<32x128xf32, #tpu.memory_space<vmem>>, vector<3x128xf32>,
    %224 = vector.extract_strided_slice %216 {offsets = [3, 0], sizes = [3, 128], strides = [1, 1]} : vector<6x128xf32> to vector<3x128xf32>
    %cst_274 = arith.constant 0.000000e+00 : f32
    %225 = vector.broadcast %cst_274 : f32 to vector<3x128xf32>
    %226 = arith.maximumf %224, %225 : vector<3x128xf32>
    %227 = vector.broadcast %cst_274 : f32 to vector<3x128xf32>
    %228 = arith.subf %224, %227 : vector<3x128xf32>
    %229 = arith.cmpf one, %228, %228 : vector<3x128xf32>
    %230 = vector.broadcast %cst_274 : f32 to vector<3x128xf32>
    %231 = arith.addf %224, %230 : vector<3x128xf32>
    %232 = math.absf %228 : vector<3x128xf32>
    %cst_275 = arith.constant 0.000000e+00 : f32
    %233 = vector.broadcast %cst_275 : f32 to vector<3x128xf32>
    %234 = arith.subf %233, %232 : vector<3x128xf32>
    %235 = math.exp %234 : vector<3x128xf32>
    %236 = math.log1p %235 : vector<3x128xf32>
    %237 = arith.addf %226, %236 : vector<3x128xf32>
    %238 = arith.select %229, %231, %237 : vector<3x128xi1>, vector<3x128xf32>
    %c18_276 = arith.constant 18 : index
    %c0_277 = arith.constant 0 : index
    %239 = vector.load %arg13[%c18_276, %c0_277] : memref<32x128xf32, #tpu.memory_space<vmem>>, vector<3x128xf32>
    tpu.vector_store %arg13[%c18_276, %c0_277], %238 {strides = array<i32>} : memref<32x128xf32, #tpu.memory_space<vmem>>, vector<3x128xf32>,
    %240 = vector.extract_strided_slice %99 {offsets = [4, 0], sizes = [2, 128], strides = [1, 1]} : vector<8x128xf32> to vector<2x128xf32>
    %241 = math.tanh %240 : vector<2x128xf32>
    %c4_278 = arith.constant 4 : index
    %c0_279 = arith.constant 0 : index
    %242 = vector.load %arg13[%c4_278, %c0_279] : memref<32x128xf32, #tpu.memory_space<vmem>>, vector<2x128xf32>
    tpu.vector_store %arg13[%c4_278, %c0_279], %241 {strides = array<i32>} : memref<32x128xf32, #tpu.memory_space<vmem>>, vector<2x128xf32>,
    %c0_280 = arith.constant 0 : index
    %c0_281 = arith.constant 0 : index
    %243 = vector.load %arg12[%c0_280, %c0_281] : memref<3x128xf32, #tpu.memory_space<vmem>>, vector<2x128xf32>
    tpu.vector_store %arg12[%c0_280, %c0_281], %241 {strides = array<i32>} : memref<3x128xf32, #tpu.memory_space<vmem>>, vector<2x128xf32>,
    %c14 = arith.constant 14 : index
    %c0_282 = arith.constant 0 : index
    %c0_283 = arith.constant 0 : index
    %244 = vector.load %arg7[%c14, %c0_282, %c0_283] : memref<20x2x128xf32, #tpu.memory_space<vmem>>, vector<1x1x32xf32>
    %245 = vector.shape_cast %244 : vector<1x1x32xf32> to vector<1x32xf32>
    %c0_284 = arith.constant 0 : index
    %c0_285 = arith.constant 0 : index
    %246 = vector.load %arg10[%c0_284, %c0_285] : memref<3x64xf32, #tpu.memory_space<vmem>>, vector<1x32xf32>
    tpu.vector_store %arg10[%c0_284, %c0_285], %245 {strides = array<i32>} : memref<3x64xf32, #tpu.memory_space<vmem>>, vector<1x32xf32>,
    %c14_286 = arith.constant 14 : index
    %c0_287 = arith.constant 0 : index
    %c32_288 = arith.constant 32 : index
    %247 = vector.load %arg7[%c14_286, %c0_287, %c32_288] : memref<20x2x128xf32, #tpu.memory_space<vmem>>, vector<1x1x32xf32>
    %248 = vector.shape_cast %247 : vector<1x1x32xf32> to vector<1x32xf32>
    %c1_289 = arith.constant 1 : index
    %c0_290 = arith.constant 0 : index
    %249 = vector.load %arg10[%c1_289, %c0_290] : memref<3x64xf32, #tpu.memory_space<vmem>>, vector<1x32xf32>
    tpu.vector_store %arg10[%c1_289, %c0_290], %248 {strides = array<i32>} : memref<3x64xf32, #tpu.memory_space<vmem>>, vector<1x32xf32>,
    %c16 = arith.constant 16 : index
    %c0_291 = arith.constant 0 : index
    %c0_292 = arith.constant 0 : index
    %250 = vector.load %arg7[%c16, %c0_291, %c0_292] : memref<20x2x128xf32, #tpu.memory_space<vmem>>, vector<1x1x32xf32>
    %251 = vector.shape_cast %250 : vector<1x1x32xf32> to vector<1x32xf32>
    %c0_293 = arith.constant 0 : index
    %c32_294 = arith.constant 32 : index
    %252 = vector.load %arg10[%c0_293, %c32_294] : memref<3x64xf32, #tpu.memory_space<vmem>>, vector<1x32xf32>
    tpu.vector_store %arg10[%c0_293, %c32_294], %251 {strides = array<i32>} : memref<3x64xf32, #tpu.memory_space<vmem>>, vector<1x32xf32>,
    %c16_295 = arith.constant 16 : index
    %c0_296 = arith.constant 0 : index
    %c32_297 = arith.constant 32 : index
    %253 = vector.load %arg7[%c16_295, %c0_296, %c32_297] : memref<20x2x128xf32, #tpu.memory_space<vmem>>, vector<1x1x32xf32>
    %254 = vector.shape_cast %253 : vector<1x1x32xf32> to vector<1x32xf32>
    %c1_298 = arith.constant 1 : index
    %c32_299 = arith.constant 32 : index
    %255 = vector.load %arg10[%c1_298, %c32_299] : memref<3x64xf32, #tpu.memory_space<vmem>>, vector<1x32xf32>
    tpu.vector_store %arg10[%c1_298, %c32_299], %254 {strides = array<i32>} : memref<3x64xf32, #tpu.memory_space<vmem>>, vector<1x32xf32>,
    %c16_300 = arith.constant 16 : index
    %c0_301 = arith.constant 0 : index
    %c64_302 = arith.constant 64 : index
    %256 = vector.load %arg7[%c16_300, %c0_301, %c64_302] : memref<20x2x128xf32, #tpu.memory_space<vmem>>, vector<1x1x32xf32>
    %257 = vector.shape_cast %256 : vector<1x1x32xf32> to vector<1x32xf32>
    %c2_303 = arith.constant 2 : index
    %c32_304 = arith.constant 32 : index
    %258 = vector.load %arg10[%c2_303, %c32_304] : memref<3x64xf32, #tpu.memory_space<vmem>>, vector<1x32xf32>
    tpu.vector_store %arg10[%c2_303, %c32_304], %257 {strides = array<i32>} : memref<3x64xf32, #tpu.memory_space<vmem>>, vector<1x32xf32>,
    %c0_305 = arith.constant 0 : index
    %c0_306 = arith.constant 0 : index
    %259 = vector.load %arg10[%c0_305, %c0_306] : memref<3x64xf32, #tpu.memory_space<vmem>>, vector<3x64xf32>
    %c0_307 = arith.constant 0 : index
    %c0_308 = arith.constant 0 : index
    %260 = vector.load %arg12[%c0_307, %c0_308] : memref<3x128xf32, #tpu.memory_space<vmem>>, vector<3x128xf32>
    %cst_309 = arith.constant dense<0.000000e+00> : vector<64x128xf32>
    %261 = tpu.matmul %259, %260, %cst_309 {dimension_numbers = #tpu.dot_dimension_numbers<[0], [0], [1], [1], [0, 1, 1, 1], [], []>} : vector<3x64xf32>, vector<3x128xf32>, vector<64x128xf32> -> vector<64x128xf32>
    %cst_310 = arith.constant 0.000000e+00 : f32
    %262 = vector.broadcast %cst_310 : f32 to vector<64x128xf32>
    %263 = arith.maximumf %261, %262 : vector<64x128xf32>
    %c15_311 = arith.constant 15 : index
    %c0_312 = arith.constant 0 : index
    %c0_313 = arith.constant 0 : index
    %264 = vector.load %arg7[%c15_311, %c0_312, %c0_313] : memref<20x2x128xf32, #tpu.memory_space<vmem>>, vector<1x1x32xf32>
    %265 = vector.shape_cast %264 : vector<1x1x32xf32> to vector<1x32xf32>
    %c0_314 = arith.constant 0 : index
    %c0_315 = arith.constant 0 : index
    %266 = vector.load %arg11[%c0_314, %c0_315] : memref<6x64xf32, #tpu.memory_space<vmem>>, vector<1x32xf32>
    tpu.vector_store %arg11[%c0_314, %c0_315], %265 {strides = array<i32>} : memref<6x64xf32, #tpu.memory_space<vmem>>, vector<1x32xf32>,
    %c17 = arith.constant 17 : index
    %c0_316 = arith.constant 0 : index
    %c0_317 = arith.constant 0 : index
    %267 = vector.load %arg7[%c17, %c0_316, %c0_317] : memref<20x2x128xf32, #tpu.memory_space<vmem>>, vector<1x1x32xf32>
    %268 = vector.shape_cast %267 : vector<1x1x32xf32> to vector<1x32xf32>
    %c3_318 = arith.constant 3 : index
    %c32_319 = arith.constant 32 : index
    %269 = vector.load %arg11[%c3_318, %c32_319] : memref<6x64xf32, #tpu.memory_space<vmem>>, vector<1x32xf32>
    tpu.vector_store %arg11[%c3_318, %c32_319], %268 {strides = array<i32>} : memref<6x64xf32, #tpu.memory_space<vmem>>, vector<1x32xf32>,
    %c15_320 = arith.constant 15 : index
    %c0_321 = arith.constant 0 : index
    %c32_322 = arith.constant 32 : index
    %270 = vector.load %arg7[%c15_320, %c0_321, %c32_322] : memref<20x2x128xf32, #tpu.memory_space<vmem>>, vector<1x1x32xf32>
    %271 = vector.shape_cast %270 : vector<1x1x32xf32> to vector<1x32xf32>
    %c1_323 = arith.constant 1 : index
    %c0_324 = arith.constant 0 : index
    %272 = vector.load %arg11[%c1_323, %c0_324] : memref<6x64xf32, #tpu.memory_space<vmem>>, vector<1x32xf32>
    tpu.vector_store %arg11[%c1_323, %c0_324], %271 {strides = array<i32>} : memref<6x64xf32, #tpu.memory_space<vmem>>, vector<1x32xf32>,
    %c17_325 = arith.constant 17 : index
    %c0_326 = arith.constant 0 : index
    %c32_327 = arith.constant 32 : index
    %273 = vector.load %arg7[%c17_325, %c0_326, %c32_327] : memref<20x2x128xf32, #tpu.memory_space<vmem>>, vector<1x1x32xf32>
    %274 = vector.shape_cast %273 : vector<1x1x32xf32> to vector<1x32xf32>
    %c4_328 = arith.constant 4 : index
    %c32_329 = arith.constant 32 : index
    %275 = vector.load %arg11[%c4_328, %c32_329] : memref<6x64xf32, #tpu.memory_space<vmem>>, vector<1x32xf32>
    tpu.vector_store %arg11[%c4_328, %c32_329], %274 {strides = array<i32>} : memref<6x64xf32, #tpu.memory_space<vmem>>, vector<1x32xf32>,
    %c15_330 = arith.constant 15 : index
    %c0_331 = arith.constant 0 : index
    %c64_332 = arith.constant 64 : index
    %276 = vector.load %arg7[%c15_330, %c0_331, %c64_332] : memref<20x2x128xf32, #tpu.memory_space<vmem>>, vector<1x1x32xf32>
    %277 = vector.shape_cast %276 : vector<1x1x32xf32> to vector<1x32xf32>
    %c2_333 = arith.constant 2 : index
    %c0_334 = arith.constant 0 : index
    %278 = vector.load %arg11[%c2_333, %c0_334] : memref<6x64xf32, #tpu.memory_space<vmem>>, vector<1x32xf32>
    tpu.vector_store %arg11[%c2_333, %c0_334], %277 {strides = array<i32>} : memref<6x64xf32, #tpu.memory_space<vmem>>, vector<1x32xf32>,
    %c17_335 = arith.constant 17 : index
    %c0_336 = arith.constant 0 : index
    %c64_337 = arith.constant 64 : index
    %279 = vector.load %arg7[%c17_335, %c0_336, %c64_337] : memref<20x2x128xf32, #tpu.memory_space<vmem>>, vector<1x1x32xf32>
    %280 = vector.shape_cast %279 : vector<1x1x32xf32> to vector<1x32xf32>
    %c5_338 = arith.constant 5 : index
    %c32_339 = arith.constant 32 : index
    %281 = vector.load %arg11[%c5_338, %c32_339] : memref<6x64xf32, #tpu.memory_space<vmem>>, vector<1x32xf32>
    tpu.vector_store %arg11[%c5_338, %c32_339], %280 {strides = array<i32>} : memref<6x64xf32, #tpu.memory_space<vmem>>, vector<1x32xf32>,
    %c0_340 = arith.constant 0 : index
    %c0_341 = arith.constant 0 : index
    %282 = vector.load %arg11[%c0_340, %c0_341] : memref<6x64xf32, #tpu.memory_space<vmem>>, vector<6x64xf32>
    %cst_342 = arith.constant dense<0.000000e+00> : vector<6x128xf32>
    %283 = tpu.matmul %282, %263, %cst_342 {dimension_numbers = #tpu.dot_dimension_numbers<[1], [0], [0], [1], [0, 0, 1, 1], [], []>} : vector<6x64xf32>, vector<64x128xf32>, vector<6x128xf32> -> vector<6x128xf32>
    %284 = vector.extract_strided_slice %283 {offsets = [0, 0], sizes = [3, 128], strides = [1, 1]} : vector<6x128xf32> to vector<3x128xf32>
    %285 = math.tanh %284 : vector<3x128xf32>
    %cst_343 = arith.constant 1.000000e+00 : f32
    %286 = vector.broadcast %cst_343 : f32 to vector<3x128xf32>
    %287 = arith.addf %285, %286 : vector<3x128xf32>
    %cst_344 = arith.constant 5.000000e-01 : f32
    %288 = vector.broadcast %cst_344 : f32 to vector<3x128xf32>
    %289 = arith.mulf %287, %288 : vector<3x128xf32>
    %c12_345 = arith.constant 12 : index
    %c0_346 = arith.constant 0 : index
    %290 = vector.load %arg13[%c12_345, %c0_346] : memref<32x128xf32, #tpu.memory_space<vmem>>, vector<3x128xf32>
    tpu.vector_store %arg13[%c12_345, %c0_346], %289 {strides = array<i32>} : memref<32x128xf32, #tpu.memory_space<vmem>>, vector<3x128xf32>,
    %291 = vector.extract_strided_slice %283 {offsets = [3, 0], sizes = [3, 128], strides = [1, 1]} : vector<6x128xf32> to vector<3x128xf32>
    %cst_347 = arith.constant 0.000000e+00 : f32
    %292 = vector.broadcast %cst_347 : f32 to vector<3x128xf32>
    %293 = arith.maximumf %291, %292 : vector<3x128xf32>
    %294 = vector.broadcast %cst_347 : f32 to vector<3x128xf32>
    %295 = arith.subf %291, %294 : vector<3x128xf32>
    %296 = arith.cmpf one, %295, %295 : vector<3x128xf32>
    %297 = vector.broadcast %cst_347 : f32 to vector<3x128xf32>
    %298 = arith.addf %291, %297 : vector<3x128xf32>
    %299 = math.absf %295 : vector<3x128xf32>
    %cst_348 = arith.constant 0.000000e+00 : f32
    %300 = vector.broadcast %cst_348 : f32 to vector<3x128xf32>
    %301 = arith.subf %300, %299 : vector<3x128xf32>
    %302 = math.exp %301 : vector<3x128xf32>
    %303 = math.log1p %302 : vector<3x128xf32>
    %304 = arith.addf %293, %303 : vector<3x128xf32>
    %305 = arith.select %296, %298, %304 : vector<3x128xi1>, vector<3x128xf32>
    %c21 = arith.constant 21 : index
    %c0_349 = arith.constant 0 : index
    %306 = vector.load %arg13[%c21, %c0_349] : memref<32x128xf32, #tpu.memory_space<vmem>>, vector<3x128xf32>
    tpu.vector_store %arg13[%c21, %c0_349], %305 {strides = array<i32>} : memref<32x128xf32, #tpu.memory_space<vmem>>, vector<3x128xf32>,
    %307 = vector.extract_strided_slice %105 {offsets = [0, 0], sizes = [1, 128], strides = [1, 1]} : vector<2x128xf32> to vector<1x128xf32>
    %308 = vector.extract_strided_slice %105 {offsets = [1, 0], sizes = [1, 128], strides = [1, 1]} : vector<2x128xf32> to vector<1x128xf32>
    %cst_350 = arith.constant 1.000000e+00 : f32
    %309 = vector.broadcast %cst_350 : f32 to vector<1x128xf32>
    %310 = arith.subf %309, %307 : vector<1x128xf32>
    %cst_351 = arith.constant 9.99999974E-6 : f32
    %cst_352 = arith.constant 0.999989986 : f32
    %311 = vector.broadcast %cst_351 : f32 to vector<1x128xf32>
    %312 = arith.maximumf %311, %307 : vector<1x128xf32>
    %313 = vector.broadcast %cst_352 : f32 to vector<1x128xf32>
    %314 = arith.minimumf %313, %312 : vector<1x128xf32>
    %c24 = arith.constant 24 : index
    %c0_353 = arith.constant 0 : index
    %315 = vector.load %arg13[%c24, %c0_353] : memref<32x128xf32, #tpu.memory_space<vmem>>, vector<1x128xf32>
    tpu.vector_store %arg13[%c24, %c0_353], %314 {strides = array<i32>} : memref<32x128xf32, #tpu.memory_space<vmem>>, vector<1x128xf32>,
    %316 = arith.mulf %308, %310 : vector<1x128xf32>
    %cst_354 = arith.constant 9.99999974E-6 : f32
    %cst_355 = arith.constant 0.999989986 : f32
    %317 = vector.broadcast %cst_354 : f32 to vector<1x128xf32>
    %318 = arith.maximumf %317, %316 : vector<1x128xf32>
    %319 = vector.broadcast %cst_355 : f32 to vector<1x128xf32>
    %320 = arith.minimumf %319, %318 : vector<1x128xf32>
    %c25 = arith.constant 25 : index
    %c0_356 = arith.constant 0 : index
    %321 = vector.load %arg13[%c25, %c0_356] : memref<32x128xf32, #tpu.memory_space<vmem>>, vector<1x128xf32>
    tpu.vector_store %arg13[%c25, %c0_356], %320 {strides = array<i32>} : memref<32x128xf32, #tpu.memory_space<vmem>>, vector<1x128xf32>,
    %cst_357 = arith.constant 1.000000e+00 : f32
    %322 = vector.broadcast %cst_357 : f32 to vector<1x128xf32>
    %323 = arith.subf %322, %308 : vector<1x128xf32>
    %324 = arith.mulf %310, %323 : vector<1x128xf32>
    %cst_358 = arith.constant 9.99999974E-6 : f32
    %cst_359 = arith.constant 0.999989986 : f32
    %325 = vector.broadcast %cst_358 : f32 to vector<1x128xf32>
    %326 = arith.maximumf %325, %324 : vector<1x128xf32>
    %327 = vector.broadcast %cst_359 : f32 to vector<1x128xf32>
    %328 = arith.minimumf %327, %326 : vector<1x128xf32>
    %c26 = arith.constant 26 : index
    %c0_360 = arith.constant 0 : index
    %329 = vector.load %arg13[%c26, %c0_360] : memref<32x128xf32, #tpu.memory_space<vmem>>, vector<1x128xf32>
    tpu.vector_store %arg13[%c26, %c0_360], %328 {strides = array<i32>} : memref<32x128xf32, #tpu.memory_space<vmem>>, vector<1x128xf32>,
    %330 = tpu.iota {dimensions = array<i32: 0>} : vector<128x128xi32>
    %331 = tpu.iota {dimensions = array<i32: 1>} : vector<128x128xi32>
    %332 = arith.cmpi eq, %330, %331 : vector<128x128xi32>
    %333 = arith.extui %332 : vector<128x128xi1> to vector<128x128xi32>
    %334 = arith.sitofp %333 : vector<128x128xi32> to vector<128x128xf32>
    %c0_361 = arith.constant 0 : index
    %c0_362 = arith.constant 0 : index
    %335 = vector.load %arg13[%c0_361, %c0_362] : memref<32x128xf32, #tpu.memory_space<vmem>>, vector<32x128xf32>
    %cst_363 = arith.constant dense<0.000000e+00> : vector<128x32xf32>
    %336 = tpu.matmul %334, %335, %cst_363 {dimension_numbers = #tpu.dot_dimension_numbers<[1], [1], [0], [0], [0, 0, 1, 0], [], []>} : vector<128x128xf32>, vector<32x128xf32>, vector<128x32xf32> -> vector<128x32xf32>
    %c0_364 = arith.constant 0 : index
    %c0_365 = arith.constant 0 : index
    %c0_366 = arith.constant 0 : index
    %337 = vector.load %arg6[%c0_364, %c0_365, %c0_366] : memref<2x128x32xf32, #tpu.memory_space<vmem>>, vector<1x128x32xf32>
    %338 = vector.shape_cast %337 : vector<1x128x32xf32> to vector<128x32xf32>
    %339 = vector.shape_cast %336 : vector<128x32xf32> to vector<1x128x32xf32>
    tpu.vector_store %arg6[%c0_364, %c0_365, %c0_366], %339 {strides = array<i32>} : memref<2x128x32xf32, #tpu.memory_space<vmem>>, vector<1x128x32xf32>,
    %340 = tpu.iota {dimensions = array<i32: 0>} : vector<3x3xi32>
    %341 = tpu.iota {dimensions = array<i32: 1>} : vector<3x3xi32>
    %342 = arith.cmpi eq, %340, %341 : vector<3x3xi32>
    %343 = arith.extui %342 : vector<3x3xi1> to vector<3x3xi32>
    %344 = arith.sitofp %343 : vector<3x3xi32> to vector<3x3xf32>
    %c1_367 = arith.constant 1 : index
    %c0_368 = arith.constant 0 : index
    %c0_369 = arith.constant 0 : index
    %345 = vector.load %arg1[%c1_367, %c0_368, %c0_369] : memref<2x128x3xf32, #tpu.memory_space<vmem>>, vector<1x128x3xf32>
    %346 = vector.shape_cast %345 : vector<1x128x3xf32> to vector<128x3xf32>
    %cst_370 = arith.constant dense<0.000000e+00> : vector<3x128xf32>
    %347 = tpu.matmul %344, %346, %cst_370 {dimension_numbers = #tpu.dot_dimension_numbers<[1], [1], [0], [0], [0, 0, 1, 0], [], []>} : vector<3x3xf32>, vector<128x3xf32>, vector<3x128xf32> -> vector<3x128xf32>
    %348 = vector.extract_strided_slice %347 {offsets = [1, 0], sizes = [1, 128], strides = [1, 1]} : vector<3x128xf32> to vector<1x128xf32>
    %c2_371 = arith.constant 2 : index
    %c0_372 = arith.constant 0 : index
    %349 = vector.load %arg12[%c2_371, %c0_372] : memref<3x128xf32, #tpu.memory_space<vmem>>, vector<1x128xf32>
    tpu.vector_store %arg12[%c2_371, %c0_372], %348 {strides = array<i32>} : memref<3x128xf32, #tpu.memory_space<vmem>>, vector<1x128xf32>,
    %c0_373 = arith.constant 0 : index
    %c1_374 = arith.constant 1 : index
    %c0_375 = arith.constant 0 : index
    %350 = vector.load %arg7[%c0_373, %c1_374, %c0_375] : memref<20x2x128xf32, #tpu.memory_space<vmem>>, vector<1x1x32xf32>
    %351 = vector.shape_cast %350 : vector<1x1x32xf32> to vector<1x32xf32>
    %c0_376 = arith.constant 0 : index
    %c0_377 = arith.constant 0 : index
    %352 = vector.load %arg8[%c0_376, %c0_377] : memref<3x128xf32, #tpu.memory_space<vmem>>, vector<1x32xf32>
    tpu.vector_store %arg8[%c0_376, %c0_377], %351 {strides = array<i32>} : memref<3x128xf32, #tpu.memory_space<vmem>>, vector<1x32xf32>,
    %c6_378 = arith.constant 6 : index
    %c1_379 = arith.constant 1 : index
    %c0_380 = arith.constant 0 : index
    %353 = vector.load %arg7[%c6_378, %c1_379, %c0_380] : memref<20x2x128xf32, #tpu.memory_space<vmem>>, vector<1x1x32xf32>
    %354 = vector.shape_cast %353 : vector<1x1x32xf32> to vector<1x32xf32>
    %c0_381 = arith.constant 0 : index
    %c32_382 = arith.constant 32 : index
    %355 = vector.load %arg8[%c0_381, %c32_382] : memref<3x128xf32, #tpu.memory_space<vmem>>, vector<1x32xf32>
    tpu.vector_store %arg8[%c0_381, %c32_382], %354 {strides = array<i32>} : memref<3x128xf32, #tpu.memory_space<vmem>>, vector<1x32xf32>,
    %c12_383 = arith.constant 12 : index
    %c1_384 = arith.constant 1 : index
    %c0_385 = arith.constant 0 : index
    %356 = vector.load %arg7[%c12_383, %c1_384, %c0_385] : memref<20x2x128xf32, #tpu.memory_space<vmem>>, vector<1x1x32xf32>
    %357 = vector.shape_cast %356 : vector<1x1x32xf32> to vector<1x32xf32>
    %c0_386 = arith.constant 0 : index
    %c64_387 = arith.constant 64 : index
    %358 = vector.load %arg8[%c0_386, %c64_387] : memref<3x128xf32, #tpu.memory_space<vmem>>, vector<1x32xf32>
    tpu.vector_store %arg8[%c0_386, %c64_387], %357 {strides = array<i32>} : memref<3x128xf32, #tpu.memory_space<vmem>>, vector<1x32xf32>,
    %c18_388 = arith.constant 18 : index
    %c1_389 = arith.constant 1 : index
    %c0_390 = arith.constant 0 : index
    %359 = vector.load %arg7[%c18_388, %c1_389, %c0_390] : memref<20x2x128xf32, #tpu.memory_space<vmem>>, vector<1x1x32xf32>
    %360 = vector.shape_cast %359 : vector<1x1x32xf32> to vector<1x32xf32>
    %c0_391 = arith.constant 0 : index
    %c96_392 = arith.constant 96 : index
    %361 = vector.load %arg8[%c0_391, %c96_392] : memref<3x128xf32, #tpu.memory_space<vmem>>, vector<1x32xf32>
    tpu.vector_store %arg8[%c0_391, %c96_392], %360 {strides = array<i32>} : memref<3x128xf32, #tpu.memory_space<vmem>>, vector<1x32xf32>,
    %c0_393 = arith.constant 0 : index
    %c1_394 = arith.constant 1 : index
    %c32_395 = arith.constant 32 : index
    %362 = vector.load %arg7[%c0_393, %c1_394, %c32_395] : memref<20x2x128xf32, #tpu.memory_space<vmem>>, vector<1x1x32xf32>
    %363 = vector.shape_cast %362 : vector<1x1x32xf32> to vector<1x32xf32>
    %c1_396 = arith.constant 1 : index
    %c0_397 = arith.constant 0 : index
    %364 = vector.load %arg8[%c1_396, %c0_397] : memref<3x128xf32, #tpu.memory_space<vmem>>, vector<1x32xf32>
    tpu.vector_store %arg8[%c1_396, %c0_397], %363 {strides = array<i32>} : memref<3x128xf32, #tpu.memory_space<vmem>>, vector<1x32xf32>,
    %c6_398 = arith.constant 6 : index
    %c1_399 = arith.constant 1 : index
    %c32_400 = arith.constant 32 : index
    %365 = vector.load %arg7[%c6_398, %c1_399, %c32_400] : memref<20x2x128xf32, #tpu.memory_space<vmem>>, vector<1x1x32xf32>
    %366 = vector.shape_cast %365 : vector<1x1x32xf32> to vector<1x32xf32>
    %c1_401 = arith.constant 1 : index
    %c32_402 = arith.constant 32 : index
    %367 = vector.load %arg8[%c1_401, %c32_402] : memref<3x128xf32, #tpu.memory_space<vmem>>, vector<1x32xf32>
    tpu.vector_store %arg8[%c1_401, %c32_402], %366 {strides = array<i32>} : memref<3x128xf32, #tpu.memory_space<vmem>>, vector<1x32xf32>,
    %c12_403 = arith.constant 12 : index
    %c1_404 = arith.constant 1 : index
    %c32_405 = arith.constant 32 : index
    %368 = vector.load %arg7[%c12_403, %c1_404, %c32_405] : memref<20x2x128xf32, #tpu.memory_space<vmem>>, vector<1x1x32xf32>
    %369 = vector.shape_cast %368 : vector<1x1x32xf32> to vector<1x32xf32>
    %c1_406 = arith.constant 1 : index
    %c64_407 = arith.constant 64 : index
    %370 = vector.load %arg8[%c1_406, %c64_407] : memref<3x128xf32, #tpu.memory_space<vmem>>, vector<1x32xf32>
    tpu.vector_store %arg8[%c1_406, %c64_407], %369 {strides = array<i32>} : memref<3x128xf32, #tpu.memory_space<vmem>>, vector<1x32xf32>,
    %c18_408 = arith.constant 18 : index
    %c1_409 = arith.constant 1 : index
    %c32_410 = arith.constant 32 : index
    %371 = vector.load %arg7[%c18_408, %c1_409, %c32_410] : memref<20x2x128xf32, #tpu.memory_space<vmem>>, vector<1x1x32xf32>
    %372 = vector.shape_cast %371 : vector<1x1x32xf32> to vector<1x32xf32>
    %c1_411 = arith.constant 1 : index
    %c96_412 = arith.constant 96 : index
    %373 = vector.load %arg8[%c1_411, %c96_412] : memref<3x128xf32, #tpu.memory_space<vmem>>, vector<1x32xf32>
    tpu.vector_store %arg8[%c1_411, %c96_412], %372 {strides = array<i32>} : memref<3x128xf32, #tpu.memory_space<vmem>>, vector<1x32xf32>,
    %c0_413 = arith.constant 0 : index
    %c1_414 = arith.constant 1 : index
    %c64_415 = arith.constant 64 : index
    %374 = vector.load %arg7[%c0_413, %c1_414, %c64_415] : memref<20x2x128xf32, #tpu.memory_space<vmem>>, vector<1x1x32xf32>
    %375 = vector.shape_cast %374 : vector<1x1x32xf32> to vector<1x32xf32>
    %c2_416 = arith.constant 2 : index
    %c0_417 = arith.constant 0 : index
    %376 = vector.load %arg8[%c2_416, %c0_417] : memref<3x128xf32, #tpu.memory_space<vmem>>, vector<1x32xf32>
    tpu.vector_store %arg8[%c2_416, %c0_417], %375 {strides = array<i32>} : memref<3x128xf32, #tpu.memory_space<vmem>>, vector<1x32xf32>,
    %c6_418 = arith.constant 6 : index
    %c1_419 = arith.constant 1 : index
    %c64_420 = arith.constant 64 : index
    %377 = vector.load %arg7[%c6_418, %c1_419, %c64_420] : memref<20x2x128xf32, #tpu.memory_space<vmem>>, vector<1x1x32xf32>
    %378 = vector.shape_cast %377 : vector<1x1x32xf32> to vector<1x32xf32>
    %c2_421 = arith.constant 2 : index
    %c32_422 = arith.constant 32 : index
    %379 = vector.load %arg8[%c2_421, %c32_422] : memref<3x128xf32, #tpu.memory_space<vmem>>, vector<1x32xf32>
    tpu.vector_store %arg8[%c2_421, %c32_422], %378 {strides = array<i32>} : memref<3x128xf32, #tpu.memory_space<vmem>>, vector<1x32xf32>,
    %c12_423 = arith.constant 12 : index
    %c1_424 = arith.constant 1 : index
    %c64_425 = arith.constant 64 : index
    %380 = vector.load %arg7[%c12_423, %c1_424, %c64_425] : memref<20x2x128xf32, #tpu.memory_space<vmem>>, vector<1x1x32xf32>
    %381 = vector.shape_cast %380 : vector<1x1x32xf32> to vector<1x32xf32>
    %c2_426 = arith.constant 2 : index
    %c64_427 = arith.constant 64 : index
    %382 = vector.load %arg8[%c2_426, %c64_427] : memref<3x128xf32, #tpu.memory_space<vmem>>, vector<1x32xf32>
    tpu.vector_store %arg8[%c2_426, %c64_427], %381 {strides = array<i32>} : memref<3x128xf32, #tpu.memory_space<vmem>>, vector<1x32xf32>,
    %c18_428 = arith.constant 18 : index
    %c1_429 = arith.constant 1 : index
    %c64_430 = arith.constant 64 : index
    %383 = vector.load %arg7[%c18_428, %c1_429, %c64_430] : memref<20x2x128xf32, #tpu.memory_space<vmem>>, vector<1x1x32xf32>
    %384 = vector.shape_cast %383 : vector<1x1x32xf32> to vector<1x32xf32>
    %c2_431 = arith.constant 2 : index
    %c96_432 = arith.constant 96 : index
    %385 = vector.load %arg8[%c2_431, %c96_432] : memref<3x128xf32, #tpu.memory_space<vmem>>, vector<1x32xf32>
    tpu.vector_store %arg8[%c2_431, %c96_432], %384 {strides = array<i32>} : memref<3x128xf32, #tpu.memory_space<vmem>>, vector<1x32xf32>,
    %c0_433 = arith.constant 0 : index
    %c0_434 = arith.constant 0 : index
    %386 = vector.load %arg8[%c0_433, %c0_434] : memref<3x128xf32, #tpu.memory_space<vmem>>, vector<3x128xf32>
    %cst_435 = arith.constant dense<0.000000e+00> : vector<128x128xf32>
    %387 = tpu.matmul %386, %347, %cst_435 {dimension_numbers = #tpu.dot_dimension_numbers<[0], [0], [1], [1], [0, 1, 1, 1], [], []>} : vector<3x128xf32>, vector<3x128xf32>, vector<128x128xf32> -> vector<128x128xf32>
    %cst_436 = arith.constant 0.000000e+00 : f32
    %388 = vector.broadcast %cst_436 : f32 to vector<128x128xf32>
    %389 = arith.maximumf %387, %388 : vector<128x128xf32>
    %c1_437 = arith.constant 1 : index
    %c1_438 = arith.constant 1 : index
    %c0_439 = arith.constant 0 : index
    %390 = vector.load %arg7[%c1_437, %c1_438, %c0_439] : memref<20x2x128xf32, #tpu.memory_space<vmem>>, vector<1x1x32xf32>
    %391 = vector.shape_cast %390 : vector<1x1x32xf32> to vector<1x32xf32>
    %c0_440 = arith.constant 0 : index
    %c0_441 = arith.constant 0 : index
    %392 = vector.load %arg9[%c0_440, %c0_441] : memref<8x128xf32, #tpu.memory_space<vmem>>, vector<1x32xf32>
    tpu.vector_store %arg9[%c0_440, %c0_441], %391 {strides = array<i32>} : memref<8x128xf32, #tpu.memory_space<vmem>>, vector<1x32xf32>,
    %c1_442 = arith.constant 1 : index
    %c1_443 = arith.constant 1 : index
    %c32_444 = arith.constant 32 : index
    %393 = vector.load %arg7[%c1_442, %c1_443, %c32_444] : memref<20x2x128xf32, #tpu.memory_space<vmem>>, vector<1x1x32xf32>
    %394 = vector.shape_cast %393 : vector<1x1x32xf32> to vector<1x32xf32>
    %c1_445 = arith.constant 1 : index
    %c0_446 = arith.constant 0 : index
    %395 = vector.load %arg9[%c1_445, %c0_446] : memref<8x128xf32, #tpu.memory_space<vmem>>, vector<1x32xf32>
    tpu.vector_store %arg9[%c1_445, %c0_446], %394 {strides = array<i32>} : memref<8x128xf32, #tpu.memory_space<vmem>>, vector<1x32xf32>,
    %c7_447 = arith.constant 7 : index
    %c1_448 = arith.constant 1 : index
    %c0_449 = arith.constant 0 : index
    %396 = vector.load %arg7[%c7_447, %c1_448, %c0_449] : memref<20x2x128xf32, #tpu.memory_space<vmem>>, vector<1x1x32xf32>
    %397 = vector.shape_cast %396 : vector<1x1x32xf32> to vector<1x32xf32>
    %c2_450 = arith.constant 2 : index
    %c32_451 = arith.constant 32 : index
    %398 = vector.load %arg9[%c2_450, %c32_451] : memref<8x128xf32, #tpu.memory_space<vmem>>, vector<1x32xf32>
    tpu.vector_store %arg9[%c2_450, %c32_451], %397 {strides = array<i32>} : memref<8x128xf32, #tpu.memory_space<vmem>>, vector<1x32xf32>,
    %c7_452 = arith.constant 7 : index
    %c1_453 = arith.constant 1 : index
    %c32_454 = arith.constant 32 : index
    %399 = vector.load %arg7[%c7_452, %c1_453, %c32_454] : memref<20x2x128xf32, #tpu.memory_space<vmem>>, vector<1x1x32xf32>
    %400 = vector.shape_cast %399 : vector<1x1x32xf32> to vector<1x32xf32>
    %c3_455 = arith.constant 3 : index
    %c32_456 = arith.constant 32 : index
    %401 = vector.load %arg9[%c3_455, %c32_456] : memref<8x128xf32, #tpu.memory_space<vmem>>, vector<1x32xf32>
    tpu.vector_store %arg9[%c3_455, %c32_456], %400 {strides = array<i32>} : memref<8x128xf32, #tpu.memory_space<vmem>>, vector<1x32xf32>,
    %c13_457 = arith.constant 13 : index
    %c1_458 = arith.constant 1 : index
    %c0_459 = arith.constant 0 : index
    %402 = vector.load %arg7[%c13_457, %c1_458, %c0_459] : memref<20x2x128xf32, #tpu.memory_space<vmem>>, vector<1x1x32xf32>
    %403 = vector.shape_cast %402 : vector<1x1x32xf32> to vector<1x32xf32>
    %c4_460 = arith.constant 4 : index
    %c64_461 = arith.constant 64 : index
    %404 = vector.load %arg9[%c4_460, %c64_461] : memref<8x128xf32, #tpu.memory_space<vmem>>, vector<1x32xf32>
    tpu.vector_store %arg9[%c4_460, %c64_461], %403 {strides = array<i32>} : memref<8x128xf32, #tpu.memory_space<vmem>>, vector<1x32xf32>,
    %c13_462 = arith.constant 13 : index
    %c1_463 = arith.constant 1 : index
    %c32_464 = arith.constant 32 : index
    %405 = vector.load %arg7[%c13_462, %c1_463, %c32_464] : memref<20x2x128xf32, #tpu.memory_space<vmem>>, vector<1x1x32xf32>
    %406 = vector.shape_cast %405 : vector<1x1x32xf32> to vector<1x32xf32>
    %c5_465 = arith.constant 5 : index
    %c64_466 = arith.constant 64 : index
    %407 = vector.load %arg9[%c5_465, %c64_466] : memref<8x128xf32, #tpu.memory_space<vmem>>, vector<1x32xf32>
    tpu.vector_store %arg9[%c5_465, %c64_466], %406 {strides = array<i32>} : memref<8x128xf32, #tpu.memory_space<vmem>>, vector<1x32xf32>,
    %c19_467 = arith.constant 19 : index
    %c1_468 = arith.constant 1 : index
    %c0_469 = arith.constant 0 : index
    %408 = vector.load %arg7[%c19_467, %c1_468, %c0_469] : memref<20x2x128xf32, #tpu.memory_space<vmem>>, vector<1x1x32xf32>
    %409 = vector.shape_cast %408 : vector<1x1x32xf32> to vector<1x32xf32>
    %c6_470 = arith.constant 6 : index
    %c96_471 = arith.constant 96 : index
    %410 = vector.load %arg9[%c6_470, %c96_471] : memref<8x128xf32, #tpu.memory_space<vmem>>, vector<1x32xf32>
    tpu.vector_store %arg9[%c6_470, %c96_471], %409 {strides = array<i32>} : memref<8x128xf32, #tpu.memory_space<vmem>>, vector<1x32xf32>,
    %c19_472 = arith.constant 19 : index
    %c1_473 = arith.constant 1 : index
    %c32_474 = arith.constant 32 : index
    %411 = vector.load %arg7[%c19_472, %c1_473, %c32_474] : memref<20x2x128xf32, #tpu.memory_space<vmem>>, vector<1x1x32xf32>
    %412 = vector.shape_cast %411 : vector<1x1x32xf32> to vector<1x32xf32>
    %c7_475 = arith.constant 7 : index
    %c96_476 = arith.constant 96 : index
    %413 = vector.load %arg9[%c7_475, %c96_476] : memref<8x128xf32, #tpu.memory_space<vmem>>, vector<1x32xf32>
    tpu.vector_store %arg9[%c7_475, %c96_476], %412 {strides = array<i32>} : memref<8x128xf32, #tpu.memory_space<vmem>>, vector<1x32xf32>,
    %c0_477 = arith.constant 0 : index
    %c0_478 = arith.constant 0 : index
    %414 = vector.load %arg9[%c0_477, %c0_478] : memref<8x128xf32, #tpu.memory_space<vmem>>, vector<8x128xf32>
    %cst_479 = arith.constant dense<0.000000e+00> : vector<8x128xf32>
    %415 = tpu.matmul %414, %389, %cst_479 {dimension_numbers = #tpu.dot_dimension_numbers<[1], [0], [0], [1], [0, 0, 1, 1], [], []>} : vector<8x128xf32>, vector<128x128xf32>, vector<8x128xf32> -> vector<8x128xf32>
    %416 = vector.extract_strided_slice %415 {offsets = [6, 0], sizes = [2, 128], strides = [1, 1]} : vector<8x128xf32> to vector<2x128xf32>
    %417 = math.tanh %416 : vector<2x128xf32>
    %cst_480 = arith.constant 1.000000e+00 : f32
    %418 = vector.broadcast %cst_480 : f32 to vector<2x128xf32>
    %419 = arith.addf %417, %418 : vector<2x128xf32>
    %cst_481 = arith.constant 5.000000e-01 : f32
    %420 = vector.broadcast %cst_481 : f32 to vector<2x128xf32>
    %421 = arith.mulf %419, %420 : vector<2x128xf32>
    %422 = vector.extract_strided_slice %415 {offsets = [0, 0], sizes = [2, 128], strides = [1, 1]} : vector<8x128xf32> to vector<2x128xf32>
    %423 = math.tanh %422 : vector<2x128xf32>
    %c0_482 = arith.constant 0 : index
    %c0_483 = arith.constant 0 : index
    %424 = vector.load %arg13[%c0_482, %c0_483] : memref<32x128xf32, #tpu.memory_space<vmem>>, vector<2x128xf32>
    tpu.vector_store %arg13[%c0_482, %c0_483], %423 {strides = array<i32>} : memref<32x128xf32, #tpu.memory_space<vmem>>, vector<2x128xf32>,
    %c0_484 = arith.constant 0 : index
    %c0_485 = arith.constant 0 : index
    %425 = vector.load %arg12[%c0_484, %c0_485] : memref<3x128xf32, #tpu.memory_space<vmem>>, vector<2x128xf32>
    tpu.vector_store %arg12[%c0_484, %c0_485], %423 {strides = array<i32>} : memref<3x128xf32, #tpu.memory_space<vmem>>, vector<2x128xf32>,
    %c2_486 = arith.constant 2 : index
    %c1_487 = arith.constant 1 : index
    %c0_488 = arith.constant 0 : index
    %426 = vector.load %arg7[%c2_486, %c1_487, %c0_488] : memref<20x2x128xf32, #tpu.memory_space<vmem>>, vector<1x1x32xf32>
    %427 = vector.shape_cast %426 : vector<1x1x32xf32> to vector<1x32xf32>
    %c0_489 = arith.constant 0 : index
    %c0_490 = arith.constant 0 : index
    %428 = vector.load %arg10[%c0_489, %c0_490] : memref<3x64xf32, #tpu.memory_space<vmem>>, vector<1x32xf32>
    tpu.vector_store %arg10[%c0_489, %c0_490], %427 {strides = array<i32>} : memref<3x64xf32, #tpu.memory_space<vmem>>, vector<1x32xf32>,
    %c2_491 = arith.constant 2 : index
    %c1_492 = arith.constant 1 : index
    %c32_493 = arith.constant 32 : index
    %429 = vector.load %arg7[%c2_491, %c1_492, %c32_493] : memref<20x2x128xf32, #tpu.memory_space<vmem>>, vector<1x1x32xf32>
    %430 = vector.shape_cast %429 : vector<1x1x32xf32> to vector<1x32xf32>
    %c1_494 = arith.constant 1 : index
    %c0_495 = arith.constant 0 : index
    %431 = vector.load %arg10[%c1_494, %c0_495] : memref<3x64xf32, #tpu.memory_space<vmem>>, vector<1x32xf32>
    tpu.vector_store %arg10[%c1_494, %c0_495], %430 {strides = array<i32>} : memref<3x64xf32, #tpu.memory_space<vmem>>, vector<1x32xf32>,
    %c4_496 = arith.constant 4 : index
    %c1_497 = arith.constant 1 : index
    %c0_498 = arith.constant 0 : index
    %432 = vector.load %arg7[%c4_496, %c1_497, %c0_498] : memref<20x2x128xf32, #tpu.memory_space<vmem>>, vector<1x1x32xf32>
    %433 = vector.shape_cast %432 : vector<1x1x32xf32> to vector<1x32xf32>
    %c0_499 = arith.constant 0 : index
    %c32_500 = arith.constant 32 : index
    %434 = vector.load %arg10[%c0_499, %c32_500] : memref<3x64xf32, #tpu.memory_space<vmem>>, vector<1x32xf32>
    tpu.vector_store %arg10[%c0_499, %c32_500], %433 {strides = array<i32>} : memref<3x64xf32, #tpu.memory_space<vmem>>, vector<1x32xf32>,
    %c4_501 = arith.constant 4 : index
    %c1_502 = arith.constant 1 : index
    %c32_503 = arith.constant 32 : index
    %435 = vector.load %arg7[%c4_501, %c1_502, %c32_503] : memref<20x2x128xf32, #tpu.memory_space<vmem>>, vector<1x1x32xf32>
    %436 = vector.shape_cast %435 : vector<1x1x32xf32> to vector<1x32xf32>
    %c1_504 = arith.constant 1 : index
    %c32_505 = arith.constant 32 : index
    %437 = vector.load %arg10[%c1_504, %c32_505] : memref<3x64xf32, #tpu.memory_space<vmem>>, vector<1x32xf32>
    tpu.vector_store %arg10[%c1_504, %c32_505], %436 {strides = array<i32>} : memref<3x64xf32, #tpu.memory_space<vmem>>, vector<1x32xf32>,
    %c4_506 = arith.constant 4 : index
    %c1_507 = arith.constant 1 : index
    %c64_508 = arith.constant 64 : index
    %438 = vector.load %arg7[%c4_506, %c1_507, %c64_508] : memref<20x2x128xf32, #tpu.memory_space<vmem>>, vector<1x1x32xf32>
    %439 = vector.shape_cast %438 : vector<1x1x32xf32> to vector<1x32xf32>
    %c2_509 = arith.constant 2 : index
    %c32_510 = arith.constant 32 : index
    %440 = vector.load %arg10[%c2_509, %c32_510] : memref<3x64xf32, #tpu.memory_space<vmem>>, vector<1x32xf32>
    tpu.vector_store %arg10[%c2_509, %c32_510], %439 {strides = array<i32>} : memref<3x64xf32, #tpu.memory_space<vmem>>, vector<1x32xf32>,
    %c0_511 = arith.constant 0 : index
    %c0_512 = arith.constant 0 : index
    %441 = vector.load %arg10[%c0_511, %c0_512] : memref<3x64xf32, #tpu.memory_space<vmem>>, vector<3x64xf32>
    %c0_513 = arith.constant 0 : index
    %c0_514 = arith.constant 0 : index
    %442 = vector.load %arg12[%c0_513, %c0_514] : memref<3x128xf32, #tpu.memory_space<vmem>>, vector<3x128xf32>
    %cst_515 = arith.constant dense<0.000000e+00> : vector<64x128xf32>
    %443 = tpu.matmul %441, %442, %cst_515 {dimension_numbers = #tpu.dot_dimension_numbers<[0], [0], [1], [1], [0, 1, 1, 1], [], []>} : vector<3x64xf32>, vector<3x128xf32>, vector<64x128xf32> -> vector<64x128xf32>
    %cst_516 = arith.constant 0.000000e+00 : f32
    %444 = vector.broadcast %cst_516 : f32 to vector<64x128xf32>
    %445 = arith.maximumf %443, %444 : vector<64x128xf32>
    %c3_517 = arith.constant 3 : index
    %c1_518 = arith.constant 1 : index
    %c0_519 = arith.constant 0 : index
    %446 = vector.load %arg7[%c3_517, %c1_518, %c0_519] : memref<20x2x128xf32, #tpu.memory_space<vmem>>, vector<1x1x32xf32>
    %447 = vector.shape_cast %446 : vector<1x1x32xf32> to vector<1x32xf32>
    %c0_520 = arith.constant 0 : index
    %c0_521 = arith.constant 0 : index
    %448 = vector.load %arg11[%c0_520, %c0_521] : memref<6x64xf32, #tpu.memory_space<vmem>>, vector<1x32xf32>
    tpu.vector_store %arg11[%c0_520, %c0_521], %447 {strides = array<i32>} : memref<6x64xf32, #tpu.memory_space<vmem>>, vector<1x32xf32>,
    %c5_522 = arith.constant 5 : index
    %c1_523 = arith.constant 1 : index
    %c0_524 = arith.constant 0 : index
    %449 = vector.load %arg7[%c5_522, %c1_523, %c0_524] : memref<20x2x128xf32, #tpu.memory_space<vmem>>, vector<1x1x32xf32>
    %450 = vector.shape_cast %449 : vector<1x1x32xf32> to vector<1x32xf32>
    %c3_525 = arith.constant 3 : index
    %c32_526 = arith.constant 32 : index
    %451 = vector.load %arg11[%c3_525, %c32_526] : memref<6x64xf32, #tpu.memory_space<vmem>>, vector<1x32xf32>
    tpu.vector_store %arg11[%c3_525, %c32_526], %450 {strides = array<i32>} : memref<6x64xf32, #tpu.memory_space<vmem>>, vector<1x32xf32>,
    %c3_527 = arith.constant 3 : index
    %c1_528 = arith.constant 1 : index
    %c32_529 = arith.constant 32 : index
    %452 = vector.load %arg7[%c3_527, %c1_528, %c32_529] : memref<20x2x128xf32, #tpu.memory_space<vmem>>, vector<1x1x32xf32>
    %453 = vector.shape_cast %452 : vector<1x1x32xf32> to vector<1x32xf32>
    %c1_530 = arith.constant 1 : index
    %c0_531 = arith.constant 0 : index
    %454 = vector.load %arg11[%c1_530, %c0_531] : memref<6x64xf32, #tpu.memory_space<vmem>>, vector<1x32xf32>
    tpu.vector_store %arg11[%c1_530, %c0_531], %453 {strides = array<i32>} : memref<6x64xf32, #tpu.memory_space<vmem>>, vector<1x32xf32>,
    %c5_532 = arith.constant 5 : index
    %c1_533 = arith.constant 1 : index
    %c32_534 = arith.constant 32 : index
    %455 = vector.load %arg7[%c5_532, %c1_533, %c32_534] : memref<20x2x128xf32, #tpu.memory_space<vmem>>, vector<1x1x32xf32>
    %456 = vector.shape_cast %455 : vector<1x1x32xf32> to vector<1x32xf32>
    %c4_535 = arith.constant 4 : index
    %c32_536 = arith.constant 32 : index
    %457 = vector.load %arg11[%c4_535, %c32_536] : memref<6x64xf32, #tpu.memory_space<vmem>>, vector<1x32xf32>
    tpu.vector_store %arg11[%c4_535, %c32_536], %456 {strides = array<i32>} : memref<6x64xf32, #tpu.memory_space<vmem>>, vector<1x32xf32>,
    %c3_537 = arith.constant 3 : index
    %c1_538 = arith.constant 1 : index
    %c64_539 = arith.constant 64 : index
    %458 = vector.load %arg7[%c3_537, %c1_538, %c64_539] : memref<20x2x128xf32, #tpu.memory_space<vmem>>, vector<1x1x32xf32>
    %459 = vector.shape_cast %458 : vector<1x1x32xf32> to vector<1x32xf32>
    %c2_540 = arith.constant 2 : index
    %c0_541 = arith.constant 0 : index
    %460 = vector.load %arg11[%c2_540, %c0_541] : memref<6x64xf32, #tpu.memory_space<vmem>>, vector<1x32xf32>
    tpu.vector_store %arg11[%c2_540, %c0_541], %459 {strides = array<i32>} : memref<6x64xf32, #tpu.memory_space<vmem>>, vector<1x32xf32>,
    %c5_542 = arith.constant 5 : index
    %c1_543 = arith.constant 1 : index
    %c64_544 = arith.constant 64 : index
    %461 = vector.load %arg7[%c5_542, %c1_543, %c64_544] : memref<20x2x128xf32, #tpu.memory_space<vmem>>, vector<1x1x32xf32>
    %462 = vector.shape_cast %461 : vector<1x1x32xf32> to vector<1x32xf32>
    %c5_545 = arith.constant 5 : index
    %c32_546 = arith.constant 32 : index
    %463 = vector.load %arg11[%c5_545, %c32_546] : memref<6x64xf32, #tpu.memory_space<vmem>>, vector<1x32xf32>
    tpu.vector_store %arg11[%c5_545, %c32_546], %462 {strides = array<i32>} : memref<6x64xf32, #tpu.memory_space<vmem>>, vector<1x32xf32>,
    %c0_547 = arith.constant 0 : index
    %c0_548 = arith.constant 0 : index
    %464 = vector.load %arg11[%c0_547, %c0_548] : memref<6x64xf32, #tpu.memory_space<vmem>>, vector<6x64xf32>
    %cst_549 = arith.constant dense<0.000000e+00> : vector<6x128xf32>
    %465 = tpu.matmul %464, %445, %cst_549 {dimension_numbers = #tpu.dot_dimension_numbers<[1], [0], [0], [1], [0, 0, 1, 1], [], []>} : vector<6x64xf32>, vector<64x128xf32>, vector<6x128xf32> -> vector<6x128xf32>
    %466 = vector.extract_strided_slice %465 {offsets = [0, 0], sizes = [3, 128], strides = [1, 1]} : vector<6x128xf32> to vector<3x128xf32>
    %467 = math.tanh %466 : vector<3x128xf32>
    %cst_550 = arith.constant 1.000000e+00 : f32
    %468 = vector.broadcast %cst_550 : f32 to vector<3x128xf32>
    %469 = arith.addf %467, %468 : vector<3x128xf32>
    %cst_551 = arith.constant 5.000000e-01 : f32
    %470 = vector.broadcast %cst_551 : f32 to vector<3x128xf32>
    %471 = arith.mulf %469, %470 : vector<3x128xf32>
    %c6_552 = arith.constant 6 : index
    %c0_553 = arith.constant 0 : index
    %472 = vector.load %arg13[%c6_552, %c0_553] : memref<32x128xf32, #tpu.memory_space<vmem>>, vector<3x128xf32>
    tpu.vector_store %arg13[%c6_552, %c0_553], %471 {strides = array<i32>} : memref<32x128xf32, #tpu.memory_space<vmem>>, vector<3x128xf32>,
    %473 = vector.extract_strided_slice %465 {offsets = [3, 0], sizes = [3, 128], strides = [1, 1]} : vector<6x128xf32> to vector<3x128xf32>
    %cst_554 = arith.constant 0.000000e+00 : f32
    %474 = vector.broadcast %cst_554 : f32 to vector<3x128xf32>
    %475 = arith.maximumf %473, %474 : vector<3x128xf32>
    %476 = vector.broadcast %cst_554 : f32 to vector<3x128xf32>
    %477 = arith.subf %473, %476 : vector<3x128xf32>
    %478 = arith.cmpf one, %477, %477 : vector<3x128xf32>
    %479 = vector.broadcast %cst_554 : f32 to vector<3x128xf32>
    %480 = arith.addf %473, %479 : vector<3x128xf32>
    %481 = math.absf %477 : vector<3x128xf32>
    %cst_555 = arith.constant 0.000000e+00 : f32
    %482 = vector.broadcast %cst_555 : f32 to vector<3x128xf32>
    %483 = arith.subf %482, %481 : vector<3x128xf32>
    %484 = math.exp %483 : vector<3x128xf32>
    %485 = math.log1p %484 : vector<3x128xf32>
    %486 = arith.addf %475, %485 : vector<3x128xf32>
    %487 = arith.select %478, %480, %486 : vector<3x128xi1>, vector<3x128xf32>
    %c15_556 = arith.constant 15 : index
    %c0_557 = arith.constant 0 : index
    %488 = vector.load %arg13[%c15_556, %c0_557] : memref<32x128xf32, #tpu.memory_space<vmem>>, vector<3x128xf32>
    tpu.vector_store %arg13[%c15_556, %c0_557], %487 {strides = array<i32>} : memref<32x128xf32, #tpu.memory_space<vmem>>, vector<3x128xf32>,
    %489 = vector.extract_strided_slice %415 {offsets = [2, 0], sizes = [2, 128], strides = [1, 1]} : vector<8x128xf32> to vector<2x128xf32>
    %490 = math.tanh %489 : vector<2x128xf32>
    %c2_558 = arith.constant 2 : index
    %c0_559 = arith.constant 0 : index
    %491 = vector.load %arg13[%c2_558, %c0_559] : memref<32x128xf32, #tpu.memory_space<vmem>>, vector<2x128xf32>
    tpu.vector_store %arg13[%c2_558, %c0_559], %490 {strides = array<i32>} : memref<32x128xf32, #tpu.memory_space<vmem>>, vector<2x128xf32>,
    %c0_560 = arith.constant 0 : index
    %c0_561 = arith.constant 0 : index
    %492 = vector.load %arg12[%c0_560, %c0_561] : memref<3x128xf32, #tpu.memory_space<vmem>>, vector<2x128xf32>
    tpu.vector_store %arg12[%c0_560, %c0_561], %490 {strides = array<i32>} : memref<3x128xf32, #tpu.memory_space<vmem>>, vector<2x128xf32>,
    %c8_562 = arith.constant 8 : index
    %c1_563 = arith.constant 1 : index
    %c0_564 = arith.constant 0 : index
    %493 = vector.load %arg7[%c8_562, %c1_563, %c0_564] : memref<20x2x128xf32, #tpu.memory_space<vmem>>, vector<1x1x32xf32>
    %494 = vector.shape_cast %493 : vector<1x1x32xf32> to vector<1x32xf32>
    %c0_565 = arith.constant 0 : index
    %c0_566 = arith.constant 0 : index
    %495 = vector.load %arg10[%c0_565, %c0_566] : memref<3x64xf32, #tpu.memory_space<vmem>>, vector<1x32xf32>
    tpu.vector_store %arg10[%c0_565, %c0_566], %494 {strides = array<i32>} : memref<3x64xf32, #tpu.memory_space<vmem>>, vector<1x32xf32>,
    %c8_567 = arith.constant 8 : index
    %c1_568 = arith.constant 1 : index
    %c32_569 = arith.constant 32 : index
    %496 = vector.load %arg7[%c8_567, %c1_568, %c32_569] : memref<20x2x128xf32, #tpu.memory_space<vmem>>, vector<1x1x32xf32>
    %497 = vector.shape_cast %496 : vector<1x1x32xf32> to vector<1x32xf32>
    %c1_570 = arith.constant 1 : index
    %c0_571 = arith.constant 0 : index
    %498 = vector.load %arg10[%c1_570, %c0_571] : memref<3x64xf32, #tpu.memory_space<vmem>>, vector<1x32xf32>
    tpu.vector_store %arg10[%c1_570, %c0_571], %497 {strides = array<i32>} : memref<3x64xf32, #tpu.memory_space<vmem>>, vector<1x32xf32>,
    %c10_572 = arith.constant 10 : index
    %c1_573 = arith.constant 1 : index
    %c0_574 = arith.constant 0 : index
    %499 = vector.load %arg7[%c10_572, %c1_573, %c0_574] : memref<20x2x128xf32, #tpu.memory_space<vmem>>, vector<1x1x32xf32>
    %500 = vector.shape_cast %499 : vector<1x1x32xf32> to vector<1x32xf32>
    %c0_575 = arith.constant 0 : index
    %c32_576 = arith.constant 32 : index
    %501 = vector.load %arg10[%c0_575, %c32_576] : memref<3x64xf32, #tpu.memory_space<vmem>>, vector<1x32xf32>
    tpu.vector_store %arg10[%c0_575, %c32_576], %500 {strides = array<i32>} : memref<3x64xf32, #tpu.memory_space<vmem>>, vector<1x32xf32>,
    %c10_577 = arith.constant 10 : index
    %c1_578 = arith.constant 1 : index
    %c32_579 = arith.constant 32 : index
    %502 = vector.load %arg7[%c10_577, %c1_578, %c32_579] : memref<20x2x128xf32, #tpu.memory_space<vmem>>, vector<1x1x32xf32>
    %503 = vector.shape_cast %502 : vector<1x1x32xf32> to vector<1x32xf32>
    %c1_580 = arith.constant 1 : index
    %c32_581 = arith.constant 32 : index
    %504 = vector.load %arg10[%c1_580, %c32_581] : memref<3x64xf32, #tpu.memory_space<vmem>>, vector<1x32xf32>
    tpu.vector_store %arg10[%c1_580, %c32_581], %503 {strides = array<i32>} : memref<3x64xf32, #tpu.memory_space<vmem>>, vector<1x32xf32>,
    %c10_582 = arith.constant 10 : index
    %c1_583 = arith.constant 1 : index
    %c64_584 = arith.constant 64 : index
    %505 = vector.load %arg7[%c10_582, %c1_583, %c64_584] : memref<20x2x128xf32, #tpu.memory_space<vmem>>, vector<1x1x32xf32>
    %506 = vector.shape_cast %505 : vector<1x1x32xf32> to vector<1x32xf32>
    %c2_585 = arith.constant 2 : index
    %c32_586 = arith.constant 32 : index
    %507 = vector.load %arg10[%c2_585, %c32_586] : memref<3x64xf32, #tpu.memory_space<vmem>>, vector<1x32xf32>
    tpu.vector_store %arg10[%c2_585, %c32_586], %506 {strides = array<i32>} : memref<3x64xf32, #tpu.memory_space<vmem>>, vector<1x32xf32>,
    %c0_587 = arith.constant 0 : index
    %c0_588 = arith.constant 0 : index
    %508 = vector.load %arg10[%c0_587, %c0_588] : memref<3x64xf32, #tpu.memory_space<vmem>>, vector<3x64xf32>
    %c0_589 = arith.constant 0 : index
    %c0_590 = arith.constant 0 : index
    %509 = vector.load %arg12[%c0_589, %c0_590] : memref<3x128xf32, #tpu.memory_space<vmem>>, vector<3x128xf32>
    %cst_591 = arith.constant dense<0.000000e+00> : vector<64x128xf32>
    %510 = tpu.matmul %508, %509, %cst_591 {dimension_numbers = #tpu.dot_dimension_numbers<[0], [0], [1], [1], [0, 1, 1, 1], [], []>} : vector<3x64xf32>, vector<3x128xf32>, vector<64x128xf32> -> vector<64x128xf32>
    %cst_592 = arith.constant 0.000000e+00 : f32
    %511 = vector.broadcast %cst_592 : f32 to vector<64x128xf32>
    %512 = arith.maximumf %510, %511 : vector<64x128xf32>
    %c9_593 = arith.constant 9 : index
    %c1_594 = arith.constant 1 : index
    %c0_595 = arith.constant 0 : index
    %513 = vector.load %arg7[%c9_593, %c1_594, %c0_595] : memref<20x2x128xf32, #tpu.memory_space<vmem>>, vector<1x1x32xf32>
    %514 = vector.shape_cast %513 : vector<1x1x32xf32> to vector<1x32xf32>
    %c0_596 = arith.constant 0 : index
    %c0_597 = arith.constant 0 : index
    %515 = vector.load %arg11[%c0_596, %c0_597] : memref<6x64xf32, #tpu.memory_space<vmem>>, vector<1x32xf32>
    tpu.vector_store %arg11[%c0_596, %c0_597], %514 {strides = array<i32>} : memref<6x64xf32, #tpu.memory_space<vmem>>, vector<1x32xf32>,
    %c11_598 = arith.constant 11 : index
    %c1_599 = arith.constant 1 : index
    %c0_600 = arith.constant 0 : index
    %516 = vector.load %arg7[%c11_598, %c1_599, %c0_600] : memref<20x2x128xf32, #tpu.memory_space<vmem>>, vector<1x1x32xf32>
    %517 = vector.shape_cast %516 : vector<1x1x32xf32> to vector<1x32xf32>
    %c3_601 = arith.constant 3 : index
    %c32_602 = arith.constant 32 : index
    %518 = vector.load %arg11[%c3_601, %c32_602] : memref<6x64xf32, #tpu.memory_space<vmem>>, vector<1x32xf32>
    tpu.vector_store %arg11[%c3_601, %c32_602], %517 {strides = array<i32>} : memref<6x64xf32, #tpu.memory_space<vmem>>, vector<1x32xf32>,
    %c9_603 = arith.constant 9 : index
    %c1_604 = arith.constant 1 : index
    %c32_605 = arith.constant 32 : index
    %519 = vector.load %arg7[%c9_603, %c1_604, %c32_605] : memref<20x2x128xf32, #tpu.memory_space<vmem>>, vector<1x1x32xf32>
    %520 = vector.shape_cast %519 : vector<1x1x32xf32> to vector<1x32xf32>
    %c1_606 = arith.constant 1 : index
    %c0_607 = arith.constant 0 : index
    %521 = vector.load %arg11[%c1_606, %c0_607] : memref<6x64xf32, #tpu.memory_space<vmem>>, vector<1x32xf32>
    tpu.vector_store %arg11[%c1_606, %c0_607], %520 {strides = array<i32>} : memref<6x64xf32, #tpu.memory_space<vmem>>, vector<1x32xf32>,
    %c11_608 = arith.constant 11 : index
    %c1_609 = arith.constant 1 : index
    %c32_610 = arith.constant 32 : index
    %522 = vector.load %arg7[%c11_608, %c1_609, %c32_610] : memref<20x2x128xf32, #tpu.memory_space<vmem>>, vector<1x1x32xf32>
    %523 = vector.shape_cast %522 : vector<1x1x32xf32> to vector<1x32xf32>
    %c4_611 = arith.constant 4 : index
    %c32_612 = arith.constant 32 : index
    %524 = vector.load %arg11[%c4_611, %c32_612] : memref<6x64xf32, #tpu.memory_space<vmem>>, vector<1x32xf32>
    tpu.vector_store %arg11[%c4_611, %c32_612], %523 {strides = array<i32>} : memref<6x64xf32, #tpu.memory_space<vmem>>, vector<1x32xf32>,
    %c9_613 = arith.constant 9 : index
    %c1_614 = arith.constant 1 : index
    %c64_615 = arith.constant 64 : index
    %525 = vector.load %arg7[%c9_613, %c1_614, %c64_615] : memref<20x2x128xf32, #tpu.memory_space<vmem>>, vector<1x1x32xf32>
    %526 = vector.shape_cast %525 : vector<1x1x32xf32> to vector<1x32xf32>
    %c2_616 = arith.constant 2 : index
    %c0_617 = arith.constant 0 : index
    %527 = vector.load %arg11[%c2_616, %c0_617] : memref<6x64xf32, #tpu.memory_space<vmem>>, vector<1x32xf32>
    tpu.vector_store %arg11[%c2_616, %c0_617], %526 {strides = array<i32>} : memref<6x64xf32, #tpu.memory_space<vmem>>, vector<1x32xf32>,
    %c11_618 = arith.constant 11 : index
    %c1_619 = arith.constant 1 : index
    %c64_620 = arith.constant 64 : index
    %528 = vector.load %arg7[%c11_618, %c1_619, %c64_620] : memref<20x2x128xf32, #tpu.memory_space<vmem>>, vector<1x1x32xf32>
    %529 = vector.shape_cast %528 : vector<1x1x32xf32> to vector<1x32xf32>
    %c5_621 = arith.constant 5 : index
    %c32_622 = arith.constant 32 : index
    %530 = vector.load %arg11[%c5_621, %c32_622] : memref<6x64xf32, #tpu.memory_space<vmem>>, vector<1x32xf32>
    tpu.vector_store %arg11[%c5_621, %c32_622], %529 {strides = array<i32>} : memref<6x64xf32, #tpu.memory_space<vmem>>, vector<1x32xf32>,
    %c0_623 = arith.constant 0 : index
    %c0_624 = arith.constant 0 : index
    %531 = vector.load %arg11[%c0_623, %c0_624] : memref<6x64xf32, #tpu.memory_space<vmem>>, vector<6x64xf32>
    %cst_625 = arith.constant dense<0.000000e+00> : vector<6x128xf32>
    %532 = tpu.matmul %531, %512, %cst_625 {dimension_numbers = #tpu.dot_dimension_numbers<[1], [0], [0], [1], [0, 0, 1, 1], [], []>} : vector<6x64xf32>, vector<64x128xf32>, vector<6x128xf32> -> vector<6x128xf32>
    %533 = vector.extract_strided_slice %532 {offsets = [0, 0], sizes = [3, 128], strides = [1, 1]} : vector<6x128xf32> to vector<3x128xf32>
    %534 = math.tanh %533 : vector<3x128xf32>
    %cst_626 = arith.constant 1.000000e+00 : f32
    %535 = vector.broadcast %cst_626 : f32 to vector<3x128xf32>
    %536 = arith.addf %534, %535 : vector<3x128xf32>
    %cst_627 = arith.constant 5.000000e-01 : f32
    %537 = vector.broadcast %cst_627 : f32 to vector<3x128xf32>
    %538 = arith.mulf %536, %537 : vector<3x128xf32>
    %c9_628 = arith.constant 9 : index
    %c0_629 = arith.constant 0 : index
    %539 = vector.load %arg13[%c9_628, %c0_629] : memref<32x128xf32, #tpu.memory_space<vmem>>, vector<3x128xf32>
    tpu.vector_store %arg13[%c9_628, %c0_629], %538 {strides = array<i32>} : memref<32x128xf32, #tpu.memory_space<vmem>>, vector<3x128xf32>,
    %540 = vector.extract_strided_slice %532 {offsets = [3, 0], sizes = [3, 128], strides = [1, 1]} : vector<6x128xf32> to vector<3x128xf32>
    %cst_630 = arith.constant 0.000000e+00 : f32
    %541 = vector.broadcast %cst_630 : f32 to vector<3x128xf32>
    %542 = arith.maximumf %540, %541 : vector<3x128xf32>
    %543 = vector.broadcast %cst_630 : f32 to vector<3x128xf32>
    %544 = arith.subf %540, %543 : vector<3x128xf32>
    %545 = arith.cmpf one, %544, %544 : vector<3x128xf32>
    %546 = vector.broadcast %cst_630 : f32 to vector<3x128xf32>
    %547 = arith.addf %540, %546 : vector<3x128xf32>
    %548 = math.absf %544 : vector<3x128xf32>
    %cst_631 = arith.constant 0.000000e+00 : f32
    %549 = vector.broadcast %cst_631 : f32 to vector<3x128xf32>
    %550 = arith.subf %549, %548 : vector<3x128xf32>
    %551 = math.exp %550 : vector<3x128xf32>
    %552 = math.log1p %551 : vector<3x128xf32>
    %553 = arith.addf %542, %552 : vector<3x128xf32>
    %554 = arith.select %545, %547, %553 : vector<3x128xi1>, vector<3x128xf32>
    %c18_632 = arith.constant 18 : index
    %c0_633 = arith.constant 0 : index
    %555 = vector.load %arg13[%c18_632, %c0_633] : memref<32x128xf32, #tpu.memory_space<vmem>>, vector<3x128xf32>
    tpu.vector_store %arg13[%c18_632, %c0_633], %554 {strides = array<i32>} : memref<32x128xf32, #tpu.memory_space<vmem>>, vector<3x128xf32>,
    %556 = vector.extract_strided_slice %415 {offsets = [4, 0], sizes = [2, 128], strides = [1, 1]} : vector<8x128xf32> to vector<2x128xf32>
    %557 = math.tanh %556 : vector<2x128xf32>
    %c4_634 = arith.constant 4 : index
    %c0_635 = arith.constant 0 : index
    %558 = vector.load %arg13[%c4_634, %c0_635] : memref<32x128xf32, #tpu.memory_space<vmem>>, vector<2x128xf32>
    tpu.vector_store %arg13[%c4_634, %c0_635], %557 {strides = array<i32>} : memref<32x128xf32, #tpu.memory_space<vmem>>, vector<2x128xf32>,
    %c0_636 = arith.constant 0 : index
    %c0_637 = arith.constant 0 : index
    %559 = vector.load %arg12[%c0_636, %c0_637] : memref<3x128xf32, #tpu.memory_space<vmem>>, vector<2x128xf32>
    tpu.vector_store %arg12[%c0_636, %c0_637], %557 {strides = array<i32>} : memref<3x128xf32, #tpu.memory_space<vmem>>, vector<2x128xf32>,
    %c14_638 = arith.constant 14 : index
    %c1_639 = arith.constant 1 : index
    %c0_640 = arith.constant 0 : index
    %560 = vector.load %arg7[%c14_638, %c1_639, %c0_640] : memref<20x2x128xf32, #tpu.memory_space<vmem>>, vector<1x1x32xf32>
    %561 = vector.shape_cast %560 : vector<1x1x32xf32> to vector<1x32xf32>
    %c0_641 = arith.constant 0 : index
    %c0_642 = arith.constant 0 : index
    %562 = vector.load %arg10[%c0_641, %c0_642] : memref<3x64xf32, #tpu.memory_space<vmem>>, vector<1x32xf32>
    tpu.vector_store %arg10[%c0_641, %c0_642], %561 {strides = array<i32>} : memref<3x64xf32, #tpu.memory_space<vmem>>, vector<1x32xf32>,
    %c14_643 = arith.constant 14 : index
    %c1_644 = arith.constant 1 : index
    %c32_645 = arith.constant 32 : index
    %563 = vector.load %arg7[%c14_643, %c1_644, %c32_645] : memref<20x2x128xf32, #tpu.memory_space<vmem>>, vector<1x1x32xf32>
    %564 = vector.shape_cast %563 : vector<1x1x32xf32> to vector<1x32xf32>
    %c1_646 = arith.constant 1 : index
    %c0_647 = arith.constant 0 : index
    %565 = vector.load %arg10[%c1_646, %c0_647] : memref<3x64xf32, #tpu.memory_space<vmem>>, vector<1x32xf32>
    tpu.vector_store %arg10[%c1_646, %c0_647], %564 {strides = array<i32>} : memref<3x64xf32, #tpu.memory_space<vmem>>, vector<1x32xf32>,
    %c16_648 = arith.constant 16 : index
    %c1_649 = arith.constant 1 : index
    %c0_650 = arith.constant 0 : index
    %566 = vector.load %arg7[%c16_648, %c1_649, %c0_650] : memref<20x2x128xf32, #tpu.memory_space<vmem>>, vector<1x1x32xf32>
    %567 = vector.shape_cast %566 : vector<1x1x32xf32> to vector<1x32xf32>
    %c0_651 = arith.constant 0 : index
    %c32_652 = arith.constant 32 : index
    %568 = vector.load %arg10[%c0_651, %c32_652] : memref<3x64xf32, #tpu.memory_space<vmem>>, vector<1x32xf32>
    tpu.vector_store %arg10[%c0_651, %c32_652], %567 {strides = array<i32>} : memref<3x64xf32, #tpu.memory_space<vmem>>, vector<1x32xf32>,
    %c16_653 = arith.constant 16 : index
    %c1_654 = arith.constant 1 : index
    %c32_655 = arith.constant 32 : index
    %569 = vector.load %arg7[%c16_653, %c1_654, %c32_655] : memref<20x2x128xf32, #tpu.memory_space<vmem>>, vector<1x1x32xf32>
    %570 = vector.shape_cast %569 : vector<1x1x32xf32> to vector<1x32xf32>
    %c1_656 = arith.constant 1 : index
    %c32_657 = arith.constant 32 : index
    %571 = vector.load %arg10[%c1_656, %c32_657] : memref<3x64xf32, #tpu.memory_space<vmem>>, vector<1x32xf32>
    tpu.vector_store %arg10[%c1_656, %c32_657], %570 {strides = array<i32>} : memref<3x64xf32, #tpu.memory_space<vmem>>, vector<1x32xf32>,
    %c16_658 = arith.constant 16 : index
    %c1_659 = arith.constant 1 : index
    %c64_660 = arith.constant 64 : index
    %572 = vector.load %arg7[%c16_658, %c1_659, %c64_660] : memref<20x2x128xf32, #tpu.memory_space<vmem>>, vector<1x1x32xf32>
    %573 = vector.shape_cast %572 : vector<1x1x32xf32> to vector<1x32xf32>
    %c2_661 = arith.constant 2 : index
    %c32_662 = arith.constant 32 : index
    %574 = vector.load %arg10[%c2_661, %c32_662] : memref<3x64xf32, #tpu.memory_space<vmem>>, vector<1x32xf32>
    tpu.vector_store %arg10[%c2_661, %c32_662], %573 {strides = array<i32>} : memref<3x64xf32, #tpu.memory_space<vmem>>, vector<1x32xf32>,
    %c0_663 = arith.constant 0 : index
    %c0_664 = arith.constant 0 : index
    %575 = vector.load %arg10[%c0_663, %c0_664] : memref<3x64xf32, #tpu.memory_space<vmem>>, vector<3x64xf32>
    %c0_665 = arith.constant 0 : index
    %c0_666 = arith.constant 0 : index
    %576 = vector.load %arg12[%c0_665, %c0_666] : memref<3x128xf32, #tpu.memory_space<vmem>>, vector<3x128xf32>
    %cst_667 = arith.constant dense<0.000000e+00> : vector<64x128xf32>
    %577 = tpu.matmul %575, %576, %cst_667 {dimension_numbers = #tpu.dot_dimension_numbers<[0], [0], [1], [1], [0, 1, 1, 1], [], []>} : vector<3x64xf32>, vector<3x128xf32>, vector<64x128xf32> -> vector<64x128xf32>
    %cst_668 = arith.constant 0.000000e+00 : f32
    %578 = vector.broadcast %cst_668 : f32 to vector<64x128xf32>
    %579 = arith.maximumf %577, %578 : vector<64x128xf32>
    %c15_669 = arith.constant 15 : index
    %c1_670 = arith.constant 1 : index
    %c0_671 = arith.constant 0 : index
    %580 = vector.load %arg7[%c15_669, %c1_670, %c0_671] : memref<20x2x128xf32, #tpu.memory_space<vmem>>, vector<1x1x32xf32>
    %581 = vector.shape_cast %580 : vector<1x1x32xf32> to vector<1x32xf32>
    %c0_672 = arith.constant 0 : index
    %c0_673 = arith.constant 0 : index
    %582 = vector.load %arg11[%c0_672, %c0_673] : memref<6x64xf32, #tpu.memory_space<vmem>>, vector<1x32xf32>
    tpu.vector_store %arg11[%c0_672, %c0_673], %581 {strides = array<i32>} : memref<6x64xf32, #tpu.memory_space<vmem>>, vector<1x32xf32>,
    %c17_674 = arith.constant 17 : index
    %c1_675 = arith.constant 1 : index
    %c0_676 = arith.constant 0 : index
    %583 = vector.load %arg7[%c17_674, %c1_675, %c0_676] : memref<20x2x128xf32, #tpu.memory_space<vmem>>, vector<1x1x32xf32>
    %584 = vector.shape_cast %583 : vector<1x1x32xf32> to vector<1x32xf32>
    %c3_677 = arith.constant 3 : index
    %c32_678 = arith.constant 32 : index
    %585 = vector.load %arg11[%c3_677, %c32_678] : memref<6x64xf32, #tpu.memory_space<vmem>>, vector<1x32xf32>
    tpu.vector_store %arg11[%c3_677, %c32_678], %584 {strides = array<i32>} : memref<6x64xf32, #tpu.memory_space<vmem>>, vector<1x32xf32>,
    %c15_679 = arith.constant 15 : index
    %c1_680 = arith.constant 1 : index
    %c32_681 = arith.constant 32 : index
    %586 = vector.load %arg7[%c15_679, %c1_680, %c32_681] : memref<20x2x128xf32, #tpu.memory_space<vmem>>, vector<1x1x32xf32>
    %587 = vector.shape_cast %586 : vector<1x1x32xf32> to vector<1x32xf32>
    %c1_682 = arith.constant 1 : index
    %c0_683 = arith.constant 0 : index
    %588 = vector.load %arg11[%c1_682, %c0_683] : memref<6x64xf32, #tpu.memory_space<vmem>>, vector<1x32xf32>
    tpu.vector_store %arg11[%c1_682, %c0_683], %587 {strides = array<i32>} : memref<6x64xf32, #tpu.memory_space<vmem>>, vector<1x32xf32>,
    %c17_684 = arith.constant 17 : index
    %c1_685 = arith.constant 1 : index
    %c32_686 = arith.constant 32 : index
    %589 = vector.load %arg7[%c17_684, %c1_685, %c32_686] : memref<20x2x128xf32, #tpu.memory_space<vmem>>, vector<1x1x32xf32>
    %590 = vector.shape_cast %589 : vector<1x1x32xf32> to vector<1x32xf32>
    %c4_687 = arith.constant 4 : index
    %c32_688 = arith.constant 32 : index
    %591 = vector.load %arg11[%c4_687, %c32_688] : memref<6x64xf32, #tpu.memory_space<vmem>>, vector<1x32xf32>
    tpu.vector_store %arg11[%c4_687, %c32_688], %590 {strides = array<i32>} : memref<6x64xf32, #tpu.memory_space<vmem>>, vector<1x32xf32>,
    %c15_689 = arith.constant 15 : index
    %c1_690 = arith.constant 1 : index
    %c64_691 = arith.constant 64 : index
    %592 = vector.load %arg7[%c15_689, %c1_690, %c64_691] : memref<20x2x128xf32, #tpu.memory_space<vmem>>, vector<1x1x32xf32>
    %593 = vector.shape_cast %592 : vector<1x1x32xf32> to vector<1x32xf32>
    %c2_692 = arith.constant 2 : index
    %c0_693 = arith.constant 0 : index
    %594 = vector.load %arg11[%c2_692, %c0_693] : memref<6x64xf32, #tpu.memory_space<vmem>>, vector<1x32xf32>
    tpu.vector_store %arg11[%c2_692, %c0_693], %593 {strides = array<i32>} : memref<6x64xf32, #tpu.memory_space<vmem>>, vector<1x32xf32>,
    %c17_694 = arith.constant 17 : index
    %c1_695 = arith.constant 1 : index
    %c64_696 = arith.constant 64 : index
    %595 = vector.load %arg7[%c17_694, %c1_695, %c64_696] : memref<20x2x128xf32, #tpu.memory_space<vmem>>, vector<1x1x32xf32>
    %596 = vector.shape_cast %595 : vector<1x1x32xf32> to vector<1x32xf32>
    %c5_697 = arith.constant 5 : index
    %c32_698 = arith.constant 32 : index
    %597 = vector.load %arg11[%c5_697, %c32_698] : memref<6x64xf32, #tpu.memory_space<vmem>>, vector<1x32xf32>
    tpu.vector_store %arg11[%c5_697, %c32_698], %596 {strides = array<i32>} : memref<6x64xf32, #tpu.memory_space<vmem>>, vector<1x32xf32>,
    %c0_699 = arith.constant 0 : index
    %c0_700 = arith.constant 0 : index
    %598 = vector.load %arg11[%c0_699, %c0_700] : memref<6x64xf32, #tpu.memory_space<vmem>>, vector<6x64xf32>
    %cst_701 = arith.constant dense<0.000000e+00> : vector<6x128xf32>
    %599 = tpu.matmul %598, %579, %cst_701 {dimension_numbers = #tpu.dot_dimension_numbers<[1], [0], [0], [1], [0, 0, 1, 1], [], []>} : vector<6x64xf32>, vector<64x128xf32>, vector<6x128xf32> -> vector<6x128xf32>
    %600 = vector.extract_strided_slice %599 {offsets = [0, 0], sizes = [3, 128], strides = [1, 1]} : vector<6x128xf32> to vector<3x128xf32>
    %601 = math.tanh %600 : vector<3x128xf32>
    %cst_702 = arith.constant 1.000000e+00 : f32
    %602 = vector.broadcast %cst_702 : f32 to vector<3x128xf32>
    %603 = arith.addf %601, %602 : vector<3x128xf32>
    %cst_703 = arith.constant 5.000000e-01 : f32
    %604 = vector.broadcast %cst_703 : f32 to vector<3x128xf32>
    %605 = arith.mulf %603, %604 : vector<3x128xf32>
    %c12_704 = arith.constant 12 : index
    %c0_705 = arith.constant 0 : index
    %606 = vector.load %arg13[%c12_704, %c0_705] : memref<32x128xf32, #tpu.memory_space<vmem>>, vector<3x128xf32>
    tpu.vector_store %arg13[%c12_704, %c0_705], %605 {strides = array<i32>} : memref<32x128xf32, #tpu.memory_space<vmem>>, vector<3x128xf32>,
    %607 = vector.extract_strided_slice %599 {offsets = [3, 0], sizes = [3, 128], strides = [1, 1]} : vector<6x128xf32> to vector<3x128xf32>
    %cst_706 = arith.constant 0.000000e+00 : f32
    %608 = vector.broadcast %cst_706 : f32 to vector<3x128xf32>
    %609 = arith.maximumf %607, %608 : vector<3x128xf32>
    %610 = vector.broadcast %cst_706 : f32 to vector<3x128xf32>
    %611 = arith.subf %607, %610 : vector<3x128xf32>
    %612 = arith.cmpf one, %611, %611 : vector<3x128xf32>
    %613 = vector.broadcast %cst_706 : f32 to vector<3x128xf32>
    %614 = arith.addf %607, %613 : vector<3x128xf32>
    %615 = math.absf %611 : vector<3x128xf32>
    %cst_707 = arith.constant 0.000000e+00 : f32
    %616 = vector.broadcast %cst_707 : f32 to vector<3x128xf32>
    %617 = arith.subf %616, %615 : vector<3x128xf32>
    %618 = math.exp %617 : vector<3x128xf32>
    %619 = math.log1p %618 : vector<3x128xf32>
    %620 = arith.addf %609, %619 : vector<3x128xf32>
    %621 = arith.select %612, %614, %620 : vector<3x128xi1>, vector<3x128xf32>
    %c21_708 = arith.constant 21 : index
    %c0_709 = arith.constant 0 : index
    %622 = vector.load %arg13[%c21_708, %c0_709] : memref<32x128xf32, #tpu.memory_space<vmem>>, vector<3x128xf32>
    tpu.vector_store %arg13[%c21_708, %c0_709], %621 {strides = array<i32>} : memref<32x128xf32, #tpu.memory_space<vmem>>, vector<3x128xf32>,
    %623 = vector.extract_strided_slice %421 {offsets = [0, 0], sizes = [1, 128], strides = [1, 1]} : vector<2x128xf32> to vector<1x128xf32>
    %624 = vector.extract_strided_slice %421 {offsets = [1, 0], sizes = [1, 128], strides = [1, 1]} : vector<2x128xf32> to vector<1x128xf32>
    %cst_710 = arith.constant 1.000000e+00 : f32
    %625 = vector.broadcast %cst_710 : f32 to vector<1x128xf32>
    %626 = arith.subf %625, %623 : vector<1x128xf32>
    %cst_711 = arith.constant 9.99999974E-6 : f32
    %cst_712 = arith.constant 0.999989986 : f32
    %627 = vector.broadcast %cst_711 : f32 to vector<1x128xf32>
    %628 = arith.maximumf %627, %623 : vector<1x128xf32>
    %629 = vector.broadcast %cst_712 : f32 to vector<1x128xf32>
    %630 = arith.minimumf %629, %628 : vector<1x128xf32>
    %c24_713 = arith.constant 24 : index
    %c0_714 = arith.constant 0 : index
    %631 = vector.load %arg13[%c24_713, %c0_714] : memref<32x128xf32, #tpu.memory_space<vmem>>, vector<1x128xf32>
    tpu.vector_store %arg13[%c24_713, %c0_714], %630 {strides = array<i32>} : memref<32x128xf32, #tpu.memory_space<vmem>>, vector<1x128xf32>,
    %632 = arith.mulf %624, %626 : vector<1x128xf32>
    %cst_715 = arith.constant 9.99999974E-6 : f32
    %cst_716 = arith.constant 0.999989986 : f32
    %633 = vector.broadcast %cst_715 : f32 to vector<1x128xf32>
    %634 = arith.maximumf %633, %632 : vector<1x128xf32>
    %635 = vector.broadcast %cst_716 : f32 to vector<1x128xf32>
    %636 = arith.minimumf %635, %634 : vector<1x128xf32>
    %c25_717 = arith.constant 25 : index
    %c0_718 = arith.constant 0 : index
    %637 = vector.load %arg13[%c25_717, %c0_718] : memref<32x128xf32, #tpu.memory_space<vmem>>, vector<1x128xf32>
    tpu.vector_store %arg13[%c25_717, %c0_718], %636 {strides = array<i32>} : memref<32x128xf32, #tpu.memory_space<vmem>>, vector<1x128xf32>,
    %cst_719 = arith.constant 1.000000e+00 : f32
    %638 = vector.broadcast %cst_719 : f32 to vector<1x128xf32>
    %639 = arith.subf %638, %624 : vector<1x128xf32>
    %640 = arith.mulf %626, %639 : vector<1x128xf32>
    %cst_720 = arith.constant 9.99999974E-6 : f32
    %cst_721 = arith.constant 0.999989986 : f32
    %641 = vector.broadcast %cst_720 : f32 to vector<1x128xf32>
    %642 = arith.maximumf %641, %640 : vector<1x128xf32>
    %643 = vector.broadcast %cst_721 : f32 to vector<1x128xf32>
    %644 = arith.minimumf %643, %642 : vector<1x128xf32>
    %c26_722 = arith.constant 26 : index
    %c0_723 = arith.constant 0 : index
    %645 = vector.load %arg13[%c26_722, %c0_723] : memref<32x128xf32, #tpu.memory_space<vmem>>, vector<1x128xf32>
    tpu.vector_store %arg13[%c26_722, %c0_723], %644 {strides = array<i32>} : memref<32x128xf32, #tpu.memory_space<vmem>>, vector<1x128xf32>,
    %646 = tpu.iota {dimensions = array<i32: 0>} : vector<128x128xi32>
    %647 = tpu.iota {dimensions = array<i32: 1>} : vector<128x128xi32>
    %648 = arith.cmpi eq, %646, %647 : vector<128x128xi32>
    %649 = arith.extui %648 : vector<128x128xi1> to vector<128x128xi32>
    %650 = arith.sitofp %649 : vector<128x128xi32> to vector<128x128xf32>
    %c0_724 = arith.constant 0 : index
    %c0_725 = arith.constant 0 : index
    %651 = vector.load %arg13[%c0_724, %c0_725] : memref<32x128xf32, #tpu.memory_space<vmem>>, vector<32x128xf32>
    %cst_726 = arith.constant dense<0.000000e+00> : vector<128x32xf32>
    %652 = tpu.matmul %650, %651, %cst_726 {dimension_numbers = #tpu.dot_dimension_numbers<[1], [1], [0], [0], [0, 0, 1, 0], [], []>} : vector<128x128xf32>, vector<32x128xf32>, vector<128x32xf32> -> vector<128x32xf32>
    %c1_727 = arith.constant 1 : index
    %c0_728 = arith.constant 0 : index
    %c0_729 = arith.constant 0 : index
    %653 = vector.load %arg6[%c1_727, %c0_728, %c0_729] : memref<2x128x32xf32, #tpu.memory_space<vmem>>, vector<1x128x32xf32>
    %654 = vector.shape_cast %653 : vector<1x128x32xf32> to vector<128x32xf32>
    %655 = vector.shape_cast %652 : vector<128x32xf32> to vector<1x128x32xf32>
    tpu.vector_store %arg6[%c1_727, %c0_728, %c0_729], %655 {strides = array<i32>} : memref<2x128x32xf32, #tpu.memory_space<vmem>>, vector<1x128x32xf32>,
    return
  }
}

</mosaic_0001>

<bundles_post_ra>
// kernel: hyper_vdn_forward.1
= control target key start
LH: loop header
LB: loop body
LE: loop exit
PB: predicated region body
PF: predicated region fallthrough
CT: control target
= control target key end

     0   :  { %11 = vsyncpa [#allocation10], 0  ;;  %s5185_s0 = inlined_call_operand.vmem [shape: f32[2,16], index: 0, kind: input, shape index: {}]   ;;  %s5186_s1 = inlined_call_operand.vmem [shape: f32[2,128,3], index: 1, kind: input, shape index: {}]   ;;  %s5187_s2 = inlined_call_operand.hbm [shape: f32[20,16,32], index: 2, kind: input, shape index: {}]   ;;  %s5188_s3 = inlined_call_operand.vmem [shape: f32[20,1,32], index: 3, kind: input, shape index: {}]   ;;  %s5189_s4 = inlined_call_operand.hbm [shape: f32[20,32,128], index: 4, kind: input, shape index: {}]   ;;  %s5190_s5 = inlined_call_operand.vmem [shape: f32[20,1,128], index: 5, kind: input, shape index: {}]   ;;  %s5191_s6 = inlined_call_operand.vmem [shape: f32[2,128,32], index: 6, kind: output, shape index: {}]  }
   0x1   :  { %s21_s23 = sshll.u32 %s5187_s2, 4  ;;  %s22_s23 = int_to_ptr.hbm [resolvable:$true] %s21_s23 }
   0x2   :  { %12 = vsyncpa [#allocation12], 0  ;;  %s3953_s24 = smov [#allocation9]   ;;  %s36_s28 = sshll.u32 %s5189_s4, 4  ;;  %s37_s28 = int_to_ptr.hbm [resolvable:$true] %s36_s28 }
   0x3   :  { %s23_s25 = sshll.u32 %s3953_s24, 4  ;;  %s3954_s29 = smov 128   ;;  %s24_s25 = int_to_ptr.vmem [resolvable:$true] %s23_s25 }
   0x4   :  { %s3955_s30 = smov 8   ;;  %s3956_s7 = smov [#allocation11]  }
   0x5   :  { %29 = dma.hbm_to_vmem [thread:$0]  %s22_s23, 5120, %s24_s25, [#allocation10], %s3954_s29, %s3954_s29, %s3955_s30  }
   0x6   :  { %s38_s8 = sshll.u32 %s3956_s7, 4  ;;  %s39_s8 = int_to_ptr.vmem [resolvable:$true] %s38_s8 }
   0x7   :  { %44 = dma.hbm_to_vmem [thread:$0]  %s37_s28, 10240, %s39_s8, [#allocation12], %s3954_s29, %s3954_s29, %s3955_s30  }
   0x8   :  { %3949 = dma.done.wait [#allocation10], 5120  }
   0x9   :  { %3950 = vsyncadd [#allocation10], 4294962176 }
   0xa   :  { %3951 = dma.done.wait [#allocation12], 10240  }
   0xb   :  { %3952 = vsyncadd [#allocation12], 4294957056  ;;  %v66_v0 = vld [vmem:[#allocation9 + $0x8] sm:$0xff]  ;;  %v65_v2 = vld [vmem:[#allocation9] sm:$0xff]  ;;  %vm185_vm0 = vcmask 130048   ;;  %vm769_vm1 = vcmask 261120  }
   0xc   :  { %v70_v1 = vld [vmem:[#allocation9 + $0x28] sm:$0xff]  ;;  %203 = vmatpush.msra.mxu0 %v66_v0  ;;  %v69_v3 = vld [vmem:[#allocation9 + $0x20] sm:$0xff]  ;;  %v4006_v4 = vld [vmem:[%s5185_s0] sm:$0x3]  ;;  %vm56_vm2 = vcmask 518144   ;;  %vm58_vm3 = vcmask 521216  }
   0xd   :  { %243 = vmatpush.msra.mxu2 %v70_v1  ;;  %v72_v5 = vld [vmem:[#allocation9 + $0x38] sm:$0xff]  ;;  %v74_v6 = vld [vmem:[#allocation9 + $0x48] sm:$0xff]  ;;  %v71_v7 = vld [vmem:[#allocation9 + $0x30] sm:$0xff]  ;;  %s3958_s25 = smov 96   ;;  %vm1347_vm4 = vcmask 253952   ;;  %s3959_s8 = smov 64  }
   0xe   :  { %204 = vmatpush.msra.mxu0 %v65_v2  ;;  %v73_v8 = vld [vmem:[#allocation9 + $0x40] sm:$0xff]  ;;  %v78_v9 = vld [vmem:[#allocation9 + $0x68] sm:$0xff]  ;;  %v80_v12 = vld [vmem:[#allocation9 + $0x78] sm:$0xff]  ;;  %s3960_s20 = smov 32   ;;  %vm1355_vm5 = vcmask 516352   ;;  %vm1273_vm6 = vcmask 23552  }
   0xf   :  { %244 = vmatpush.msra.mxu2 %v69_v3  ;;  %3560 = vmatmul.msk.f32.vlgmr.msra.gmra.mxu0 %vm185_vm0, %v4006_v4  ;;  %v82_v10 = vld [vmem:[#allocation9 + $0x88] sm:$0xff]  ;;  %v77_v11 = vld [vmem:[#allocation9 + $0x60] sm:$0xff]  ;;  %v79_v14 = vld [vmem:[#allocation9 + $0x70] sm:$0xff]  ;;  %vm1363_vm7 = vcmask 778752   ;;  %vm1371_vm8 = vcmask 1041152   ;;  %vm1494_vm10 = vcmask 1042432  }
  0x10   :  { %3562 = vmatmul.msk.f32.vlgmr.msra.gmra.mxu2 %vm185_vm0, %v4006_v4  ;;  %283 = vmatpush.msrb.mxu0 %v74_v6  ;;  %v81_v13 = vld [vmem:[#allocation9 + $0x80] sm:$0xff]  ;;  %v86_v15 = vld [vmem:[#allocation9 + $0xa8] sm:$0xff]  ;;  %v68_v19 = vld [vmem:[#allocation9 + $0x18] sm:$0xff]  ;;  %vm1814_vm11 = vcmask 523264  }
  0x11   :  { %263 = vmatpush.msrb.mxu2 %v72_v5  ;;  %v90_v16 = vld [vmem:[#allocation9 + $0xc8] sm:$0xff]  ;;  %343 = vmatpush.msra.mxu3 %v80_v12  ;;  %v85_v17 = vld [vmem:[#allocation9 + $0xa0] sm:$0xff]  ;;  %v67_v20 = vld [vmem:[#allocation9 + $0x10] sm:$0xff] }
  0x12   :  { %284 = vmatpush.msrb.mxu0 %v73_v8  ;;  %v89_v18 = vld [vmem:[#allocation9 + $0xc0] sm:$0xff]  ;;  %v88_v21 = vld [vmem:[#allocation9 + $0xb8] sm:$0xff]  ;;  %223 = vmatpush.msra.mxu1 %v68_v19  ;;  %v87_v22 = vld [vmem:[#allocation9 + $0xb0] sm:$0xff] }
  0x13   :  { %264 = vmatpush.msrb.mxu2 %v71_v7  ;;  %344 = vmatpush.msra.mxu3 %v79_v14  ;;  %v76_v23 = vld [vmem:[#allocation9 + $0x58] sm:$0xff]  ;;  %v94_v25 = vld [vmem:[#allocation9 + $0xe8] sm:$0xff]  ;;  %v75_v26 = vld [vmem:[#allocation9 + $0x50] sm:$0xff] }
  0x14   :  { %363 = vmatpush.msra.mxu0 %v82_v10  ;;  %3567 = vmatmul.msk.f32.vlgmr.msra.gmra.mxu3 %vm185_vm0, %v4006_v4  ;;  %v96_v24 = vld [vmem:[#allocation9 + $0xf8] sm:$0xff]  ;;  %v93_v28 = vld [vmem:[#allocation9 + $0xe0] sm:$0xff]  ;;  %v95_v29 = vld [vmem:[#allocation9 + $0xf0] sm:$0xff] }
  0x15   :  { %323 = vmatpush.msra.mxu2 %v78_v9  ;;  %224 = vmatpush.msra.mxu1 %v67_v20  ;;  %v84_v27 = vld [vmem:[#allocation9 + $0x98] sm:$0xff]  ;;  %v83_v30 = vld [vmem:[#allocation9 + $0x90] sm:$0xff]  ;;  %v98_v32 = vld [vmem:[#allocation9 + $0x108] sm:$0xff] }
  0x16   :  { %364 = vmatpush.msra.mxu0 %v81_v13  ;;  %423 = vmatpush.msrb.mxu3 %v88_v21  ;;  %v104_v31 = vld [vmem:[#allocation9 + $0x138] sm:$0xff]  ;;  %v103_v33 = vld [vmem:[#allocation9 + $0x130] sm:$0xff]  ;;  %v97_v35 = vld [vmem:[#allocation9 + $0x100] sm:$0xff] }
  0x17   :  { %324 = vmatpush.msra.mxu2 %v77_v11  ;;  %3564 = vmatmul.msk.f32.vlgmr.msrb.gmra.mxu0 %vm185_vm0, %v4006_v4  ;;  %v92_v34 = vld [vmem:[#allocation9 + $0xd8] sm:$0xff]  ;;  %v102_v36 = vld [vmem:[#allocation9 + $0x128] sm:$0xff]  ;;  %v91_v37 = vld [vmem:[#allocation9 + $0xd0] sm:$0xff] }
  0x18   :  { %3563 = vmatmul.msk.f32.vlgmr.msrb.gmra.mxu2 %vm185_vm0, %v4006_v4  ;;  %443 = vmatpush.msrb.mxu0 %v90_v16  ;;  %v612_v38 = vld [vmem:[#allocation11 + $0x18] sm:$0xff]  ;;  %v101_v39 = vld [vmem:[#allocation9 + $0x120] sm:$0xff]  ;;  %v611_v40 = vld [vmem:[#allocation11 + $0x10] sm:$0xff] }
  0x19   :  { %403 = vmatpush.msrb.mxu2 %v86_v15  ;;  %3561 = vmatmul.msk.f32.vlgmr.msra.gmra.mxu1 %vm185_vm0, %v4006_v4  ;;  %v610_v41 = vld [vmem:[#allocation11 + $0x8] sm:$0xff]  ;;  %v609_v42 = vld [vmem:[#allocation11] sm:$0xff]  ;;  %v620_v43 = vld [vmem:[#allocation11 + $0x58] sm:$0xff] }
  0x1a   :  { %444 = vmatpush.msrb.mxu0 %v89_v18  ;;  %424 = vmatpush.msrb.mxu3 %v87_v22  ;;  %v619_v44 = vld [vmem:[#allocation11 + $0x50] sm:$0xff]  ;;  %v618_v45 = vld [vmem:[#allocation11 + $0x48] sm:$0xff]  ;;  %v617_v46 = vld [vmem:[#allocation11 + $0x40] sm:$0xff] }
  0x1b   :  { %404 = vmatpush.msrb.mxu2 %v85_v17  ;;  %303 = vmatpush.msrb.mxu1 %v76_v23  ;;  %v624_v47 = vld [vmem:[#allocation11 + $0x78] sm:$0xff]  ;;  %v623_v48 = vld [vmem:[#allocation11 + $0x70] sm:$0xff]  ;;  %v622_v49 = vld [vmem:[#allocation11 + $0x68] sm:$0xff] }
  0x1c   :  { %503 = vmatpush.msra.mxu3 %v96_v24  ;;  %v621_v50 = vld [vmem:[#allocation11 + $0x60] sm:$0xff]  ;;  %v628_v51 = vld [vmem:[#allocation11 + $0x98] sm:$0xff]  ;;  %v627_v52 = vld [vmem:[#allocation11 + $0x90] sm:$0xff] }
  0x1d   :  { %304 = vmatpush.msrb.mxu1 %v75_v26  ;;  %3571 = vmatmul.msk.f32.vlgmr.msrb.gmra.mxu3 %vm185_vm0, %v4006_v4  ;;  %v636_v53 = vld [vmem:[#allocation11 + $0xd8] sm:$0xff]  ;;  %v626_v54 = vld [vmem:[#allocation11 + $0x88] sm:$0xff]  ;;  %v635_v55 = vld [vmem:[#allocation11 + $0xd0] sm:$0xff] }
  0x1e   :  { %504 = vmatpush.msra.mxu3 %v95_v29  ;;  %v625_v56 = vld [vmem:[#allocation11 + $0x80] sm:$0xff]  ;;  %v634_v57 = vld [vmem:[#allocation11 + $0xc8] sm:$0xff]  ;;  %v3821_v59 = vld [vmem:[%s5188_s3] ss:$0 sm:$0xff] }
  0x1f   :  { %3568 = vmatmul.msk.f32.vlgmr.msra.gmra.mxu0 %vm185_vm0, %v4006_v4  ;;  %383 = vmatpush.msra.mxu1 %v84_v27  ;;  %v633_v58 = vld [vmem:[#allocation11 + $0xc0] sm:$0xff]  ;;  %v3822_v63 = vld [vmem:[%s5188_s3 + $0x2] ss:$0 sm:$0xff]  ;;  %v643_v2 = vld [vmem:[#allocation11 + $0x110] sm:$0xff] }
  0x20   :  { %3566 = vmatmul.msk.f32.vlgmr.msra.gmra.mxu2 %vm185_vm0, %v4006_v4  ;;  %583 = vmatpush.msrb.mxu3 %v104_v31  ;;  %v644_v0 = vld [vmem:[#allocation11 + $0x118] sm:$0xff]  ;;  %v3824_v1 = vld [vmem:[%s5188_s3 + $0x4] ss:$0 sm:$0xff]  ;;  %v642_v7 = vld [vmem:[#allocation11 + $0x108] sm:$0xff] }
  0x21   :  { %483 = vmatpush.msra.mxu2 %v94_v25  ;;  %384 = vmatpush.msra.mxu1 %v83_v30  ;;  %v100_v3 = vld [vmem:[#allocation9 + $0x118] sm:$0xff]  ;;  %v99_v8 = vld [vmem:[#allocation9 + $0x110] sm:$0xff]  ;;  %v641_v13 = vld [vmem:[#allocation11 + $0x100] sm:$0xff] }
  0x22   :  { %3565 = vmatmul.msk.f32.vlgmr.msrb.gmra.mxu1 %vm185_vm0, %v4006_v4  ;;  %523 = vmatpush.msra.mxu0 %v98_v32  ;;  %v652_v12 = vld [vmem:[#allocation11 + $0x158] sm:$0xff]  ;;  %v651_v16 = vld [vmem:[#allocation11 + $0x150] sm:$0xff]  ;;  %v650_v22 = vld [vmem:[#allocation11 + $0x148] sm:$0xff] }
  0x23   :  { %484 = vmatpush.msra.mxu2 %v93_v28  ;;  %584 = vmatpush.msrb.mxu3 %v103_v33  ;;  %v616_v14 = vld [vmem:[#allocation11 + $0x38] sm:$0xff]  ;;  %v615_v20 = vld [vmem:[#allocation11 + $0x30] sm:$0xff]  ;;  %v614_v25 = vld [vmem:[#allocation11 + $0x28] sm:$0xff] }
  0x24   :  { %463 = vmatpush.msrb.mxu1 %v92_v34  ;;  %524 = vmatpush.msra.mxu0 %v97_v35  ;;  %v3823_v15 = vld [vmem:[%s5188_s3 + $0x3] ss:$0 sm:$0xff]  ;;  %v3830_v19 = vld [vmem:[%s5188_s3 + $0x1] ss:$0 sm:$0xff]  ;;  %v659_v23 = vld [vmem:[#allocation11 + $0x190] sm:$0xff] }
  0x25   :  { %3575 = vmatmul.msk.f32.vlgmr.msra.gmra.mxu3 %vm185_vm0, %v4006_v4  ;;  %v660_v18 = vld [vmem:[#allocation11 + $0x198] sm:$0xff]  ;;  %v649_v27 = vld [vmem:[#allocation11 + $0x140] sm:$0xff]  ;;  %v639_v29 = vld [vmem:[#allocation11 + $0xf0] sm:$0xff] }
  0x26   :  { %464 = vmatpush.msrb.mxu1 %v91_v37  ;;  %854 = vmatpush.msra.mxu3 %v624_v47  ;;  %v640_v21 = vld [vmem:[#allocation11 + $0xf8] sm:$0xff]  ;;  %v658_v31 = vld [vmem:[#allocation11 + $0x188] sm:$0xff]  ;;  %v3831_v32 = vld [vmem:[%s5188_s3 + $0x7] ss:$0 sm:$0xff] }
  0x27   :  { %3572 = vmatmul.msk.f32.vlgmr.msrb.gmra.mxu0 %vm185_vm0, %v4006_v4  ;;  %v613_v33 = vld [vmem:[#allocation11 + $0x20] sm:$0xff]  ;;  %v631_v47 = vld [vmem:[#allocation11 + $0xb0] sm:$0xff] }
  0x28   :  { %3570 = vmatmul.msk.f32.vlgmr.msrb.gmra.mxu2 %vm185_vm0, %v4006_v4  ;;  %785 = vmatpush.msrb.mxu0 %v612_v38 }
  0x29   :  { %563 = vmatpush.msrb.mxu2 %v102_v36  ;;  %855 = vmatpush.msra.mxu3 %v623_v48  ;;  %v656_v48 = vld [vmem:[#allocation11 + $0x178] sm:$0xff] }
  0x2a   :  { %3569 = vmatmul.msk.f32.vlgmr.msra.gmra.mxu1 %vm185_vm0, %v4006_v4  ;;  %786 = vmatpush.msrb.mxu0 %v611_v40  ;;  %v638_v40 = vld [vmem:[#allocation11 + $0xe8] sm:$0xff] }
  0x2b   :  { %564 = vmatpush.msrb.mxu2 %v101_v39  ;;  %856 = vmatpush.msra.mxu3 %v622_v49  ;;  %v657_v39 = vld [vmem:[#allocation11 + $0x180] sm:$0xff]  ;;  %v3828_v49 = vld [vmem:[%s5188_s3 + $0xc] ss:$0 sm:$0xff] }
  0x2c   :  { %787 = vmatpush.msrb.mxu0 %v610_v41  ;;  %543 = vmatpush.msra.mxu1 %v100_v3  ;;  %v632_v41 = vld [vmem:[#allocation11 + $0xb8] sm:$0xff] }
  0x2d   :  { %3579 = vmatmul.msk.f32.vlgmr.msrb.gmra.mxu3 %vm185_vm0, %v4006_v4 }
  0x2e   :  { %788 = vmatpush.msrb.mxu0 %v609_v42  ;;  %857 = vmatpush.msra.mxu3 %v621_v50  ;;  %v3825_v42 = vld [vmem:[%s5188_s3 + $0x6] ss:$0 sm:$0xff] }
  0x2f   :  { %3576 = vmatmul.msk.f32.vlgmr.msra.gmra.mxu0 %vm185_vm0, %v4006_v4  ;;  %544 = vmatpush.msra.mxu1 %v99_v8  ;;  %v648_v8 = vld [vmem:[#allocation11 + $0x138] sm:$0xff] }
  0x30   :  { %3574 = vmatmul.msk.f32.vlgmr.msra.gmra.mxu2 %vm185_vm0, %v4006_v4  ;;  %877 = vmatpush.msra.mxu0 %v628_v51 }
  0x31   :  { %831 = vmatpush.msra.mxu2 %v620_v43  ;;  %946 = vmatpush.msrb.mxu3 %v640_v21 }
  0x32   :  { %3573 = vmatmul.msk.f32.vlgmr.msrb.gmra.mxu1 %vm185_vm0, %v4006_v4  ;;  %878 = vmatpush.msra.mxu0 %v627_v52 }
  0x33   :  { %832 = vmatpush.msra.mxu2 %v619_v44  ;;  %808 = vmatpush.msrb.mxu1 %v616_v14  ;;  %v647_v14 = vld [vmem:[#allocation11 + $0x130] sm:$0xff] }
  0x34   :  { %879 = vmatpush.msra.mxu0 %v626_v54  ;;  %947 = vmatpush.msrb.mxu3 %v639_v29  ;;  %v655_v54 = vld [vmem:[#allocation11 + $0x170] sm:$0xff]  ;;  %v645_v29 = vld [vmem:[#allocation11 + $0x120] sm:$0xff] }
  0x35   :  { %833 = vmatpush.msra.mxu2 %v618_v45  ;;  %809 = vmatpush.msrb.mxu1 %v615_v20  ;;  %v637_v45 = vld [vmem:[#allocation11 + $0xe0] sm:$0xff]  ;;  %v671_v20 = vld [vmem:[#allocation11 + $0x1f0] sm:$0xff] }
  0x36   :  { %880 = vmatpush.msra.mxu0 %v625_v56  ;;  %948 = vmatpush.msrb.mxu3 %v638_v40 }
  0x37   :  { %834 = vmatpush.msra.mxu2 %v617_v46  ;;  %810 = vmatpush.msrb.mxu1 %v614_v25  ;;  %v3833_v46 = vld [vmem:[%s5188_s3 + $0x5] ss:$0 sm:$0xff]  ;;  %v670_v25 = vld [vmem:[#allocation11 + $0x1e8] sm:$0xff] }
  0x38   :  { %3578 = vmatmul.msk.f32.vlgmr.msrb.gmra.mxu2 %vm185_vm0, %v4006_v4  ;;  %949 = vmatpush.msrb.mxu3 %v637_v45  ;;  %v662_v45 = vld [vmem:[#allocation11 + $0x1a8] sm:$0xff] }
  0x39   :  { %923 = vmatpush.msrb.mxu2 %v636_v53  ;;  %811 = vmatpush.msrb.mxu1 %v613_v33  ;;  %v630_v53 = vld [vmem:[#allocation11 + $0xa8] sm:$0xff]  ;;  %v664_v33 = vld [vmem:[#allocation11 + $0x1b8] sm:$0xff] }
  0x3a   :  { %3577 = vmatmul.msk.f32.vlgmr.msra.gmra.mxu1 %vm185_vm0, %v4006_v4  ;;  %v3826_v4 = vld [vmem:[%s5188_s3 + $0x8] ss:$0 sm:$0xff] }
  0x3b   :  { %924 = vmatpush.msrb.mxu2 %v635_v55  ;;  %900 = vmatpush.msra.mxu1 %v632_v41  ;;  %v663_v41 = vld [vmem:[#allocation11 + $0x1b0] sm:$0xff] }
  0x3d   :  { %925 = vmatpush.msrb.mxu2 %v634_v57  ;;  %901 = vmatpush.msra.mxu1 %v631_v47  ;;  %v3834_v57 = vld [vmem:[%s5188_s3 + $0xb] ss:$0 sm:$0xff]  ;;  %v3832_v47 = vld [vmem:[%s5188_s3 + $0x12] ss:$0 sm:$0xff] }
  0x3f   :  { %926 = vmatpush.msrb.mxu2 %v633_v58  ;;  %902 = vmatpush.msra.mxu1 %v630_v53 }
  0x8c   :  { %v206_v60 = vpop.f32.mrf.mxu0 }
  0x8d   :  { %v207_v61 = vadd.f32 %v3821_v59, %v206_v60 }
  0x8f   :  { %v589_v62 = vmax.f32 %v207_v61, 0.0 }
  0x91   :  { %3580 = vmatmul.msk.f32.vlgmr.msrb.gmra.mxu0 %vm769_vm1, %v589_v62  ;;  %v668_v62 = vld [vmem:[#allocation11 + $0x1d8] sm:$0xff] }
  0x92   :  { %969 = vmatpush.msrb.mxu0 %v644_v0 }
  0x93   :  { %v246_v5 = vpop.f32.mrf.mxu2 }
  0x94   :  { %v247_v6 = vadd.f32 %v3822_v63, %v246_v5  ;;  %v286_v9 = vpop.f32.mrf.mxu0  ;;  %970 = vmatpush.msrb.mxu0 %v643_v2  ;;  %v629_v63 = vld [vmem:[#allocation11 + $0xa0] sm:$0xff]  ;;  %v667_v5 = vld [vmem:[#allocation11 + $0x1d0] sm:$0xff] }
  0x95   :  { %v287_v11 = vadd.f32 %v3824_v1, %v286_v9  ;;  %v654_v1 = vld [vmem:[#allocation11 + $0x168] sm:$0xff]  ;;  %v3827_v2 = vld [vmem:[%s5188_s3 + $0xa] ss:$0 sm:$0xff]  ;;  %903 = vmatpush.msra.mxu1 %v629_v63 }
  0x96   :  { %v591_v10 = vmax.f32 %v247_v6, 0.0  ;;  %971 = vmatpush.msrb.mxu0 %v642_v7  ;;  %v226_v24 = vpop.f32.mrf.mxu1  ;;  %v3835_v7 = vld [vmem:[%s5188_s3 + $0x9] ss:$0 sm:$0xff] }
  0x97   :  { %v593_v17 = vmax.f32 %v287_v11, 0.0  ;;  %v227_v28 = vadd.f32 %v3830_v19, %v226_v24  ;;  %v346_v36 = vpop.f32.mrf.mxu3  ;;  %v653_v9 = vld [vmem:[#allocation11 + $0x160] sm:$0xff]  ;;  %v3836_v19 = vld [vmem:[%s5188_s3 + $0xf] ss:$0 sm:$0xff]  ;;  %v3829_v24 = vld [vmem:[%s5188_s3 + $0xe] ss:$0 sm:$0xff] }
  0x98   :  { %3582 = vmatmul.msk.f32.vlgmr.msra.gmra.mxu2 %vm769_vm1, %v591_v10  ;;  %972 = vmatpush.msrb.mxu0 %v641_v13  ;;  %v347_v44 = vadd.f32 %v3831_v32, %v346_v36  ;;  %v666_v10 = vld [vmem:[#allocation11 + $0x1c8] sm:$0xff]  ;;  %v688_v36 = vld [vmem:[#allocation11 + $0x278] sm:$0xff] }
  0x99   :  { %1015 = vmatpush.msra.mxu2 %v652_v12  ;;  %3584 = vmatmul.msk.f32.vlgmr.msra.gmra.mxu0 %vm769_vm1, %v593_v17  ;;  %v590_v35 = vmax.f32 %v227_v28, 0.0  ;;  %v672_v12 = vld [vmem:[#allocation11 + $0x1f8] sm:$0xff]  ;;  %v682_v32 = vld [vmem:[#allocation11 + $0x248] sm:$0xff] }
  0x9a   :  { %1061 = vmatpush.msra.mxu0 %v660_v18  ;;  %v596_v56 = vmax.f32 %v347_v44, 0.0 }
  0x9b   :  { %v266_v26 = vpop.f32.mrf.mxu2  ;;  %1016 = vmatpush.msra.mxu2 %v651_v16  ;;  %3581 = vmatmul.msk.f32.vlgmr.msrb.gmra.mxu1 %vm769_vm1, %v590_v35  ;;  %v665_v16 = vld [vmem:[#allocation11 + $0x1c0] sm:$0xff] }
  0x9c   :  { %v267_v30 = vadd.f32 %v3823_v15, %v266_v26  ;;  %v366_v34 = vpop.f32.mrf.mxu0  ;;  %1062 = vmatpush.msra.mxu0 %v659_v23  ;;  %992 = vmatpush.msrb.mxu1 %v648_v8  ;;  %v646_v23 = vld [vmem:[#allocation11 + $0x128] sm:$0xff]  ;;  %v683_v26 = vld [vmem:[#allocation11 + $0x250] sm:$0xff] }
  0x9d   :  { %1017 = vmatpush.msra.mxu2 %v650_v22  ;;  %v367_v38 = vadd.f32 %v3826_v4, %v366_v34  ;;  %v684_v22 = vld [vmem:[#allocation11 + $0x258] sm:$0xff] }
  0x9e   :  { %v592_v37 = vmax.f32 %v267_v30, 0.0  ;;  %1063 = vmatpush.msra.mxu0 %v658_v31  ;;  %993 = vmatpush.msrb.mxu1 %v647_v14  ;;  %v3837_v30 = vld [vmem:[%s5188_s3 + $0xd] ss:$0 sm:$0xff]  ;;  %v669_v31 = vld [vmem:[#allocation11 + $0x1e0] sm:$0xff] }
  0x9f   :  { %1018 = vmatpush.msra.mxu2 %v649_v27  ;;  %v597_v43 = vmax.f32 %v367_v38, 0.0  ;;  %v306_v50 = vpop.f32.mrf.mxu1  ;;  %v681_v38 = vld [vmem:[#allocation11 + $0x240] sm:$0xff] }
  0xa0   :  { %3583 = vmatmul.msk.f32.vlgmr.msra.gmra.mxu3 %vm769_vm1, %v592_v37  ;;  %1064 = vmatpush.msra.mxu0 %v657_v39  ;;  %v307_v52 = vadd.f32 %v3833_v46, %v306_v50  ;;  %v426_v59 = vpop.f32.mrf.mxu3  ;;  %v687_v46 = vld [vmem:[#allocation11 + $0x270] sm:$0xff]  ;;  %v661_v50 = vld [vmem:[#allocation11 + $0x1a0] sm:$0xff] }
  0xa1   :  { %3588 = vmatmul.msk.f32.vlgmr.msrb.gmra.mxu0 %vm769_vm1, %v597_v43  ;;  %1038 = vmatpush.msra.mxu3 %v656_v48  ;;  %v427_v6 = vadd.f32 %v3834_v57, %v426_v59  ;;  %v3839_v57 = vld [vmem:[%s5188_s3 + $0x10] ss:$0 sm:$0xff]  ;;  %v3957_v59 = vmov 0.0   ;;  %v3845_v14 = vld [vmem:[%s5190_s5 + $0x8] ss:$0 sm:$0xff] }
  0xa2   :  { %v594_v0 = vmax.f32 %v307_v52, 0.0  ;;  %994 = vmatpush.msrb.mxu1 %v646_v23  ;;  %v685_v52 = vld [vmem:[#allocation11 + $0x260] sm:$0xff]  ;;  %55 = vst [vmem:[#allocation4] sm:$0xff] %v3957_v59 }
  0xa3   :  { %v326_v51 = vpop.f32.mrf.mxu2  ;;  %1039 = vmatpush.msra.mxu3 %v655_v54  ;;  %v600_v17 = vmax.f32 %v427_v6, 0.0  ;;  %60 = vst [vmem:[#allocation8] sm:$0xff] %v3957_v59  ;;  %v3843_v6 = vld [vmem:[%s5190_s5 + $0x4] ss:$0 sm:$0xff] }
  0xa4   :  { %v327_v55 = vadd.f32 %v3825_v42, %v326_v51  ;;  %v446_v58 = vpop.f32.mrf.mxu0  ;;  %3585 = vmatmul.msk.f32.vlgmr.msra.gmra.mxu1 %vm769_vm1, %v594_v0  ;;  %v3838_v42 = vld [vmem:[%s5188_s3 + $0x13] ss:$0 sm:$0xff]  ;;  %61 = vst [vmem:[#allocation8 + $0x8] sm:$0xff] %v3957_v59  ;;  %v3840_v0 = vld [vmem:[%s5190_s5] ss:$0 sm:$0xff] }
  0xa5   :  { %v447_v61 = vadd.f32 %v3828_v49, %v446_v58  ;;  %1040 = vmatpush.msra.mxu3 %v654_v1  ;;  %995 = vmatpush.msrb.mxu1 %v645_v29  ;;  %v686_v51 = vld [vmem:[#allocation11 + $0x268] sm:$0xff]  ;;  %62 = vst [vmem:[#allocation8 + $0x10] sm:$0xff] %v3957_v59 }
  0xa6   :  { %v595_v60 = vmax.f32 %v327_v55, 0.0  ;;  %63 = vst [vmem:[#allocation8 + $0x18] sm:$0xff] %v3957_v59  ;;  %v674_v1 = vld [vmem:[#allocation11 + $0x208] sm:$0xff] }
  0xa7   :  { %v601_v3 = vmax.f32 %v447_v61, 0.0  ;;  %v386_v11 = vpop.f32.mrf.mxu1  ;;  %1041 = vmatpush.msra.mxu3 %v653_v9  ;;  %1084 = vmatpush.msra.mxu1 %v664_v33  ;;  %v676_v61 = vld [vmem:[#allocation11 + $0x218] sm:$0xff]  ;;  %57 = vst.msk [vmem:[#allocation5] sm:$0x7] %vm56_vm2, %v3957_v59 }
  0xa8   :  { %3586 = vmatmul.msk.f32.vlgmr.msrb.gmra.mxu2 %vm769_vm1, %v595_v60  ;;  %3587 = vmatmul.msk.f32.vlgmr.msrb.gmra.mxu3 %vm769_vm1, %v596_v56  ;;  %v387_v18 = vadd.f32 %v3835_v7, %v386_v11  ;;  %v506_v4 = vpop.f32.mrf.mxu3  ;;  %59 = vst.msk [vmem:[#allocation6] sm:$0x3f] %vm58_vm3, %v3957_v59  ;;  %v3841_v9 = vld [vmem:[%s5190_s5 + $0x2] ss:$0 sm:$0xff] }
  0xa9   :  { %1107 = vmatpush.msrb.mxu2 %v668_v62  ;;  %3592 = vmatmul.msk.f32.vlgmr.msra.gmra.mxu0 %vm769_vm1, %v601_v3  ;;  %v507_v28 = vadd.f32 %v3836_v19, %v506_v4  ;;  %v675_v62 = vld [vmem:[#allocation11 + $0x210] sm:$0xff]  ;;  %v3842_v4 = vld [vmem:[%s5190_s5 + $0x3] ss:$0 sm:$0xff] }
  0xaa   :  { %1130 = vmatpush.msrb.mxu3 %v672_v12  ;;  %v598_v27 = vmax.f32 %v387_v18, 0.0  ;;  %1085 = vmatpush.msra.mxu1 %v663_v41  ;;  %v3855_v41 = vld [vmem:[%s5190_s5 + $0xb] ss:$0 sm:$0xff] }
  0xab   :  { %v406_v13 = vpop.f32.mrf.mxu2  ;;  %1108 = vmatpush.msrb.mxu2 %v667_v5  ;;  %v604_v39 = vmax.f32 %v507_v28, 0.0  ;;  %1153 = vmatpush.msrb.mxu0 %v676_v61 }
  0xac   :  { %v407_v15 = vadd.f32 %v3827_v2, %v406_v13  ;;  %1131 = vmatpush.msrb.mxu3 %v671_v20  ;;  %3589 = vmatmul.msk.f32.vlgmr.msrb.gmra.mxu1 %vm769_vm1, %v598_v27  ;;  %v526_v58 = vpop.f32.mrf.mxu0  ;;  %v673_v2 = vld [vmem:[#allocation11 + $0x200] sm:$0xff] }
  0xad   :  { %1109 = vmatpush.msrb.mxu2 %v666_v10  ;;  %1086 = vmatpush.msra.mxu1 %v662_v45  ;;  %v527_v60 = vadd.f32 %v3839_v57, %v526_v58 }
  0xae   :  { %v599_v21 = vmax.f32 %v407_v15, 0.0  ;;  %1132 = vmatpush.msrb.mxu3 %v670_v25  ;;  %1154 = vmatpush.msrb.mxu0 %v675_v62  ;;  %v3849_v15 = vld [vmem:[%s5190_s5 + $0x1] ss:$0 sm:$0xff]  ;;  %v3851_v25 = vld [vmem:[%s5190_s5 + $0x5] ss:$0 sm:$0xff] }
  0xaf   :  { %1110 = vmatpush.msrb.mxu2 %v665_v16  ;;  %v466_v34 = vpop.f32.mrf.mxu1  ;;  %1087 = vmatpush.msra.mxu1 %v661_v50  ;;  %v605_v63 = vmax.f32 %v527_v60, 0.0  ;;  %v3856_v50 = vld [vmem:[%s5190_s5 + $0xd] ss:$0 sm:$0xff]  ;;  %v3853_v62 = vld [vmem:[%s5190_s5 + $0x12] ss:$0 sm:$0xff] }
  0xb0   :  { %3590 = vmatmul.msk.f32.vlgmr.msra.gmra.mxu2 %vm769_vm1, %v599_v21  ;;  %3591 = vmatmul.msk.f32.vlgmr.msra.gmra.mxu3 %vm769_vm1, %v600_v17  ;;  %v467_v40 = vadd.f32 %v3837_v30, %v466_v34  ;;  %v586_v43 = vpop.f32.mrf.mxu3 }
  0xb1   :  { %1199 = vmatpush.msra.mxu2 %v684_v22  ;;  %1133 = vmatpush.msrb.mxu3 %v669_v31  ;;  %v587_v49 = vadd.f32 %v3838_v42, %v586_v43 }
  0xb2   :  { %v602_v48 = vmax.f32 %v467_v40, 0.0  ;;  %1155 = vmatpush.msrb.mxu0 %v674_v1  ;;  %v3847_v40 = vld [vmem:[%s5190_s5 + $0xa] ss:$0 sm:$0xff] }
  0xb3   :  { %v486_v35 = vpop.f32.mrf.mxu2  ;;  %1200 = vmatpush.msra.mxu2 %v683_v26  ;;  %1222 = vmatpush.msra.mxu3 %v688_v36  ;;  %v608_v55 = vmax.f32 %v587_v49, 0.0  ;;  %v3844_v26 = vld [vmem:[%s5190_s5 + $0x6] ss:$0 sm:$0xff] }
  0xb4   :  { %v487_v37 = vadd.f32 %v3829_v24, %v486_v35  ;;  %3593 = vmatmul.msk.f32.vlgmr.msra.gmra.mxu1 %vm769_vm1, %v602_v48  ;;  %1156 = vmatpush.msrb.mxu0 %v673_v2  ;;  %v3848_v24 = vld [vmem:[%s5190_s5 + $0xc] ss:$0 sm:$0xff] }
  0xb5   :  { %1201 = vmatpush.msra.mxu2 %v682_v32  ;;  %1223 = vmatpush.msra.mxu3 %v687_v46  ;;  %v3852_v32 = vld [vmem:[%s5190_s5 + $0x7] ss:$0 sm:$0xff] }
  0xb6   :  { %v603_v44 = vmax.f32 %v487_v37, 0.0  ;;  %3596 = vmatmul.msk.f32.vlgmr.msrb.gmra.mxu0 %vm769_vm1, %v605_v63  ;;  %v3858_v63 = vld [vmem:[%s5190_s5 + $0x13] ss:$0 sm:$0xff] }
  0xb7   :  { %1202 = vmatpush.msra.mxu2 %v681_v38  ;;  %1224 = vmatpush.msra.mxu3 %v686_v51  ;;  %v4137_v7 = vpop.f32.mrf.mxu1 }
  0xb8   :  { %3594 = vmatmul.msk.f32.vlgmr.msrb.gmra.mxu2 %vm769_vm1, %v603_v44  ;;  %3595 = vmatmul.msk.f32.vlgmr.msrb.gmra.mxu3 %vm769_vm1, %v604_v39  ;;  %v3854_v39 = vld [vmem:[%s5190_s5 + $0x9] ss:$0 sm:$0xff] }
  0xb9   :  { %1225 = vmatpush.msra.mxu3 %v685_v52  ;;  %v3850_v52 = vld [vmem:[%s5190_s5 + $0xe] ss:$0 sm:$0xff] }
  0xbb   :  { %v566_v53 = vpop.f32.mrf.mxu2 }
  0xbc   :  { %v567_v54 = vadd.f32 %v3832_v47, %v566_v53  ;;  %v3857_v53 = vld [vmem:[%s5190_s5 + $0xf] ss:$0 sm:$0xff] }
  0xbe   :  { %v607_v56 = vmax.f32 %v567_v54, 0.0 }
  0xc0   :  { %3598 = vmatmul.msk.f32.vlgmr.msra.gmra.mxu2 %vm769_vm1, %v607_v56  ;;  %3599 = vmatmul.msk.f32.vlgmr.msra.gmra.mxu3 %vm769_vm1, %v608_v55 }
 0x10e   :  { %v790_v3 = vpop.f32.mrf.mxu0 }
 0x10f   :  { %v791_v5 = vadd.f32 %v3840_v0, %v790_v3 }
 0x111   :  { %1230 = vst [vmem:[#allocation2] sm:$0x3] %v791_v5 }
 0x116   :  { %v882_v8 = vpop.f32.mrf.mxu0 }
 0x117   :  { %v883_v10 = vadd.f32 %v3843_v6, %v882_v8 }
 0x118   :  { %v1373_v11 = vld [vmem:[#allocation2] sm:$0x1]  ;;  %v813_v16 = vpop.f32.mrf.mxu1 }
 0x119   :  { %1375 = vrot.lane.b32.xlu0 %v1373_v11, %s3958_s25  ;;  %1234 = vst [vmem:[#allocation2 + $0x8] sm:$0x3] %v883_v10  ;;  %v1346_v17 = vld [vmem:[#allocation2] sm:$0x1]  ;;  %v814_v19 = vadd.f32 %v3849_v15, %v813_v16 }
 0x11a   :  { %v1393_v20 = vld [vmem:[#allocation2] sm:$0x1]  ;;  %1348 = vst.msk [vmem:[#allocation3] sm:$0x1] %vm1347_vm4, %v1346_v17 }
 0x11b   :  { %v836_v12 = vpop.f32.mrf.mxu2  ;;  %1231 = vst [vmem:[#allocation2 + $0x2] sm:$0x3] %v814_v19 }
 0x11c   :  { %v837_v13 = vadd.f32 %v3841_v9, %v836_v12 }
 0x11e   :  { %1232 = vst [vmem:[#allocation2 + $0x4] sm:$0x3] %v837_v13  ;;  %v974_v18 = vpop.f32.mrf.mxu0 }
 0x11f   :  { %v975_v21 = vadd.f32 %v3845_v14, %v974_v18 }
 0x120   :  { %v1659_v17 = vld [vmem:[#allocation2 + $0x8] sm:$0x1] }
 0x121   :  { %1238 = vst [vmem:[#allocation2 + $0x10] sm:$0x3] %v975_v21  ;;  %1395 = vrot.lane.b32.xlu0 %v1393_v20, %s3959_s8  ;;  %v905_v31 = vpop.f32.mrf.mxu1  ;;  %v1667_v18 = vld [vmem:[#allocation2 + $0x8] sm:$0x1] }
 0x122   :  { %v1580_v30 = vld [vmem:[#allocation2 + $0x2] sm:$0x1]  ;;  %v906_v33 = vadd.f32 %v3851_v25, %v905_v31 }
 0x123   :  { %v859_v22 = vpop.f32.mrf.mxu3  ;;  %1581 = vst.msk [vmem:[#allocation4] sm:$0x1] %vm1347_vm4, %v1580_v30  ;;  %v1582_v9 = vld [vmem:[#allocation2 + $0x2] sm:$0x1]  ;;  %v1271_v30 = vld [vmem:[%s5186_s1 + $0x70] sm:$0xff] }
 0x124   :  { %v860_v23 = vadd.f32 %v3842_v4, %v859_v22  ;;  %1235 = vst [vmem:[#allocation2 + $0xa] sm:$0x3] %v906_v33  ;;  %v3859_v4 = vld [vmem:[%s5190_s5 + $0x10] ss:$0 sm:$0xff]  ;;  %v1269_v33 = vld [vmem:[%s5186_s1 + $0x60] sm:$0xff] }
 0x125   :  { %v1650_v28 = vld [vmem:[#allocation2 + $0x4] sm:$0x1] }
 0x126   :  { %1233 = vst [vmem:[#allocation2 + $0x6] sm:$0x3] %v860_v23  ;;  %v1066_v27 = vpop.f32.mrf.mxu0  ;;  %v1652_v16 = vld [vmem:[#allocation2 + $0x4] sm:$0x1] }
 0x127   :  { %v1067_v29 = vadd.f32 %v3848_v24, %v1066_v27  ;;  %1651 = vst.msk [vmem:[#allocation5] sm:$0x1] %vm1347_vm4, %v1650_v28  ;;  %v1272_v27 = vld [vmem:[%s5186_s1 + $0x78] sm:$0xff] }
 0x128   :  { %3601 = vmatpush.xpose.msk.msra.mxu0 %vm1273_vm6, %v1272_v27  ;;  %v2575_v27 = vld [vmem:[#allocation2 + $0x1] sm:$0x1] }
 0x129   :  { %1242 = vst [vmem:[#allocation2 + $0x18] sm:$0x3] %v1067_v29  ;;  %v997_v43 = vpop.f32.mrf.mxu1 }
 0x12a   :  { %v998_v44 = vadd.f32 %v3854_v39, %v997_v43  ;;  %v1265_v39 = vld [vmem:[%s5186_s1 + $0x40] sm:$0xff]  ;;  %v1264_v43 = vld [vmem:[%s5186_s1 + $0x38] sm:$0xff] }
 0x12b   :  { %v928_v34 = vpop.f32.mrf.mxu2  ;;  %v951_v35 = vpop.f32.mrf.mxu3  ;;  %v1787_v21 = vld [vmem:[#allocation2 + $0xa] sm:$0x1] }
 0x12c   :  { %v929_v36 = vadd.f32 %v3844_v26, %v928_v34  ;;  %v952_v37 = vadd.f32 %v3852_v32, %v951_v35  ;;  %1239 = vst [vmem:[#allocation2 + $0x12] sm:$0x3] %v998_v44  ;;  %3602 = vmatpush.xpose.msk.msra.mxu0 %vm1273_vm6, %v1271_v30  ;;  %v1270_v32 = vld [vmem:[%s5186_s1 + $0x68] sm:$0xff]  ;;  %v1268_v34 = vld [vmem:[%s5186_s1 + $0x58] sm:$0xff]  ;;  %v1267_v35 = vld [vmem:[%s5186_s1 + $0x50] sm:$0xff] }
 0x12d   :  { %v1784_v38 = vld [vmem:[#allocation2 + $0x6] sm:$0x1]  ;;  %v1263_v44 = vld [vmem:[%s5186_s1 + $0x30] sm:$0xff] }
 0x12e   :  { %1236 = vst [vmem:[#allocation2 + $0xc] sm:$0x3] %v929_v36  ;;  %v1793_v31 = vld [vmem:[#allocation2 + $0x6] sm:$0x1] }
 0x12f   :  { %1237 = vst [vmem:[#allocation2 + $0xe] sm:$0x3] %v952_v37 }
 0x130   :  { %1785 = vst.msk [vmem:[#allocation6] sm:$0x1] %vm1347_vm4, %v1784_v38  ;;  %v1358_v42 = vld [vmem:[#allocation2 + $0x18] sm:$0x1]  ;;  %3603 = vmatpush.xpose.msk.msra.mxu0 %vm1273_vm6, %v1270_v32  ;;  %v1266_v38 = vld [vmem:[%s5186_s1 + $0x48] sm:$0xff] }
 0x131   :  { %1360 = vrot.lane.b32.xlu2 %v1358_v42, %s3959_s8  ;;  %v1381_v51 = vld [vmem:[#allocation2 + $0x18] sm:$0x1]  ;;  %v1089_v54 = vpop.f32.mrf.mxu1 }
 0x132   :  { %v1090_v55 = vadd.f32 %v3856_v50, %v1089_v54  ;;  %v1405_v42 = vld [vmem:[#allocation2 + $0x18] sm:$0x1] }
 0x133   :  { %v1020_v45 = vpop.f32.mrf.mxu2  ;;  %v1043_v46 = vpop.f32.mrf.mxu3 }
 0x134   :  { %v1021_v47 = vadd.f32 %v3847_v40, %v1020_v45  ;;  %v1044_v48 = vadd.f32 %v3855_v41, %v1043_v46  ;;  %1243 = vst [vmem:[#allocation2 + $0x1a] sm:$0x3] %v1090_v55  ;;  %v1158_v25 = vpop.f32.mrf.mxu0  ;;  %3604 = vmatpush.xpose.msk.msra.mxu0 %vm1273_vm6, %v1269_v33  ;;  %v1262_v46 = vld [vmem:[%s5186_s1 + $0x28] sm:$0xff] }
 0x135   :  { %v1350_v49 = vld [vmem:[#allocation2 + $0xc] sm:$0x1]  ;;  %v1159_v26 = vadd.f32 %v3859_v4, %v1158_v25  ;;  %v1801_v25 = vld [vmem:[#allocation2 + $0x6] sm:$0x1]  ;;  %v2537_v30 = vld [vmem:[#allocation2 + $0xd] sm:$0x1] }
 0x136   :  { %1240 = vst [vmem:[#allocation2 + $0x14] sm:$0x3] %v1021_v47  ;;  %1352 = vrot.lane.b32.xlu1 %v1350_v49, %s3960_s20  ;;  %v1399_v61 = vld [vmem:[#allocation2 + $0xc] sm:$0x1]  ;;  %v1589_v10 = vld [vmem:[#allocation2 + $0xe] sm:$0x1] }
 0x137   :  { %1241 = vst [vmem:[#allocation2 + $0x16] sm:$0x3] %v1044_v48  ;;  %v1595_v15 = vld [vmem:[#allocation2 + $0xe] sm:$0x1]  ;;  %v1379_v24 = vld [vmem:[#allocation2 + $0xc] sm:$0x1] }
 0x138   :  { %1596 = vst.msk [vmem:[#allocation4 + $0x3] sm:$0x1] %vm1355_vm5, %v1595_v15  ;;  %3605 = vmatpush.xpose.msk.msra.mxu0 %vm1273_vm6, %v1268_v34  ;;  %v1261_v47 = vld [vmem:[%s5186_s1 + $0x20] sm:$0xff]  ;;  %v1864_v15 = vld [vmem:[#allocation2 + $0x10] sm:$0x1] }
 0x139   :  { %1383 = vrot.lane.b32.xlu2 %v1381_v51, %s3960_s20  ;;  %1246 = vst [vmem:[#allocation2 + $0x20] sm:$0x3] %v1159_v26  ;;  %v1260_v51 = vld [vmem:[%s5186_s1 + $0x18] sm:$0xff]  ;;  %v2581_v33 = vld [vmem:[#allocation2 + $0xd] sm:$0x1] }
 0x13b   :  { %v1112_v56 = vpop.f32.mrf.mxu2  ;;  %v1135_v57 = vpop.f32.mrf.mxu3  ;;  %v1598_v11 = vld [vmem:[#allocation2 + $0x1a] sm:$0x1] }
 0x13c   :  { %v1113_v58 = vadd.f32 %v3850_v52, %v1112_v56  ;;  %v1136_v60 = vadd.f32 %v3857_v53, %v1135_v57  ;;  %v1604_v12 = vld [vmem:[#allocation2 + $0x1a] sm:$0x1]  ;;  %3606 = vmatpush.xpose.msk.msra.mxu0 %vm1273_vm6, %v1267_v35  ;;  %v1259_v52 = vld [vmem:[%s5186_s1 + $0x10] sm:$0xff]  ;;  %v1258_v53 = vld [vmem:[%s5186_s1 + $0x8] sm:$0xff] }
 0x13d   :  { %v1873_v19 = vld [vmem:[#allocation2 + $0x14] sm:$0x1]  ;;  %v2535_v56 = vld [vmem:[#allocation2 + $0x1] sm:$0x1]  ;;  %v2760_v35 = vld [vmem:[#allocation2 + $0x3] sm:$0x1] }
 0x13e   :  { %1244 = vst [vmem:[#allocation2 + $0x1c] sm:$0x3] %v1113_v58  ;;  %1401 = vrot.lane.b32.xlu1 %v1399_v61, %s3958_s25  ;;  %v1881_v20 = vld [vmem:[#allocation2 + $0x14] sm:$0x1]  ;;  %v1250_v58 = vlaneseq }
 0x13f   :  { %1245 = vst [vmem:[#allocation2 + $0x1e] sm:$0x3] %v1136_v60  ;;  %v1257_v60 = vld [vmem:[%s5186_s1] sm:$0xff] }
 0x140   :  { %3607 = vmatpush.xpose.msk.msra.mxu0 %vm1273_vm6, %v1266_v38  ;;  %v4297_v61 = vshrl.u32 %v1250_v58, 7  ;;  %v2774_v38 = vld [vmem:[#allocation2 + $0xf] sm:$0x1] }
 0x143   :  { %v1204_v0 = vpop.f32.mrf.mxu2  ;;  %v1227_v1 = vpop.f32.mrf.mxu3 }
 0x144   :  { %v1205_v2 = vadd.f32 %v3853_v62, %v1204_v0  ;;  %v1228_v3 = vadd.f32 %v3858_v63, %v1227_v1  ;;  %3608 = vmatpush.xpose.msk.msra.mxu0 %vm1273_vm6, %v1265_v39  ;;  %v4299_v62 = vand.u32 127, %v1250_v58  ;;  %v2543_v39 = vld [vmem:[#allocation2 + $0x19] sm:$0x1] }
 0x146   :  { %1248 = vst [vmem:[#allocation2 + $0x24] sm:$0x3] %v1205_v2  ;;  %vm1254_vm9 = vcmp.eq.s32.totalorder %v4297_v61, %v4299_v62  ;;  %v1799_v2 = vld [vmem:[#allocation2 + $0xa] sm:$0x1] }
 0x147   :  { %1249 = vst [vmem:[#allocation2 + $0x26] sm:$0x3] %v1228_v3  ;;  %v4308_v0 = vsel %vm1254_vm9, 1.0, %v3957_v59  ;;  %v3846_v59 = vld [vmem:[%s5188_s3 + $0x11] ss:$0 sm:$0xff] }
 0x148   :  { %3609 = vmatpush.xpose.msk.msra.mxu0 %vm1273_vm6, %v1264_v43  ;;  %1800 = vst.msk [vmem:[#allocation6 + $0x4] sm:$0x1] %vm1355_vm5, %v1799_v2  ;;  %v2563_v43 = vld [vmem:[#allocation2 + $0x19] sm:$0x1] }
 0x14c   :  { %3610 = vmatpush.xpose.msk.msra.mxu0 %vm1273_vm6, %v1263_v44 }
 0x14d   :  { %v1387_v5 = vld [vmem:[#allocation2 + $0x24] sm:$0x1] }
 0x14e   :  { %v1407_v6 = vld [vmem:[#allocation2 + $0x24] sm:$0x1]  ;;  %1389 = vrot.lane.b32.xlu1 %v1387_v5, %s3959_s8  ;;  %v1611_v13 = vld [vmem:[#allocation2 + $0x26] sm:$0x1]  ;;  %v1665_v5 = vld [vmem:[#allocation2 + $0x8] sm:$0x1] }
 0x14f   :  { %v1366_v8 = vld [vmem:[#allocation2 + $0x24] sm:$0x1]  ;;  %1409 = vrot.lane.b32.xlu2 %v1407_v6, %s3960_s20  ;;  %v1617_v14 = vld [vmem:[#allocation2 + $0x26] sm:$0x1]  ;;  %v2788_v2 = vld [vmem:[#allocation2 + $0x27] sm:$0x1] }
 0x150   :  { %1368 = vrot.lane.b32.xlu0 %v1366_v8, %s3958_s25  ;;  %3611 = vmatpush.xpose.msk.msra.mxu0 %vm1273_vm6, %v1262_v46  ;;  %v547_v8 = vadd.f32 %v3846_v59, %v4137_v7  ;;  %v2589_v46 = vld [vmem:[#allocation2 + $0x25] sm:$0x1]  ;;  %v2086_v59 = vld [vmem:[#allocation2 + $0x20] sm:$0x1] }
 0x154   :  { %3612 = vmatpush.xpose.msk.msra.mxu0 %vm1273_vm6, %v1261_v47  ;;  %v2569_v47 = vld [vmem:[#allocation2 + $0x25] sm:$0x1] }
 0x156   :  { %1584 = vrot.lane.b32.xlu1 %v1582_v9, %s3958_s25  ;;  %v680_v9 = vld [vmem:[#allocation11 + $0x238] sm:$0xff] }
 0x157   :  { %1591 = vrot.lane.b32.xlu2 %v1589_v10, %s3960_s20  ;;  %v679_v10 = vld [vmem:[#allocation11 + $0x230] sm:$0xff]  ;;  %1176 = vmatpush.msrb.mxu1 %v680_v9 }
 0x158   :  { %3613 = vmatpush.xpose.msk.msra.mxu0 %vm1273_vm6, %v1260_v51 }
 0x159   :  { %1177 = vmatpush.msrb.mxu1 %v679_v10  ;;  %v2828_v10 = vld [vmem:[#allocation2 + $0x5] sm:$0x1] }
 0x15c   :  { %3614 = vmatpush.xpose.msk.msra.mxu0 %vm1273_vm6, %v1259_v52  ;;  %v2768_v52 = vld [vmem:[#allocation2 + $0xf] sm:$0x1] }
 0x15e   :  { %1600 = vrot.lane.b32.xlu1 %v1598_v11, %s3959_s8  ;;  %v678_v11 = vld [vmem:[#allocation11 + $0x228] sm:$0xff] }
 0x15f   :  { %1606 = vrot.lane.b32.xlu2 %v1604_v12, %s3960_s20  ;;  %v606_v12 = vmax.f32 %v547_v8, 0.0  ;;  %1178 = vmatpush.msrb.mxu1 %v678_v11  ;;  %v2094_v11 = vld [vmem:[#allocation2 + $0x20] sm:$0x1] }
 0x160   :  { %3615 = vmatpush.xpose.msk.msra.mxu0 %vm1273_vm6, %v1258_v53 }
 0x164   :  { %3616 = vmatpush.xpose.msk.msra.mxu0 %vm1273_vm6, %v1257_v60  ;;  %v2776_v60 = vld [vmem:[#allocation2 + $0x1b] sm:$0x1] }
 0x166   :  { %1613 = vrot.lane.b32.xlu1 %v1611_v13, %s3958_s25  ;;  %v677_v13 = vld [vmem:[#allocation11 + $0x220] sm:$0xff] }
 0x167   :  { %1619 = vrot.lane.b32.xlu2 %v1617_v14, %s3959_s8  ;;  %3617 = vmatmul.msk.f32.vlgmr.msra.gmra.mxu0 %vm1273_vm6, %v4308_v0 }
 0x168   :  { %1179 = vmatpush.msrb.mxu1 %v677_v13 }
 0x169   :  { %3597 = vmatmul.msk.f32.vlgmr.msrb.gmra.mxu1 %vm769_vm1, %v606_v12 }
 0x16e   :  { %1654 = vrot.lane.b32.xlu1 %v1652_v16, %s3958_s25 }
 0x16f   :  { %1661 = vrot.lane.b32.xlu2 %v1659_v17, %s3960_s20 }
 0x176   :  { %1669 = vrot.lane.b32.xlu1 %v1667_v18, %s3958_s25 }
 0x17e   :  { %1875 = vrot.lane.b32.xlu1 %v1873_v19, %s3960_s20 }
 0x186   :  { %1883 = vrot.lane.b32.xlu1 %v1881_v20, %s3958_s25  ;;  %v1807_v20 = vld [vmem:[#allocation2 + $0xa] sm:$0x1] }
 0x18b   :  { %v1376_v22 = vpop.permute.xlu0 %1375  ;;  %v1361_v23 = vpop.permute.xlu2 %1360 }
 0x18c   :  { %1378 = vst.msk [vmem:[#allocation3 + $0x1] sm:$0x1] %vm1347_vm4, %v1376_v22 }
 0x18d   :  { %1380 = vst.msk [vmem:[#allocation3 + $0x1] sm:$0x1] %vm1355_vm5, %v1379_v24 }
 0x18e   :  { %1789 = vrot.lane.b32.xlu1 %v1787_v21, %s3960_s20 }
 0x193   :  { %v1384_v28 = vpop.permute.xlu2 %1383  ;;  %v1396_v29 = vpop.permute.xlu0 %1395 }
 0x194   :  { %1386 = vst.msk [vmem:[#allocation3 + $0x1] sm:$0x1] %vm1363_vm7, %v1384_v28 }
 0x195   :  { %1398 = vst.msk [vmem:[#allocation3 + $0x2] sm:$0x1] %vm1347_vm4, %v1396_v29 }
 0x196   :  { %1795 = vrot.lane.b32.xlu1 %v1793_v31, %s3958_s25 }
 0x19e   :  { %1809 = vrot.lane.b32.xlu1 %v1807_v20, %s3958_s25 }
 0x1a8   :  { %v1353_v36 = vpop.permute.xlu1 %1352 }
 0x1a9   :  { %v1410_v37 = vpop.permute.xlu2 %1409  ;;  %1356 = vst.msk [vmem:[#allocation3] sm:$0x1] %vm1355_vm5, %v1353_v36  ;;  %v1866_v36 = vld [vmem:[#allocation2 + $0x10] sm:$0x1] }
 0x1aa   :  { %1364 = vst.msk [vmem:[#allocation3] sm:$0x1] %vm1363_vm7, %v1361_v23 }
 0x1b0   :  { %v1402_v40 = vpop.permute.xlu1 %1401 }
 0x1b1   :  { %v1592_v41 = vpop.permute.xlu2 %1591  ;;  %1404 = vst.msk [vmem:[#allocation3 + $0x2] sm:$0x1] %vm1355_vm5, %v1402_v40 }
 0x1b2   :  { %1406 = vst.msk [vmem:[#allocation3 + $0x2] sm:$0x1] %vm1363_vm7, %v1405_v42  ;;  %v2549_v42 = vld [vmem:[#allocation2 + $0x25] sm:$0x1] }
 0x1b3   :  { %1412 = vst.msk [vmem:[#allocation3 + $0x2] sm:$0x1] %vm1371_vm8, %v1410_v37 }
 0x1b4   :  { %1594 = vst.msk [vmem:[#allocation4 + $0x2] sm:$0x1] %vm1355_vm5, %v1592_v41 }
 0x1b9   :  { %v1607_v45 = vpop.permute.xlu2 %1606 }
 0x1ba   :  { %1609 = vst.msk [vmem:[#allocation4 + $0x5] sm:$0x1] %vm1363_vm7, %v1607_v45 }
 0x1c0   :  { %v1390_v48 = vpop.permute.xlu1 %1389 }
 0x1c1   :  { %v1620_v49 = vpop.permute.xlu2 %1619  ;;  %1392 = vst.msk [vmem:[#allocation3 + $0x1] sm:$0x1] %vm1371_vm8, %v1390_v48  ;;  %v3860_v48 = vld [vmem:[%s5190_s5 + $0x11] ss:$0 sm:$0xff] }
 0x1c2   :  { %v1369_v50 = vpop.permute.xlu0 %1368  ;;  %1622 = vst.msk [vmem:[#allocation4 + $0x7] sm:$0x1] %vm1371_vm8, %v1620_v49 }
 0x1c3   :  { %1372 = vst.msk [vmem:[#allocation3] sm:$0x1] %vm1371_vm8, %v1369_v50 }
 0x1c8   :  { %v1585_v54 = vpop.permute.xlu1 %1584 }
 0x1c9   :  { %v1662_v55 = vpop.permute.xlu2 %1661  ;;  %1587 = vst.msk [vmem:[#allocation4 + $0x1] sm:$0x1] %vm1347_vm4, %v1585_v54  ;;  %v2762_v54 = vld [vmem:[#allocation2 + $0x3] sm:$0x1] }
 0x1ca   :  { %v1413_v57 = vld [vmem:[#allocation3] sm:$0x7]  ;;  %1664 = vst.msk [vmem:[#allocation5] sm:$0x1] %vm1355_vm5, %v1662_v55  ;;  %v2782_v55 = vld [vmem:[#allocation2 + $0x1b] sm:$0x1] }
 0x1cb   :  { %2536 = vst.msk [vmem:[#allocation3] sm:$0x1] %vm1347_vm4, %v2535_v56  ;;  %1414 = vxpose.xlu0.b32.start.end [1/1] (short) %v1413_v57, 128 }
 0x1d0   :  { %v1601_v63 = vpop.permute.xlu1 %1600 }
 0x1d1   :  { %1603 = vst.msk [vmem:[#allocation4 + $0x4] sm:$0x1] %vm1363_vm7, %v1601_v63  ;;  %v2794_v63 = vld [vmem:[#allocation2 + $0x27] sm:$0x1] }
 0x1d8   :  { %v1614_v1 = vpop.permute.xlu1 %1613 }
 0x1d9   :  { %1616 = vst.msk [vmem:[#allocation4 + $0x6] sm:$0x1] %vm1371_vm8, %v1614_v1 }
 0x1e0   :  { %v1655_v3 = vpop.permute.xlu1 %1654  ;;  %v4351_v40 = vld [vmem:[#allocation4] sm:$0xff] }
 0x1e1   :  { %1657 = vst.msk [vmem:[#allocation5 + $0x1] sm:$0x1] %vm1347_vm4, %v1655_v3 }
 0x1e2   :  { %1666 = vst.msk [vmem:[#allocation5 + $0x1] sm:$0x1] %vm1355_vm5, %v1665_v5 }
 0x1e3   :  { %2761 = vst.msk [vmem:[#allocation4] sm:$0x1] %vm1347_vm4, %v2760_v35 }
 0x1e4   :  { %v1342_v19 = vpop.f32.mrf.mxu0  ;;  %2775 = vst.msk [vmem:[#allocation4 + $0x3] sm:$0x1] %vm1355_vm5, %v2774_v38 }
 0x1e5   :  { %1345 = vst [vmem:[#allocation7 + $0x1] sm:$0x2] %v1342_v19  ;;  %3618 = vmatpush.msk.msra.mxu1 %vm1494_vm10, %v1342_v19 }
 0x1e6   :  { %v1181_v49 = vpop.f32.mrf.mxu1 }
 0x1e7   :  { %v1182_v51 = vadd.f32 %v3860_v48, %v1181_v49 }
 0x1e8   :  { %v1670_v6 = vpop.permute.xlu1 %1669 }
 0x1e9   :  { %1672 = vst.msk [vmem:[#allocation5 + $0x2] sm:$0x1] %vm1355_vm5, %v1670_v6  ;;  %v2079_v6 = vld [vmem:[#allocation2 + $0x1c] sm:$0x1] }
 0x1ea   :  { %1247 = vst [vmem:[#allocation2 + $0x22] sm:$0x3] %v1182_v51  ;;  %v2092_v51 = vld [vmem:[#allocation2 + $0x20] sm:$0x1] }
 0x1f0   :  { %v1673_v14 = vld [vmem:[#allocation5] sm:$0x7]  ;;  %v1876_v16 = vpop.permute.xlu1 %1875 }
 0x1f1   :  { %1865 = vst.msk [vmem:[#allocation5] sm:$0x1] %vm1347_vm4, %v1864_v15  ;;  %1675 = vxpose.xlu2.b32.start.end [1/1] (short) (narrow) %v1673_v14, 64  ;;  %v2842_v14 = vld [vmem:[#allocation2 + $0x9] sm:$0x1] }
 0x1f2   :  { %1878 = vst.msk [vmem:[#allocation5] sm:$0x1] %vm1355_vm5, %v1876_v16  ;;  %v2834_v15 = vld [vmem:[#allocation2 + $0x9] sm:$0x1]  ;;  %v1998_v16 = vld [vmem:[#allocation2 + $0x12] sm:$0x1] }
 0x1f8   :  { %v1884_v7 = vpop.permute.xlu1 %1883 }
 0x1f9   :  { %1886 = vst.msk [vmem:[#allocation5 + $0x2] sm:$0x1] %vm1355_vm5, %v1884_v7 }
 0x200   :  { %v1790_v17 = vpop.permute.xlu1 %1789 }
 0x201   :  { %1792 = vst.msk [vmem:[#allocation6 + $0x3] sm:$0x1] %vm1355_vm5, %v1790_v17 }
 0x208   :  { %v1796_v18 = vpop.permute.xlu1 %1795 }
 0x209   :  { %1798 = vst.msk [vmem:[#allocation6 + $0x1] sm:$0x1] %vm1347_vm4, %v1796_v18  ;;  %v2013_v18 = vld [vmem:[#allocation2 + $0x16] sm:$0x1] }
 0x210   :  { %v1810_v57 = vpop.permute.xlu1 %1809 }
 0x211   :  { %1812 = vst.msk [vmem:[#allocation6 + $0x5] sm:$0x1] %vm1355_vm5, %v1810_v57 }
 0x26f   :  { %v1430_v4 = vpop.trf.xlu0 }
 0x270   :  { %3619 = vmatmul.msk.f32.vlgmr.msra.gmra.mxu1 %vm1273_vm6, %v1430_v4 }
 0x277   :  { %v1431_v21 = vpop.trf.xlu0 }
 0x278   :  { %3620 = vmatmul.msk.f32.gmra.mxu1 %vm1273_vm6, %v1431_v21 }
 0x27f   :  { %v1432_v22 = vpop.trf.xlu0 }
 0x280   :  { %3621 = vmatmul.msk.f32.gmra.mxu1 %vm1273_vm6, %v1432_v22 }
 0x287   :  { %v1433_v23 = vpop.trf.xlu0 }
 0x288   :  { %3622 = vmatmul.msk.f32.gmra.mxu1 %vm1273_vm6, %v1433_v23  ;;  %v2587_v23 = vld [vmem:[#allocation2 + $0x19] sm:$0x1] }
 0x28a   :  { %v4338_v28 = vpop.trf.xlu2 }
 0x28f   :  { %v1434_v24 = vpop.trf.xlu0 }
 0x290   :  { %3623 = vmatmul.msk.f32.gmra.mxu1 %vm1273_vm6, %v1434_v24 }
 0x292   :  { %1803 = vrot.lane.b32.xlu2 %v1801_v25, %s3959_s8  ;;  %v4342_v31 = vpop.trf.xlu2 }
 0x297   :  { %v1435_v26 = vpop.trf.xlu0 }
 0x298   :  { %3624 = vmatmul.msk.f32.gmra.mxu1 %vm1273_vm6, %v1435_v26 }
 0x29a   :  { %2577 = vrot.lane.b32.xlu2 %v2575_v27, %s3959_s8  ;;  %v4347_v37 = vpop.trf.xlu2 }
 0x29f   :  { %v1436_v29 = vpop.trf.xlu0 }
 0x2a0   :  { %3625 = vmatmul.msk.f32.gmra.mxu1 %vm1273_vm6, %v1436_v29 }
 0x2a2   :  { %2539 = vrot.lane.b32.xlu2 %v2537_v30, %s3960_s20  ;;  %v4358_v44 = vpop.trf.xlu2 }
 0x2a7   :  { %v1437_v32 = vpop.trf.xlu0 }
 0x2a8   :  { %3626 = vmatmul.msk.f32.gmra.mxu1 %vm1273_vm6, %v1437_v32 }
 0x2aa   :  { %2583 = vrot.lane.b32.xlu2 %v2581_v33, %s3958_s25  ;;  %v4366_v50 = vpop.trf.xlu2  ;;  %v1879_v33 = vld [vmem:[#allocation2 + $0x14] sm:$0x1] }
 0x2af   :  { %v1438_v34 = vpop.trf.xlu0 }
 0x2b0   :  { %3627 = vmatmul.msk.f32.gmra.mxu1 %vm1273_vm6, %v1438_v34 }
 0x2b1   :  { %1868 = vrot.lane.b32.xlu0 %v1866_v36, %s3958_s25 }
 0x2b2   :  { %2545 = vrot.lane.b32.xlu2 %v2543_v39, %s3959_s8  ;;  %v4371_v56 = vpop.trf.xlu2 }
 0x2b7   :  { %v1439_v41 = vpop.trf.xlu0 }
 0x2b8   :  { %3628 = vmatmul.msk.f32.gmra.mxu1 %vm1273_vm6, %v1439_v41 }
 0x2b9   :  { %2551 = vrot.lane.b32.xlu0 %v2549_v42, %s3958_s25  ;;  %v2077_v42 = vld [vmem:[#allocation2 + $0x1c] sm:$0x1] }
 0x2ba   :  { %2565 = vrot.lane.b32.xlu2 %v2563_v43, %s3960_s20  ;;  %v4378_v3 = vpop.trf.xlu2 }
 0x2bf   :  { %v1440_v45 = vpop.trf.xlu0 }
 0x2c0   :  { %3629 = vmatmul.msk.f32.gmra.mxu1 %vm1273_vm6, %v1440_v45 }
 0x2c1   :  { %2591 = vrot.lane.b32.xlu0 %v2589_v46, %s3960_s20 }
 0x2c2   :  { %2571 = vrot.lane.b32.xlu2 %v2569_v47, %s3959_s8  ;;  %v4385_v8 = vpop.trf.xlu2 }
 0x2c7   :  { %v1441_v53 = vpop.trf.xlu0 }
 0x2c8   :  { %3630 = vmatmul.msk.f32.gmra.mxu1 %vm1273_vm6, %v1441_v53 }
 0x2c9   :  { %2770 = vrot.lane.b32.xlu0 %v2768_v52, %s3960_s20 }
 0x2ca   :  { %2764 = vrot.lane.b32.xlu2 %v2762_v54, %s3958_s25 }
 0x2cf   :  { %v1442_v58 = vpop.trf.xlu0 }
 0x2d0   :  { %3631 = vmatmul.msk.f32.gmra.mxu1 %vm1273_vm6, %v1442_v58 }
 0x2d1   :  { %2784 = vrot.lane.b32.xlu0 %v2782_v55, %s3960_s20 }
 0x2d2   :  { %2778 = vrot.lane.b32.xlu2 %v2776_v60, %s3959_s8 }
 0x2d7   :  { %v1443_v1 = vpop.trf.xlu0 }
 0x2d8   :  { %3632 = vmatmul.msk.f32.gmra.mxu1 %vm1273_vm6, %v1443_v1 }
 0x2d9   :  { %2796 = vrot.lane.b32.xlu0 %v2794_v63, %s3959_s8  ;;  %v2826_v63 = vld [vmem:[#allocation2 + $0x5] sm:$0x1] }
 0x2da   :  { %2790 = vrot.lane.b32.xlu2 %v2788_v2, %s3958_s25 }
 0x2df   :  { %v1444_v5 = vpop.trf.xlu0 }
 0x2e0   :  { %3633 = vmatmul.msk.f32.gmra.mxu1 %vm1273_vm6, %v1444_v5 }
 0x2e1   :  { %2088 = vrot.lane.b32.xlu0 %v2086_v59, %s3960_s20 }
 0x2e2   :  { %2081 = vrot.lane.b32.xlu2 %v2079_v6, %s3958_s25  ;;  %v2840_v6 = vld [vmem:[#allocation2 + $0x9] sm:$0x1] }
 0x2e7   :  { %v1445_v9 = vpop.trf.xlu0 }
 0x2e8   :  { %3634 = vmatmul.msk.f32.gmra.mxu1 %vm1273_vm6, %v1445_v9 }
 0x2e9   :  { %2830 = vrot.lane.b32.xlu0 %v2828_v10, %s3958_s25 }
 0x2ea   :  { %2096 = vrot.lane.b32.xlu2 %v2094_v11, %s3958_s25 }
 0x2ec   :  { %v1804_v12 = vpop.permute.xlu2 %1803 }
 0x2ed   :  { %v4390_v13 = vpop.f32.mrf.mxu1  ;;  %1806 = vst.msk [vmem:[#allocation6 + $0x2] sm:$0x1] %vm1347_vm4, %v1804_v12 }
 0x2f1   :  { %2844 = vrot.lane.b32.xlu0 %v2842_v14, %s3958_s25 }
 0x2f2   :  { %2836 = vrot.lane.b32.xlu2 %v2834_v15, %s3960_s20  ;;  %v3035_v15 = vld [vmem:[#allocation2 + $0x11] sm:$0x1] }
 0x2f4   :  { %v4395_v7 = vld [vmem:[#allocation6] sm:$0x3f]  ;;  %v2578_v17 = vpop.permute.xlu2 %2577 }
 0x2f5   :  { %1999 = vst.msk [vmem:[#allocation6] sm:$0x1] %vm1347_vm4, %v1998_v16  ;;  %v4398_v19 = vpop.f32.mrf.mxu1 }
 0x2f6   :  { %2014 = vst.msk [vmem:[#allocation6 + $0x4] sm:$0x1] %vm1355_vm5, %v2013_v18 }
 0x2f7   :  { %2580 = vst.msk [vmem:[#allocation3 + $0x2] sm:$0x1] %vm1347_vm4, %v2578_v17 }
 0x2fc   :  { %v2540_v20 = vpop.permute.xlu2 %2539 }
 0x2fd   :  { %v4402_v4 = vpop.f32.mrf.mxu1  ;;  %2542 = vst.msk [vmem:[#allocation3] sm:$0x1] %vm1355_vm5, %v2540_v20 }
 0x304   :  { %v2584_v21 = vpop.permute.xlu2 %2583 }
 0x305   :  { %v4405_v22 = vpop.f32.mrf.mxu1  ;;  %2586 = vst.msk [vmem:[#allocation3 + $0x2] sm:$0x1] %vm1355_vm5, %v2584_v21 }
 0x306   :  { %2588 = vst.msk [vmem:[#allocation3 + $0x2] sm:$0x1] %vm1363_vm7, %v2587_v23 }
 0x30c   :  { %v2546_v24 = vpop.permute.xlu2 %2545 }
 0x30d   :  { %v4409_v25 = vpop.f32.mrf.mxu1  ;;  %2548 = vst.msk [vmem:[#allocation3] sm:$0x1] %vm1363_vm7, %v2546_v24 }
 0x314   :  { %v4412_v26 = vpop.permute.xlu2 %2565 }
 0x315   :  { %v4414_v27 = vpop.f32.mrf.mxu1 }
 0x31c   :  { %v4416_v29 = vpop.permute.xlu2 %2571 }
 0x31d   :  { %v4418_v30 = vpop.f32.mrf.mxu1 }
 0x323   :  { %v1869_v32 = vpop.permute.xlu0 %1868 }
 0x324   :  { %1871 = vst.msk [vmem:[#allocation5 + $0x1] sm:$0x1] %vm1347_vm4, %v1869_v32  ;;  %v2765_v34 = vpop.permute.xlu2 %2764  ;;  %v1569_v32 = vmax.f32 %v4418_v30, 0.0 }
 0x325   :  { %1880 = vst.msk [vmem:[#allocation5 + $0x1] sm:$0x1] %vm1355_vm5, %v1879_v33  ;;  %v4422_v35 = vpop.f32.mrf.mxu1  ;;  %v1568_v33 = vmax.f32 %v4414_v27, 0.0  ;;  %v2555_v27 = vld [vmem:[#allocation2 + $0x1] sm:$0x1] }
 0x326   :  { %2767 = vst.msk [vmem:[#allocation4 + $0x1] sm:$0x1] %vm1347_vm4, %v2765_v34  ;;  %v1570_v24 = vmax.f32 %v4422_v35, 0.0  ;;  %v1567_v34 = vmax.f32 %v4409_v25, 0.0  ;;  %v1563_v35 = vmax.f32 %v4390_v13, 0.0 }
 0x32b   :  { %v2552_v36 = vpop.permute.xlu0 %2551 }
 0x32c   :  { %v1887_v38 = vld [vmem:[#allocation5] sm:$0x7]  ;;  %2554 = vst.msk [vmem:[#allocation3] sm:$0x1] %vm1371_vm8, %v2552_v36  ;;  %v2779_v39 = vpop.permute.xlu2 %2778  ;;  %v1566_v36 = vmax.f32 %v4405_v22, 0.0 }
 0x32d   :  { %v1539_v41 = vpop.f32.mrf.mxu1  ;;  %1889 = vxpose.xlu1.b32.start.end [1/1] (short) (narrow) %v1887_v38, 64  ;;  %2781 = vst.msk [vmem:[#allocation4 + $0x4] sm:$0x1] %vm1363_vm7, %v2779_v39  ;;  %v1565_v38 = vmax.f32 %v4402_v4, 0.0  ;;  %v1564_v39 = vmax.f32 %v4398_v19, 0.0 }
 0x32e   :  { %2078 = vst.msk [vmem:[#allocation5] sm:$0x1] %vm1347_vm4, %v2077_v42  ;;  %v1571_v23 = vmax.f32 %v1539_v41, 0.0  ;;  %v2007_v41 = vld [vmem:[#allocation2 + $0x12] sm:$0x1] }
 0x32f   :  { %v3037_v19 = vld [vmem:[#allocation2 + $0x11] sm:$0x1]  ;;  %v2015_v42 = vld [vmem:[#allocation2 + $0x12] sm:$0x1] }
 0x333   :  { %v2592_v43 = vpop.permute.xlu0 %2591 }
 0x334   :  { %2594 = vst.msk [vmem:[#allocation3 + $0x2] sm:$0x1] %vm1371_vm8, %v2592_v43  ;;  %v2791_v45 = vpop.permute.xlu2 %2790 }
 0x335   :  { %v1542_v46 = vpop.f32.mrf.mxu1  ;;  %2793 = vst.msk [vmem:[#allocation4 + $0x6] sm:$0x1] %vm1371_vm8, %v2791_v45  ;;  %v2220_v45 = vld [vmem:[#allocation2 + $0x1e] sm:$0x1] }
 0x336   :  { %v1572_v21 = vmax.f32 %v1542_v46, 0.0 }
 0x33b   :  { %v2771_v47 = vpop.permute.xlu0 %2770 }
 0x33c   :  { %2773 = vst.msk [vmem:[#allocation4 + $0x2] sm:$0x1] %vm1355_vm5, %v2771_v47  ;;  %v2082_v48 = vpop.permute.xlu2 %2081 }
 0x33d   :  { %v1545_v49 = vpop.f32.mrf.mxu1  ;;  %2084 = vst.msk [vmem:[#allocation5 + $0x1] sm:$0x1] %vm1347_vm4, %v2082_v48  ;;  %v2021_v48 = vld [vmem:[#allocation2 + $0x16] sm:$0x1] }
 0x33e   :  { %2093 = vst.msk [vmem:[#allocation5 + $0x1] sm:$0x1] %vm1355_vm5, %v2092_v51  ;;  %v1573_v20 = vmax.f32 %v1545_v49, 0.0 }
 0x343   :  { %v2785_v52 = vpop.permute.xlu0 %2784 }
 0x344   :  { %2787 = vst.msk [vmem:[#allocation4 + $0x5] sm:$0x1] %vm1363_vm7, %v2785_v52  ;;  %v2097_v53 = vpop.permute.xlu2 %2096 }
 0x345   :  { %v1548_v54 = vpop.f32.mrf.mxu1  ;;  %2099 = vst.msk [vmem:[#allocation5 + $0x2] sm:$0x1] %vm1355_vm5, %v2097_v53 }
 0x346   :  { %v1574_v18 = vmax.f32 %v1548_v54, 0.0 }
 0x34b   :  { %v2797_v55 = vpop.permute.xlu0 %2796 }
 0x34c   :  { %2799 = vst.msk [vmem:[#allocation4 + $0x7] sm:$0x1] %vm1371_vm8, %v2797_v55  ;;  %v2837_v5 = vpop.permute.xlu2 %2836 }
 0x34d   :  { %v1551_v57 = vpop.f32.mrf.mxu1 }
 0x34e   :  { %v1575_v17 = vmax.f32 %v1551_v57, 0.0 }
 0x353   :  { %v2089_v58 = vpop.permute.xlu0 %2088 }
 0x354   :  { %2091 = vst.msk [vmem:[#allocation5] sm:$0x1] %vm1355_vm5, %v2089_v58  ;;  %v3043_v58 = vld [vmem:[#allocation2 + $0x15] sm:$0x1] }
 0x355   :  { %v1554_v60 = vpop.f32.mrf.mxu1 }
 0x356   :  { %v1576_v14 = vmax.f32 %v1554_v60, 0.0 }
 0x35b   :  { %v2100_v1 = vld [vmem:[#allocation5] sm:$0x7]  ;;  %v2831_v2 = vpop.permute.xlu0 %2830 }
 0x35c   :  { %2827 = vst.msk [vmem:[#allocation5] sm:$0x1] %vm1347_vm4, %v2826_v63  ;;  %2102 = vxpose.xlu0.b32.start.end [1/1] (short) (narrow) %v2100_v1, 64 }
 0x35d   :  { %2839 = vst.msk [vmem:[#allocation5] sm:$0x1] %vm1355_vm5, %v2837_v5  ;;  %v1557_v59 = vpop.f32.mrf.mxu1 }
 0x35e   :  { %2833 = vst.msk [vmem:[#allocation5 + $0x1] sm:$0x1] %vm1347_vm4, %v2831_v2  ;;  %v1577_v12 = vmax.f32 %v1557_v59, 0.0  ;;  %v2214_v2 = vld [vmem:[#allocation2 + $0x22] sm:$0x1] }
 0x35f   :  { %2841 = vst.msk [vmem:[#allocation5 + $0x1] sm:$0x1] %vm1355_vm5, %v2840_v6 }
 0x363   :  { %v2845_v9 = vpop.permute.xlu0 %2844 }
 0x364   :  { %2847 = vst.msk [vmem:[#allocation5 + $0x2] sm:$0x1] %vm1355_vm5, %v2845_v9 }
 0x365   :  { %v1560_v10 = vpop.f32.mrf.mxu1 }
 0x366   :  { %v1578_v11 = vmax.f32 %v1560_v10, 0.0 }
 0x368   :  { %1624 = vmatpush.msrb.mxu2 %v1578_v11  ;;  %v2966_v11 = vld [vmem:[#allocation2 + $0x7] sm:$0x1] }
 0x36a   :  { %1625 = vmatpush.msrb.mxu2 %v1577_v12 }
 0x36b   :  { %v2848_v16 = vld [vmem:[#allocation5] sm:$0x7] }
 0x36c   :  { %1626 = vmatpush.msrb.mxu2 %v1576_v14  ;;  %2850 = vxpose.xlu2.b32.start.end [1/1] (short) (narrow) %v2848_v16, 64  ;;  %3036 = vst.msk [vmem:[#allocation5] sm:$0x1] %vm1347_vm4, %v3035_v15 }
 0x36e   :  { %1627 = vmatpush.msrb.mxu2 %v1575_v17 }
 0x370   :  { %1628 = vmatpush.msrb.mxu2 %v1574_v18 }
 0x372   :  { %1629 = vmatpush.msrb.mxu2 %v1573_v20  ;;  %v2960_v20 = vld [vmem:[#allocation2 + $0xb] sm:$0x1] }
 0x374   :  { %1630 = vmatpush.msrb.mxu2 %v1572_v21 }
 0x376   :  { %1631 = vmatpush.msrb.mxu2 %v1571_v23 }
 0x378   :  { %1632 = vmatpush.msrb.mxu2 %v1570_v24  ;;  %v2980_v24 = vld [vmem:[#allocation2 + $0xb] sm:$0x1] }
 0x37a   :  { %1633 = vmatpush.msrb.mxu2 %v1569_v32 }
 0x37c   :  { %1634 = vmatpush.msrb.mxu2 %v1568_v33 }
 0x37e   :  { %1635 = vmatpush.msrb.mxu2 %v1567_v34  ;;  %v3252_v34 = vld [vmem:[#allocation2 + $0x21] sm:$0x1] }
 0x380   :  { %1636 = vmatpush.msrb.mxu2 %v1566_v36 }
 0x382   :  { %1637 = vmatpush.msrb.mxu2 %v1565_v38 }
 0x384   :  { %1638 = vmatpush.msrb.mxu2 %v1564_v39 }
 0x386   :  { %1639 = vmatpush.msrb.mxu2 %v1563_v35 }
 0x387   :  { %1640 = vmatmul.f32.vlgmr.msrb.gmra.mxu2 %v4351_v40 }
 0x3bf   :  { %2557 = vrot.lane.b32.xlu1 %v2555_v27, %s3958_s25 }
 0x3d1   :  { %v4453_v25 = vpop.trf.xlu1 }
 0x3d9   :  { %v4455_v30 = vpop.trf.xlu1 }
 0x3e1   :  { %v4457_v22 = vpop.trf.xlu1 }
 0x3e9   :  { %v4459_v4 = vpop.trf.xlu1 }
 0x3f1   :  { %v4462_v13 = vpop.trf.xlu1 }
 0x3f9   :  { %v4467_v47 = vpop.trf.xlu1 }
 0x400   :  { %v2118_v15 = vpop.trf.xlu0 }
 0x401   :  { %v4477_v6 = vpop.trf.xlu1 }
 0x402   :  { %2009 = vrot.lane.b32.xlu0 %v2007_v41, %s3958_s25 }
 0x405   :  { %v4470_v53 = vpop.trf.xlu2 }
 0x408   :  { %v2119_v21 = vpop.trf.xlu0 }
 0x409   :  { %v4487_v16 = vpop.trf.xlu1 }
 0x40a   :  { %3039 = vrot.lane.b32.xlu0 %v3037_v19, %s3958_s25  ;;  %v1641_v40 = vpop.f32.mrf.mxu2 }
 0x40b   :  { %3861 = vtanh.f32 %v1641_v40 }
 0x40d   :  { %2017 = vrot.lane.b32.xlu2 %v2015_v42, %s3959_s8  ;;  %v4479_v12 = vpop.trf.xlu2  ;;  %v3049_v42 = vld [vmem:[#allocation2 + $0x15] sm:$0x1] }
 0x410   :  { %v2120_v32 = vpop.trf.xlu0 }
 0x411   :  { %v3862_v43 = vpop.eup %3861 }
 0x412   :  { %1647 = vst [vmem:[#allocation8] sm:$0xf] %v3862_v43   ;;  %2222 = vrot.lane.b32.xlu0 %v2220_v45, %s3958_s25  ;;  %v1645_v46 = vadd.f32 1.0, %v3862_v43 }
 0x413   :  { %1648 = vst [vmem:[#allocation7] sm:$0x3] %v3862_v43 }
 0x414   :  { %2074 = vst [vmem:[#allocation8] sm:$0x30] %v3862_v43  ;;  %v1646_v49 = vmul.f32 0.5, %v1645_v46 }
 0x415   :  { %2023 = vrot.lane.b32.xlu2 %v2021_v48, %s3958_s25  ;;  %v4490_v18 = vpop.trf.xlu2 }
 0x416   :  { %v2287_v51 = vsub.f32 1.0, %v1646_v49  ;;  %v2288_v52 = vmax.f32 %v1646_v49, 1e-05 }
 0x418   :  { %v2289_v54 = vmin.f32 %v2288_v52, 0.99999  ;;  %v2292_v55 = vrot.slane %v2287_v51, 7  ;;  %v2298_v57 = vrot.slane %v2287_v51, 1 }
 0x41a   :  { %3045 = vrot.lane.b32.xlu0 %v3043_v58, %s3960_s20  ;;  %v1674_v60 = vld [vmem:[#allocation7] sm:$0x7]  ;;  %2290 = vst [vmem:[#allocation8 + $0x12] sm:$0x40] %v2289_v54  ;;  %v2294_v63 = vmul.f32 %v2292_v55, %v1646_v49  ;;  %v2300_v1 = vmul.f32 %v2298_v57, %v2287_v51 }
 0x41b   :  { %3635 = vmatpush.msk.msrb.mxu0 %vm1494_vm10, %v1674_v60  ;;  %1862 = vst [vmem:[#allocation7 - $0x2] sm:$0xc] %v3862_v43 }
 0x41c   :  { %3636 = vmatmul.msk.f32.vlgmr.msrb.gmra.mxu0 %vm1273_vm6, %v4338_v28  ;;  %v2295_v5 = vmax.f32 %v2294_v63, 1e-05  ;;  %v2301_v59 = vmax.f32 %v2300_v1, 1e-05  ;;  %v2234_v28 = vld [vmem:[#allocation2 + $0x22] sm:$0x1] }
 0x41d   :  { %2216 = vrot.lane.b32.xlu2 %v2214_v2, %s3960_s20 }
 0x41e   :  { %v2296_v9 = vmin.f32 %v2295_v5, 0.99999  ;;  %v2302_v10 = vmin.f32 %v2301_v59, 0.99999 }
 0x420   :  { %2297 = vst [vmem:[#allocation8 + $0x12] sm:$0x80] %v2296_v9 }
 0x421   :  { %2303 = vst [vmem:[#allocation8 + $0x14] sm:$0x40] %v2302_v10 }
 0x422   :  { %v4481_v14 = vld [vmem:[#allocation7] sm:$0x7]  ;;  %2968 = vrot.lane.b32.xlu0 %v2966_v11, %s3958_s25  ;;  %v3711_v11 = vld [vmem:[%s5186_s1 + $0xf8] sm:$0xff] }
 0x423   :  { %2075 = vst [vmem:[#allocation7 - $0x4] sm:$0x30] %v3862_v43 }
 0x424   :  { %3637 = vmatmul.msk.f32.gmra.mxu0 %vm1273_vm6, %v4342_v31  ;;  %v2561_v31 = vld [vmem:[#allocation2 + $0xd] sm:$0x1] }
 0x425   :  { %2236 = vrot.lane.b32.xlu2 %v2234_v28, %s3958_s25  ;;  %v3710_v28 = vld [vmem:[%s5186_s1 + $0xf0] sm:$0xff] }
 0x42a   :  { %v2101_v17 = vld [vmem:[#allocation7] sm:$0x7] }
 0x42b   :  { %3655 = vmatpush.msk.msra.mxu0 %vm1494_vm10, %v2101_v17 }
 0x42c   :  { %3638 = vmatmul.msk.f32.gmra.mxu0 %vm1273_vm6, %v4347_v37  ;;  %v4504_v37 = vpop.trf.xlu2 }
 0x42d   :  { %2962 = vrot.lane.b32.xlu2 %v2960_v20, %s3960_s20  ;;  %v3706_v20 = vld [vmem:[%s5186_s1 + $0xd0] sm:$0xff] }
 0x431   :  { %v2558_v23 = vpop.permute.xlu1 %2557 }
 0x432   :  { %2560 = vst.msk [vmem:[#allocation3 + $0x1] sm:$0x1] %vm1347_vm4, %v2558_v23 }
 0x433   :  { %2562 = vst.msk [vmem:[#allocation3 + $0x1] sm:$0x1] %vm1355_vm5, %v2561_v31  ;;  %v3703_v31 = vld [vmem:[%s5186_s1 + $0xb8] sm:$0xff] }
 0x434   :  { %2568 = vst.msk [vmem:[#allocation3 + $0x1] sm:$0x1] %vm1363_vm7, %v4412_v26  ;;  %3639 = vmatmul.msk.f32.gmra.mxu0 %vm1273_vm6, %v4358_v44  ;;  %v4509_v26 = vpop.trf.xlu2  ;;  %v2121_v44 = vpop.trf.xlu0 }
 0x435   :  { %2574 = vst.msk [vmem:[#allocation3 + $0x1] sm:$0x1] %vm1371_vm8, %v4416_v29  ;;  %2982 = vrot.lane.b32.xlu2 %v2980_v24, %s3958_s25  ;;  %v3169_v29 = vld [vmem:[#allocation2 + $0x17] sm:$0x1] }
 0x43c   :  { %3640 = vmatmul.msk.f32.gmra.mxu0 %vm1273_vm6, %v4366_v50  ;;  %v2595_v33 = vld [vmem:[#allocation3] sm:$0x7]  ;;  %v4514_v36 = vpop.trf.xlu2  ;;  %v3183_v50 = vld [vmem:[#allocation2 + $0x13] sm:$0x1]  ;;  %v2122_v38 = vpop.trf.xlu0 }
 0x43d   :  { %2596 = vxpose.xlu1.b32.start.end [1/1] (short) %v2595_v33, 128  ;;  %3254 = vrot.lane.b32.xlu2 %v3252_v34, %s3960_s20  ;;  %v3700_v33 = vld [vmem:[%s5186_s1 + $0xa0] sm:$0xff]  ;;  %v3699_v34 = vld [vmem:[%s5186_s1 + $0x98] sm:$0xff] }
 0x444   :  { %3641 = vmatmul.msk.f32.gmra.mxu0 %vm1273_vm6, %v4371_v56  ;;  %v4519_v39 = vpop.trf.xlu2  ;;  %v2123_v35 = vpop.trf.xlu0 }
 0x445   :  { %3171 = vrot.lane.b32.xlu2 %v3169_v29, %s3960_s20  ;;  %v3698_v29 = vld [vmem:[%s5186_s1 + $0x90] sm:$0xff] }
 0x44c   :  { %3642 = vmatmul.msk.f32.gmra.mxu0 %vm1273_vm6, %v4378_v3  ;;  %v4524_v56 = vpop.trf.xlu2  ;;  %v2124_v27 = vpop.trf.xlu0 }
 0x44d   :  { %3185 = vrot.lane.b32.xlu2 %v3183_v50, %s3959_s8  ;;  %v3697_v50 = vld [vmem:[%s5186_s1 + $0x88] sm:$0xff] }
 0x454   :  { %3643 = vmatmul.msk.f32.gmra.mxu0 %vm1273_vm6, %v4385_v8  ;;  %v2125_v3 = vpop.trf.xlu0 }
 0x45c   :  { %3656 = vmatmul.msk.f32.vlgmr.msra.gmra.mxu0 %vm1273_vm6, %v2118_v15  ;;  %v3709_v15 = vld [vmem:[%s5186_s1 + $0xe8] sm:$0xff] }
 0x464   :  { %3657 = vmatmul.msk.f32.gmra.mxu0 %vm1273_vm6, %v2119_v21  ;;  %v3705_v21 = vld [vmem:[%s5186_s1 + $0xc8] sm:$0xff] }
 0x467   :  { %v2018_v41 = vpop.permute.xlu2 %2017 }
 0x468   :  { %2020 = vst.msk [vmem:[#allocation6 + $0x2] sm:$0x1] %vm1347_vm4, %v2018_v41  ;;  %v3246_v41 = vld [vmem:[#allocation2 + $0x1d] sm:$0x1] }
 0x46c   :  { %3658 = vmatmul.msk.f32.gmra.mxu0 %vm1273_vm6, %v2120_v32  ;;  %v3701_v32 = vld [vmem:[%s5186_s1 + $0xa8] sm:$0xff] }
 0x46f   :  { %v2024_v19 = vpop.permute.xlu2 %2023 }
 0x470   :  { %2026 = vst.msk [vmem:[#allocation6 + $0x5] sm:$0x1] %vm1355_vm5, %v2024_v19  ;;  %v3260_v19 = vld [vmem:[#allocation2 + $0x21] sm:$0x1] }
 0x474   :  { %v2010_v40 = vpop.permute.xlu0 %2009  ;;  %3659 = vmatmul.msk.f32.gmra.mxu0 %vm1273_vm6, %v2121_v44 }
 0x475   :  { %2012 = vst.msk [vmem:[#allocation6 + $0x1] sm:$0x1] %vm1347_vm4, %v2010_v40 }
 0x47c   :  { %v3040_v8 = vpop.permute.xlu0 %3039  ;;  %3660 = vmatmul.msk.f32.gmra.mxu0 %vm1273_vm6, %v2122_v38  ;;  %v3051_v38 = vld [vmem:[#allocation2 + $0x15] sm:$0x1] }
 0x47d   :  { %3042 = vst.msk [vmem:[#allocation5 + $0x1] sm:$0x1] %vm1347_vm4, %v3040_v8  ;;  %v3175_v8 = vld [vmem:[#allocation2 + $0x13] sm:$0x1] }
 0x47e   :  { %3050 = vst.msk [vmem:[#allocation5 + $0x1] sm:$0x1] %vm1355_vm5, %v3049_v42  ;;  %v3189_v42 = vld [vmem:[#allocation2 + $0x17] sm:$0x1] }
 0x484   :  { %v4535_v43 = vpop.permute.xlu0 %2222  ;;  %3661 = vmatmul.msk.f32.gmra.mxu0 %vm1273_vm6, %v2123_v35  ;;  %v3696_v35 = vld [vmem:[%s5186_s1 + $0x80] sm:$0xff] }
 0x48c   :  { %v3046_v45 = vpop.permute.xlu0 %3045  ;;  %3662 = vmatmul.msk.f32.gmra.mxu0 %vm1273_vm6, %v2124_v27  ;;  %v2974_v27 = vld [vmem:[#allocation2 + $0x7] sm:$0x1] }
 0x48d   :  { %3048 = vst.msk [vmem:[#allocation5] sm:$0x1] %vm1355_vm5, %v3046_v45  ;;  %v3384_v45 = vld [vmem:[#allocation2 + $0x1f] sm:$0x1] }
 0x494   :  { %3663 = vmatmul.msk.f32.gmra.mxu0 %vm1273_vm6, %v2125_v3 }
 0x499   :  { %v1751_v46 = vpop.f32.mrf.mxu0 }
 0x49a   :  { %v1775_v9 = vmax.f32 %v1751_v46, 0.0  ;;  %v3392_v46 = vld [vmem:[#allocation2 + $0x1f] sm:$0x1] }
 0x4a1   :  { %v1754_v48 = vpop.f32.mrf.mxu0 }
 0x4a2   :  { %v1776_v59 = vmax.f32 %v1754_v48, 0.0 }
 0x4a9   :  { %v1757_v49 = vpop.f32.mrf.mxu0 }
 0x4aa   :  { %v1777_v5 = vmax.f32 %v1757_v49, 0.0  ;;  %v3398_v49 = vld [vmem:[#allocation2 + $0x23] sm:$0x1] }
 0x4b1   :  { %v1760_v51 = vpop.f32.mrf.mxu0 }
 0x4b2   :  { %v1778_v2 = vmax.f32 %v1760_v51, 0.0 }
 0x4b9   :  { %v1763_v52 = vpop.f32.mrf.mxu0 }
 0x4ba   :  { %v1779_v1 = vmax.f32 %v1763_v52, 0.0 }
 0x4c1   :  { %v1766_v54 = vpop.f32.mrf.mxu0 }
 0x4c2   :  { %v1780_v63 = vmax.f32 %v1766_v54, 0.0  ;;  %v2217_v54 = vpop.permute.xlu2 %2216 }
 0x4c9   :  { %v1769_v55 = vpop.f32.mrf.mxu0 }
 0x4ca   :  { %v1781_v60 = vmax.f32 %v1769_v55, 0.0 }
 0x4d1   :  { %v1772_v57 = vpop.f32.mrf.mxu0 }
 0x4d2   :  { %v1782_v58 = vmax.f32 %v1772_v57, 0.0 }
 0x4d4   :  { %1826 = vmatpush.msra.mxu2 %v1782_v58 }
 0x4d6   :  { %1827 = vmatpush.msra.mxu2 %v1781_v60 }
 0x4d8   :  { %1828 = vmatpush.msra.mxu2 %v1780_v63 }
 0x4d9   :  { %v4666_v60 = vpop.f32.mrf.mxu0 }
 0x4da   :  { %1829 = vmatpush.msra.mxu2 %v1779_v1 }
 0x4dc   :  { %1830 = vmatpush.msra.mxu2 %v1778_v2 }
 0x4de   :  { %1831 = vmatpush.msra.mxu2 %v1777_v5 }
 0x4e0   :  { %1832 = vmatpush.msra.mxu2 %v1776_v59 }
 0x4e1   :  { %v4541_v10 = vpop.trf.xlu1 }
 0x4e2   :  { %1833 = vmatpush.msra.mxu2 %v1775_v9  ;;  %v2237_v9 = vpop.permute.xlu2 %2236 }
 0x4e3   :  { %3644 = vmatmul.msk.f32.vlgmr.msra.gmra.mxu2 %vm1814_vm11, %v4395_v7  ;;  %v3708_v7 = vld [vmem:[%s5186_s1 + $0xe0] sm:$0xff] }
 0x4e4   :  { %3645 = vmatpush.msk.msrb.mxu2 %vm1494_vm10, %v4481_v14  ;;  %v3707_v14 = vld [vmem:[%s5186_s1 + $0xd8] sm:$0xff] }
 0x4e6   :  { %3712 = vmatpush.xpose.msk.msra.mxu2 %vm1273_vm6, %v3711_v11 }
 0x4e9   :  { %v4560_v17 = vpop.trf.xlu1 }
 0x4ea   :  { %3713 = vmatpush.xpose.msk.msra.mxu2 %vm1273_vm6, %v3710_v28 }
 0x4eb   :  { %3646 = vmatmul.msk.f32.vlgmr.msrb.gmra.mxu2 %vm1273_vm6, %v4453_v25 }
 0x4ee   :  { %3714 = vmatpush.xpose.msk.msra.mxu2 %vm1273_vm6, %v3709_v15 }
 0x4f1   :  { %v4573_v25 = vpop.trf.xlu1 }
 0x4f2   :  { %3715 = vmatpush.xpose.msk.msra.mxu2 %vm1273_vm6, %v3708_v7 }
 0x4f3   :  { %3647 = vmatmul.msk.f32.gmra.mxu2 %vm1273_vm6, %v4455_v30  ;;  %v3704_v30 = vld [vmem:[%s5186_s1 + $0xc0] sm:$0xff] }
 0x4f6   :  { %3716 = vmatpush.xpose.msk.msra.mxu2 %vm1273_vm6, %v3707_v14  ;;  %v4674_v14 = vpop.f32.mrf.mxu0 }
 0x4f9   :  { %v4588_v23 = vpop.trf.xlu1 }
 0x4fa   :  { %3717 = vmatpush.xpose.msk.msra.mxu2 %vm1273_vm6, %v3706_v20 }
 0x4fb   :  { %3648 = vmatmul.msk.f32.gmra.mxu2 %vm1273_vm6, %v4457_v22  ;;  %v3702_v22 = vld [vmem:[%s5186_s1 + $0xb0] sm:$0xff] }
 0x4fe   :  { %3718 = vmatpush.xpose.msk.msra.mxu2 %vm1273_vm6, %v3705_v21 }
 0x501   :  { %v4601_v24 = vpop.trf.xlu1 }
 0x502   :  { %3719 = vmatpush.xpose.msk.msra.mxu2 %vm1273_vm6, %v3704_v30 }
 0x503   :  { %3649 = vmatmul.msk.f32.gmra.mxu2 %vm1273_vm6, %v4459_v4  ;;  %v2001_v4 = vld [vmem:[#allocation2 + $0x16] sm:$0x1] }
 0x506   :  { %3720 = vmatpush.xpose.msk.msra.mxu2 %vm1273_vm6, %v3703_v31  ;;  %v2963_v31 = vpop.permute.xlu2 %2962 }
 0x509   :  { %v4619_v44 = vpop.trf.xlu1 }
 0x50a   :  { %3721 = vmatpush.xpose.msk.msra.mxu2 %vm1273_vm6, %v3702_v22 }
 0x50b   :  { %3650 = vmatmul.msk.f32.gmra.mxu2 %vm1273_vm6, %v4462_v13  ;;  %v2228_v13 = vld [vmem:[#allocation2 + $0x1e] sm:$0x1] }
 0x50e   :  { %3722 = vmatpush.xpose.msk.msra.mxu2 %vm1273_vm6, %v3701_v32 }
 0x50f   :  { %2003 = vrot.lane.b32.xlu1 %v2001_v4, %s3960_s20 }
 0x512   :  { %3723 = vmatpush.xpose.msk.msra.mxu2 %vm1273_vm6, %v3700_v33 }
 0x513   :  { %3651 = vmatmul.msk.f32.gmra.mxu2 %vm1273_vm6, %v4467_v47  ;;  %v4633_v47 = vpop.trf.xlu1 }
 0x516   :  { %3724 = vmatpush.xpose.msk.msra.mxu2 %vm1273_vm6, %v3699_v34 }
 0x517   :  { %2230 = vrot.lane.b32.xlu1 %v2228_v13, %s3959_s8 }
 0x51a   :  { %3725 = vmatpush.xpose.msk.msra.mxu2 %vm1273_vm6, %v3698_v29 }
 0x51b   :  { %3652 = vmatmul.msk.f32.gmra.mxu2 %vm1273_vm6, %v4477_v6  ;;  %v4643_v6 = vpop.trf.xlu1 }
 0x51e   :  { %3726 = vmatpush.xpose.msk.msra.mxu2 %vm1273_vm6, %v3697_v50  ;;  %v4680_v50 = vpop.f32.mrf.mxu0 }
 0x51f   :  { %3053 = vrot.lane.b32.xlu1 %v3051_v38, %s3958_s25 }
 0x522   :  { %3727 = vmatpush.xpose.msk.msra.mxu2 %vm1273_vm6, %v3696_v35 }
 0x523   :  { %3653 = vmatmul.msk.f32.gmra.mxu2 %vm1273_vm6, %v4487_v16  ;;  %v4648_v3 = vpop.trf.xlu1 }
 0x527   :  { %2976 = vrot.lane.b32.xlu1 %v2974_v27, %s3959_s8  ;;  %v2983_v27 = vpop.permute.xlu2 %2982 }
 0x52b   :  { %3728 = vmatmul.msk.f32.vlgmr.msra.gmra.mxu2 %vm1273_vm6, %v4308_v0  ;;  %v4651_v40 = vpop.trf.xlu1 }
 0x52f   :  { %3248 = vrot.lane.b32.xlu1 %v3246_v41, %s3958_s25 }
 0x533   :  { %v4654_v16 = vpop.trf.xlu1 }
 0x537   :  { %3262 = vrot.lane.b32.xlu1 %v3260_v19, %s3958_s25 }
 0x53b   :  { %v4658_v0 = vpop.trf.xlu1 }
 0x53f   :  { %3177 = vrot.lane.b32.xlu1 %v3175_v8, %s3958_s25 }
 0x543   :  { %v4661_v48 = vpop.trf.xlu1 }
 0x547   :  { %3191 = vrot.lane.b32.xlu1 %v3189_v42, %s3958_s25  ;;  %v2211_v42 = vld [vmem:[#allocation2 + $0x1e] sm:$0x1] }
 0x54b   :  { %v4664_v51 = vpop.trf.xlu1 }
 0x54f   :  { %3386 = vrot.lane.b32.xlu1 %v3384_v45, %s3958_s25  ;;  %v4688_v45 = vpop.f32.mrf.mxu0 }
 0x553   :  { %v4668_v1 = vpop.trf.xlu1 }
 0x557   :  { %3394 = vrot.lane.b32.xlu1 %v3392_v46, %s3959_s8  ;;  %v2226_v46 = vld [vmem:[#allocation2 + $0x22] sm:$0x1] }
 0x55b   :  { %v4676_v20 = vpop.trf.xlu1 }
 0x55f   :  { %3400 = vrot.lane.b32.xlu1 %v3398_v49, %s3958_s25 }
 0x566   :  { %v1835_v52 = vpop.f32.mrf.mxu2 }
 0x567   :  { %3863 = vtanh.f32 %v1835_v52  ;;  %v1845_v55 = vand.u32 2147483647, %v1835_v52  ;;  %v1842_v33 = vmax.f32 %v1835_v52, 0.0  ;;  %vm1843_vm13 = vcmp.ne.f32.partialorder %v1835_v52, %v1835_v52 }
 0x569   :  { %v1846_v57 = vsub.f32 0.0, %v1845_v55 }
 0x56b   :  { %v1847_v58 = vmul.f32 1.442695, %v1846_v57  ;;  %v2958_v57 = vld [vmem:[#allocation2 + $0x7] sm:$0x1] }
 0x56d   :  { %v3864_v63 = vpop.eup %3863  ;;  %3865 = vpow2.f32 %v1847_v58 }
 0x56e   :  { %v1839_v2 = vadd.f32 1.0, %v3864_v63  ;;  %v4670_v5 = vpop.f32.mrf.mxu2 }
 0x570   :  { %v1840_v59 = vmul.f32 0.5, %v1839_v2  ;;  %v2972_v2 = vld [vmem:[#allocation2 + $0xb] sm:$0x1] }
 0x572   :  { %1841 = vst [vmem:[#allocation8 + $0x6] sm:$0x7] %v1840_v59 }
 0x573   :  { %v3866_v11 = vpop.eup %3865 }
 0x574   :  { %v1849_v28 = vadd.f32 1.0, %v3866_v11  ;;  %v1852_v15 = vmul.f32 -0.5, %v3866_v11  ;;  %v1855_v30 = vand.u32 2147483647, %v3866_v11 }
 0x576   :  { %3867 = vlog2.f32 %v1849_v28  ;;  %v4672_v7 = vpop.f32.mrf.mxu2  ;;  %v1853_v21 = vadd.f32 1.0, %v1852_v15  ;;  %vm1856_vm12 = vcmp.lt.f32.partialorder %v1855_v30, 0.0004427343  ;;  %v3244_v28 = vld [vmem:[#allocation2 + $0x1d] sm:$0x1] }
 0x578   :  { %v1854_v4 = vmul.f32 %v3866_v11, %v1853_v21 }
 0x57c   :  { %v3868_v22 = vpop.eup %3867 }
 0x57d   :  { %v1851_v32 = vmul.f32 0.6931472, %v3868_v22 }
 0x57e   :  { %v4678_v34 = vpop.f32.mrf.mxu2 }
 0x57f   :  { %v1857_v13 = vsel %vm1856_vm12, %v1854_v4, %v1851_v32  ;;  %v3167_v4 = vld [vmem:[#allocation2 + $0x13] sm:$0x1] }
 0x580   :  { %v1858_v29 = vadd.f32 %v1857_v13, %v1842_v33  ;;  %v3181_v33 = vld [vmem:[#allocation2 + $0x17] sm:$0x1] }
 0x581   :  { %v2004_v38 = vpop.permute.xlu1 %2003 }
 0x582   :  { %v1859_v35 = vsel %vm1843_vm13, %v1835_v52, %v1858_v29  ;;  %2006 = vst.msk [vmem:[#allocation6 + $0x3] sm:$0x1] %vm1355_vm5, %v2004_v38  ;;  %v3255_v52 = vpop.permute.xlu2 %3254 }
 0x583   :  { %1860 = vst [vmem:[#allocation8 + $0xc] sm:$0x38] %v1859_v35 }
 0x586   :  { %v4683_v41 = vpop.f32.mrf.mxu2 }
 0x589   :  { %v4685_v19 = vld [vmem:[#allocation6] sm:$0x3f]  ;;  %v2231_v8 = vpop.permute.xlu1 %2230 }
 0x58a   :  { %2219 = vst.msk [vmem:[#allocation6 + $0x3] sm:$0x1] %vm1355_vm5, %v2217_v54  ;;  %v4697_v54 = vpop.f32.mrf.mxu0  ;;  %v3172_v59 = vpop.permute.xlu2 %3171 }
 0x58b   :  { %2212 = vst.msk [vmem:[#allocation6] sm:$0x1] %vm1347_vm4, %v2211_v42 }
 0x58c   :  { %2225 = vst.msk [vmem:[#allocation6 + $0x1] sm:$0x1] %vm1347_vm4, %v4535_v43  ;;  %v2969_v43 = vpop.permute.xlu0 %2968 }
 0x58d   :  { %2227 = vst.msk [vmem:[#allocation6 + $0x4] sm:$0x1] %vm1355_vm5, %v2226_v46 }
 0x58e   :  { %2239 = vst.msk [vmem:[#allocation6 + $0x5] sm:$0x1] %vm1355_vm5, %v2237_v9  ;;  %v1977_v49 = vpop.f32.mrf.mxu2 }
 0x58f   :  { %2233 = vst.msk [vmem:[#allocation6 + $0x2] sm:$0x1] %vm1347_vm4, %v2231_v8  ;;  %v1993_v42 = vmax.f32 %v1977_v49, 0.0 }
 0x591   :  { %v3054_v55 = vpop.permute.xlu1 %3053 }
 0x592   :  { %3056 = vst.msk [vmem:[#allocation5 + $0x2] sm:$0x1] %vm1355_vm5, %v3054_v55  ;;  %v2193_v21 = vpop.f32.mrf.mxu0  ;;  %v3186_v22 = vpop.permute.xlu2 %3185  ;;  %v1991_v55 = vmax.f32 %v4678_v34, 0.0 }
 0x596   :  { %v4699_v58 = vld [vmem:[#allocation6] sm:$0x3f]  ;;  %v1980_v63 = vpop.f32.mrf.mxu2 }
 0x597   :  { %2959 = vst.msk [vmem:[#allocation6] sm:$0x1] %vm1347_vm4, %v2958_v57  ;;  %v1994_v8 = vmax.f32 %v1980_v63, 0.0  ;;  %v1990_v63 = vmax.f32 %v4672_v7, 0.0  ;;  %v2206_v7 = vmax.f32 %v4697_v54, 0.0 }
 0x598   :  { %2965 = vst.msk [vmem:[#allocation6 + $0x3] sm:$0x1] %vm1355_vm5, %v2963_v31  ;;  %v3258_v31 = vld [vmem:[#allocation2 + $0x21] sm:$0x1]  ;;  %v3390_v54 = vld [vmem:[#allocation2 + $0x23] sm:$0x1] }
 0x599   :  { %2971 = vst.msk [vmem:[#allocation6 + $0x1] sm:$0x1] %vm1347_vm4, %v2969_v43  ;;  %v2977_v9 = vpop.permute.xlu1 %2976  ;;  %v3057_v11 = vld [vmem:[#allocation5] sm:$0x7] }
 0x59a   :  { %2973 = vst.msk [vmem:[#allocation6 + $0x4] sm:$0x1] %vm1355_vm5, %v2972_v2  ;;  %3059 = vxpose.xlu0.b32.start.end [1/1] (short) (narrow) %v3057_v11, 64  ;;  %v2196_v38 = vpop.f32.mrf.mxu0 }
 0x59b   :  { %2985 = vst.msk [vmem:[#allocation6 + $0x5] sm:$0x1] %vm1355_vm5, %v2983_v27 }
 0x59c   :  { %2979 = vst.msk [vmem:[#allocation6 + $0x2] sm:$0x1] %vm1347_vm4, %v2977_v9  ;;  %v2204_v9 = vmax.f32 %v4680_v50, 0.0 }
 0x59d   :  { %3245 = vst.msk [vmem:[#allocation5] sm:$0x1] %vm1347_vm4, %v3244_v28 }
 0x59e   :  { %3257 = vst.msk [vmem:[#allocation5] sm:$0x1] %vm1355_vm5, %v3255_v52  ;;  %v1983_v15 = vpop.f32.mrf.mxu2  ;;  %v1992_v52 = vmax.f32 %v4683_v41, 0.0  ;;  %v1989_v41 = vmax.f32 %v4670_v5, 0.0  ;;  %v2205_v5 = vmax.f32 %v4688_v45, 0.0 }
 0x59f   :  { %v1995_v35 = vmax.f32 %v1983_v15, 0.0  ;;  %v2202_v15 = vmax.f32 %v4666_v60, 0.0 }
 0x5a1   :  { %v3249_v30 = vpop.permute.xlu1 %3248 }
 0x5a2   :  { %3251 = vst.msk [vmem:[#allocation5 + $0x1] sm:$0x1] %vm1347_vm4, %v3249_v30  ;;  %v2199_v49 = vpop.f32.mrf.mxu0 }
 0x5a3   :  { %v4710_v32 = vld [vmem:[#allocation6] sm:$0x3f]  ;;  %3259 = vst.msk [vmem:[#allocation5 + $0x1] sm:$0x1] %vm1355_vm5, %v3258_v31  ;;  %v2209_v2 = vmax.f32 %v2199_v49, 0.0 }
 0x5a4   :  { %3188 = vst.msk [vmem:[#allocation6 + $0x2] sm:$0x1] %vm1347_vm4, %v3186_v22 }
 0x5a5   :  { %3168 = vst.msk [vmem:[#allocation6] sm:$0x1] %vm1347_vm4, %v3167_v4 }
 0x5a6   :  { %3174 = vst.msk [vmem:[#allocation6 + $0x3] sm:$0x1] %vm1355_vm5, %v3172_v59  ;;  %v1986_v13 = vpop.f32.mrf.mxu2  ;;  %v2208_v59 = vmax.f32 %v2196_v38, 0.0 }
 0x5a7   :  { %3182 = vst.msk [vmem:[#allocation6 + $0x4] sm:$0x1] %vm1355_vm5, %v3181_v33  ;;  %v1996_v29 = vmax.f32 %v1986_v13, 0.0 }
 0x5a9   :  { %2039 = vmatpush.msrb.mxu3 %v1996_v29  ;;  %v3263_v27 = vpop.permute.xlu1 %3262 }
 0x5aa   :  { %3265 = vst.msk [vmem:[#allocation5 + $0x2] sm:$0x1] %vm1355_vm5, %v3263_v27 }
 0x5ab   :  { %2040 = vmatpush.msrb.mxu3 %v1995_v35 }
 0x5ad   :  { %2041 = vmatpush.msrb.mxu3 %v1994_v8 }
 0x5ae   :  { %v2531_v46 = vpop.f32.mrf.mxu2 }
 0x5af   :  { %2534 = vst [vmem:[#allocation7 + $0x1] sm:$0x2] %v2531_v46  ;;  %2042 = vmatpush.msrb.mxu3 %v1993_v42  ;;  %3729 = vmatpush.msk.msrb.mxu2 %vm1494_vm10, %v2531_v46 }
 0x5b0   :  { %3730 = vmatmul.msk.f32.vlgmr.msrb.gmra.mxu2 %vm1273_vm6, %v4541_v10  ;;  %v2207_v10 = vmax.f32 %v2193_v21, 0.0 }
 0x5b1   :  { %2043 = vmatpush.msrb.mxu3 %v1992_v52  ;;  %v3178_v57 = vpop.permute.xlu1 %3177  ;;  %v3266_v43 = vld [vmem:[#allocation5] sm:$0x7] }
 0x5b2   :  { %3180 = vst.msk [vmem:[#allocation6 + $0x1] sm:$0x1] %vm1347_vm4, %v3178_v57  ;;  %3268 = vxpose.xlu2.b32.start.end [1/1] (short) (narrow) %v3266_v43, 64 }
 0x5b3   :  { %2044 = vmatpush.msrb.mxu3 %v1991_v55 }
 0x5b5   :  { %2045 = vmatpush.msrb.mxu3 %v1990_v63 }
 0x5b7   :  { %2046 = vmatpush.msrb.mxu3 %v1989_v41 }
 0x5b8   :  { %3654 = vmatmul.msk.f32.vlgmr.msrb.gmra.mxu3 %vm1814_vm11, %v4685_v19  ;;  %3731 = vmatmul.msk.f32.gmra.mxu2 %vm1273_vm6, %v4560_v17  ;;  %v3376_v19 = vld [vmem:[#allocation2 + $0x1f] sm:$0x1]  ;;  %v2203_v17 = vmax.f32 %v4674_v14, 0.0 }
 0x5b9   :  { %2252 = vmatpush.msra.mxu3 %v2209_v2  ;;  %v3192_v34 = vpop.permute.xlu1 %3191 }
 0x5ba   :  { %3194 = vst.msk [vmem:[#allocation6 + $0x5] sm:$0x1] %vm1355_vm5, %v3192_v34 }
 0x5bb   :  { %2253 = vmatpush.msra.mxu3 %v2208_v59 }
 0x5bd   :  { %2254 = vmatpush.msra.mxu3 %v2207_v10 }
 0x5bf   :  { %2255 = vmatpush.msra.mxu3 %v2206_v7 }
 0x5c0   :  { %3732 = vmatmul.msk.f32.gmra.mxu2 %vm1273_vm6, %v4573_v25  ;;  %v2367_v25 = vld [vmem:[#allocation8 + $0x18] sm:$0xff] }
 0x5c1   :  { %2256 = vmatpush.msra.mxu3 %v2205_v5  ;;  %v3387_v11 = vpop.permute.xlu1 %3386  ;;  %v4737_v28 = vld [vmem:[#allocation6] sm:$0x3f] }
 0x5c2   :  { %3377 = vst.msk [vmem:[#allocation6] sm:$0x1] %vm1347_vm4, %v3376_v19 }
 0x5c3   :  { %2257 = vmatpush.msra.mxu3 %v2204_v9  ;;  %3389 = vst.msk [vmem:[#allocation6 + $0x1] sm:$0x1] %vm1347_vm4, %v3387_v11 }
 0x5c4   :  { %3391 = vst.msk [vmem:[#allocation6 + $0x4] sm:$0x1] %vm1355_vm5, %v3390_v54 }
 0x5c5   :  { %2258 = vmatpush.msra.mxu3 %v2203_v17 }
 0x5c7   :  { %2259 = vmatpush.msra.mxu3 %v2202_v15 }
 0x5c8   :  { %3664 = vmatmul.msk.f32.vlgmr.msra.gmra.mxu3 %vm1814_vm11, %v4699_v58  ;;  %3733 = vmatmul.msk.f32.gmra.mxu2 %vm1273_vm6, %v4588_v23 }
 0x5c9   :  { %2380 = vmatpush.xpose.msrb.mxu3 %v2367_v25  ;;  %v3395_v14 = vpop.permute.xlu1 %3394 }
 0x5ca   :  { %3397 = vst.msk [vmem:[#allocation6 + $0x2] sm:$0x1] %vm1347_vm4, %v3395_v14 }
 0x5d0   :  { %3734 = vmatmul.msk.f32.gmra.mxu2 %vm1273_vm6, %v4601_v24 }
 0x5d1   :  { %v3401_v60 = vpop.permute.xlu1 %3400 }
 0x5d2   :  { %3403 = vst.msk [vmem:[#allocation6 + $0x5] sm:$0x1] %vm1355_vm5, %v3401_v60 }
 0x5d8   :  { %3735 = vmatmul.msk.f32.gmra.mxu2 %vm1273_vm6, %v4619_v44 }
 0x5e0   :  { %3736 = vmatmul.msk.f32.gmra.mxu2 %vm1273_vm6, %v4633_v47 }
 0x5e8   :  { %3737 = vmatmul.msk.f32.gmra.mxu2 %vm1273_vm6, %v4643_v6 }
 0x5f0   :  { %3738 = vmatmul.msk.f32.gmra.mxu2 %vm1273_vm6, %v4648_v3  ;;  %v3378_v3 = vld [vmem:[#allocation2 + $0x23] sm:$0x1] }
 0x5f8   :  { %3739 = vmatmul.msk.f32.gmra.mxu2 %vm1273_vm6, %v4651_v40 }
 0x600   :  { %3740 = vmatmul.msk.f32.gmra.mxu2 %vm1273_vm6, %v4654_v16 }
 0x608   :  { %3741 = vmatmul.msk.f32.gmra.mxu2 %vm1273_vm6, %v4658_v0 }
 0x610   :  { %3742 = vmatmul.msk.f32.gmra.mxu2 %vm1273_vm6, %v4661_v48 }
 0x618   :  { %3743 = vmatmul.msk.f32.gmra.mxu2 %vm1273_vm6, %v4664_v51 }
 0x620   :  { %3744 = vmatmul.msk.f32.gmra.mxu2 %vm1273_vm6, %v4668_v1 }
 0x628   :  { %3745 = vmatmul.msk.f32.gmra.mxu2 %vm1273_vm6, %v4676_v20 }
 0x633   :  { %v4773_v23 = vpop.f32.mrf.mxu2 }
 0x63b   :  { %v2048_v24 = vpop.f32.mrf.mxu3  ;;  %v4775_v44 = vpop.f32.mrf.mxu2 }
 0x63c   :  { %3869 = vtanh.f32 %v2048_v24  ;;  %v2058_v47 = vand.u32 2147483647, %v2048_v24  ;;  %v2055_v35 = vmax.f32 %v2048_v24, 0.0  ;;  %vm2056_vm15 = vcmp.ne.f32.partialorder %v2048_v24, %v2048_v24 }
 0x63e   :  { %v2059_v6 = vsub.f32 0.0, %v2058_v47  ;;  %v4784_v7 = vpop.trf.xlu0  ;;  %v2364_v47 = vld [vmem:[#allocation8] sm:$0xff] }
 0x640   :  { %v2060_v40 = vmul.f32 1.442695, %v2059_v6  ;;  %3380 = vrot.lane.b32.xlu0 %v3378_v3, %s3960_s20 }
 0x642   :  { %v3870_v16 = vpop.eup %3869  ;;  %3871 = vpow2.f32 %v2060_v40 }
 0x643   :  { %v2052_v0 = vadd.f32 1.0, %v3870_v16  ;;  %v4778_v48 = vpop.f32.mrf.mxu2 }
 0x645   :  { %v2053_v51 = vmul.f32 0.5, %v2052_v0 }
 0x646   :  { %v4786_v15 = vpop.trf.xlu0 }
 0x647   :  { %2054 = vst [vmem:[#allocation8 + $0x9] sm:$0x7] %v2053_v51 }
 0x648   :  { %v3872_v1 = vpop.eup %3871 }
 0x649   :  { %v2062_v20 = vadd.f32 1.0, %v3872_v1  ;;  %v2065_v50 = vmul.f32 -0.5, %v3872_v1  ;;  %v2068_v22 = vand.u32 2147483647, %v3872_v1 }
 0x64b   :  { %3873 = vlog2.f32 %v2062_v20  ;;  %v2261_v45 = vpop.f32.mrf.mxu3  ;;  %v4780_v58 = vpop.f32.mrf.mxu2  ;;  %v2066_v30 = vadd.f32 1.0, %v2065_v50  ;;  %vm2069_vm14 = vcmp.lt.f32.partialorder %v2068_v22, 0.0004427343 }
 0x64c   :  { %3875 = vtanh.f32 %v2261_v45  ;;  %v2271_v21 = vand.u32 2147483647, %v2261_v45  ;;  %v2268_v5 = vmax.f32 %v2261_v45, 0.0  ;;  %vm2269_vm2 = vcmp.ne.f32.partialorder %v2261_v45, %v2261_v45 }
 0x64d   :  { %v2067_v38 = vmul.f32 %v3872_v1, %v2066_v30 }
 0x64e   :  { %v2272_v31 = vsub.f32 0.0, %v2271_v21 }
 0x650   :  { %v2273_v4 = vmul.f32 1.442695, %v2272_v31 }
 0x651   :  { %v3874_v33 = vpop.eup %3873 }
 0x652   :  { %v3876_v13 = vpop.eup %3875  ;;  %v2064_v29 = vmul.f32 0.6931472, %v3874_v33  ;;  %3877 = vpow2.f32 %v2273_v4 }
 0x653   :  { %v2265_v27 = vadd.f32 1.0, %v3876_v13  ;;  %v4782_v8 = vpop.f32.mrf.mxu2 }
 0x654   :  { %v2070_v42 = vsel %vm2069_vm14, %v2067_v38, %v2064_v29 }
 0x655   :  { %v2071_v46 = vadd.f32 %v2070_v42, %v2055_v35  ;;  %v2266_v52 = vmul.f32 0.5, %v2265_v27 }
 0x657   :  { %v2072_v55 = vsel %vm2056_vm15, %v2048_v24, %v2071_v46  ;;  %2267 = vst [vmem:[#allocation8 + $0xc] sm:$0x7] %v2266_v52  ;;  %v4788_v24 = vpop.trf.xlu0 }
 0x658   :  { %v3878_v57 = vpop.eup %3877  ;;  %2073 = vst [vmem:[#allocation8 + $0xf] sm:$0x38] %v2072_v55  ;;  %v2748_v55 = vmax.f32 %v4782_v8, 0.0 }
 0x659   :  { %v2275_v43 = vadd.f32 1.0, %v3878_v57  ;;  %v2278_v49 = vmul.f32 -0.5, %v3878_v57  ;;  %v2281_v2 = vand.u32 2147483647, %v3878_v57 }
 0x65b   :  { %3879 = vlog2.f32 %v2275_v43  ;;  %v2711_v63 = vpop.f32.mrf.mxu2  ;;  %v2279_v41 = vadd.f32 1.0, %v2278_v49  ;;  %vm2282_vm0 = vcmp.lt.f32.partialorder %v2281_v2, 0.0004427343  ;;  %v2746_v43 = vmax.f32 %v4778_v48, 0.0  ;;  %v2800_v2 = vld [vmem:[#allocation4] sm:$0xff] }
 0x65c   :  { %v2749_v52 = vmax.f32 %v2711_v63, 0.0  ;;  %v2745_v49 = vmax.f32 %v4775_v44, 0.0 }
 0x65d   :  { %v2280_v34 = vmul.f32 %v3878_v57, %v2279_v41  ;;  %v2747_v57 = vmax.f32 %v4780_v58, 0.0  ;;  %v2744_v41 = vmax.f32 %v4773_v23, 0.0 }
 0x65e   :  { %v2365_v14 = vld [vmem:[#allocation8 + $0x8] sm:$0xff] }
 0x65f   :  { %v4790_v3 = vpop.trf.xlu0 }
 0x661   :  { %v3880_v59 = vpop.eup %3879 }
 0x662   :  { %v2277_v10 = vmul.f32 0.6931472, %v3880_v59 }
 0x663   :  { %v2714_v9 = vpop.f32.mrf.mxu2 }
 0x664   :  { %v2283_v19 = vsel %vm2282_vm0, %v2280_v34, %v2277_v10  ;;  %v2750_v46 = vmax.f32 %v2714_v9, 0.0 }
 0x665   :  { %v2284_v17 = vadd.f32 %v2283_v19, %v2268_v5 }
 0x667   :  { %v2285_v11 = vsel %vm2269_vm2, %v2261_v45, %v2284_v17  ;;  %v4792_v16 = vpop.trf.xlu0 }
 0x668   :  { %2286 = vst [vmem:[#allocation8 + $0x12] sm:$0x38] %v2285_v11 }
 0x66b   :  { %v2717_v54 = vpop.f32.mrf.mxu2 }
 0x66c   :  { %v2751_v42 = vmax.f32 %v2717_v54, 0.0 }
 0x66f   :  { %v2366_v25 = vld [vmem:[#allocation8 + $0x10] sm:$0xff]  ;;  %v4794_v1 = vpop.trf.xlu0 }
 0x670   :  { %2381 = vmatpush.xpose.msrb.mxu3 %v2366_v25 }
 0x673   :  { %v2720_v60 = vpop.f32.mrf.mxu2 }
 0x674   :  { %2382 = vmatpush.xpose.msrb.mxu3 %v2365_v14  ;;  %v2752_v27 = vmax.f32 %v2720_v60, 0.0 }
 0x677   :  { %v4796_v50 = vpop.trf.xlu0 }
 0x678   :  { %2383 = vmatpush.xpose.msrb.mxu3 %v2364_v47 }
 0x67b   :  { %v2723_v6 = vpop.f32.mrf.mxu2 }
 0x67c   :  { %v2753_v35 = vmax.f32 %v2723_v6, 0.0 }
 0x67f   :  { %v4798_v21 = vpop.trf.xlu0 }
 0x683   :  { %v2726_v40 = vpop.f32.mrf.mxu2 }
 0x684   :  { %v2754_v38 = vmax.f32 %v2726_v40, 0.0 }
 0x68b   :  { %v2729_v0 = vpop.f32.mrf.mxu2 }
 0x68c   :  { %v2755_v29 = vmax.f32 %v2729_v0, 0.0 }
 0x693   :  { %v2732_v51 = vpop.f32.mrf.mxu2 }
 0x694   :  { %v2756_v33 = vmax.f32 %v2732_v51, 0.0 }
 0x69b   :  { %v2735_v20 = vpop.f32.mrf.mxu2 }
 0x69c   :  { %v2757_v4 = vmax.f32 %v2735_v20, 0.0 }
 0x6a3   :  { %v2738_v45 = vpop.f32.mrf.mxu2 }
 0x6a4   :  { %v2758_v22 = vmax.f32 %v2738_v45, 0.0 }
 0x6ab   :  { %v2741_v30 = vpop.f32.mrf.mxu2 }
 0x6ac   :  { %v2759_v31 = vmax.f32 %v2741_v30, 0.0 }
 0x6ae   :  { %2801 = vmatpush.msrb.mxu1 %v2759_v31 }
 0x6b0   :  { %2802 = vmatpush.msrb.mxu1 %v2758_v22 }
 0x6b2   :  { %2803 = vmatpush.msrb.mxu1 %v2757_v4  ;;  %v3381_v13 = vpop.permute.xlu0 %3380 }
 0x6b3   :  { %3383 = vst.msk [vmem:[#allocation6 + $0x3] sm:$0x1] %vm1355_vm5, %v3381_v13 }
 0x6b4   :  { %2804 = vmatpush.msrb.mxu1 %v2756_v33 }
 0x6b6   :  { %2805 = vmatpush.msrb.mxu1 %v2755_v29 }
 0x6b8   :  { %2806 = vmatpush.msrb.mxu1 %v2754_v38 }
 0x6ba   :  { %2807 = vmatpush.msrb.mxu1 %v2753_v35 }
 0x6bc   :  { %2808 = vmatpush.msrb.mxu1 %v2752_v27 }
 0x6be   :  { %2809 = vmatpush.msrb.mxu1 %v2751_v42 }
 0x6c0   :  { %2810 = vmatpush.msrb.mxu1 %v2750_v46 }
 0x6c2   :  { %2811 = vmatpush.msrb.mxu1 %v2749_v52 }
 0x6c4   :  { %2812 = vmatpush.msrb.mxu1 %v2748_v55 }
 0x6c6   :  { %2813 = vmatpush.msrb.mxu1 %v2747_v57 }
 0x6c8   :  { %2814 = vmatpush.msrb.mxu1 %v2746_v43 }
 0x6ca   :  { %2815 = vmatpush.msrb.mxu1 %v2745_v49 }
 0x6cc   :  { %2816 = vmatpush.msrb.mxu1 %v2744_v41 }
 0x6cd   :  { %2817 = vmatmul.f32.vlgmr.msrb.gmra.mxu1 %v2800_v2 }
 0x74a   :  { %v2818_v63 = vpop.f32.mrf.mxu1 }
 0x74b   :  { %3881 = vtanh.f32 %v2818_v63 }
 0x751   :  { %v3882_v59 = vpop.eup %3881 }
 0x752   :  { %2824 = vst [vmem:[#allocation8] sm:$0xf] %v3882_v59   ;;  %v2822_v8 = vadd.f32 1.0, %v3882_v59 }
 0x753   :  { %2825 = vst [vmem:[#allocation7] sm:$0x3] %v3882_v59 }
 0x754   :  { %3242 = vst [vmem:[#allocation8] sm:$0x30] %v3882_v59  ;;  %v2823_v58 = vmul.f32 0.5, %v2822_v8 }
 0x756   :  { %v3451_v10 = vsub.f32 1.0, %v2823_v58  ;;  %v3452_v48 = vmax.f32 %v2823_v58, 1e-05 }
 0x758   :  { %v3453_v34 = vmin.f32 %v3452_v48, 0.99999  ;;  %v3456_v5 = vrot.slane %v3451_v10, 7  ;;  %v3462_v44 = vrot.slane %v3451_v10, 1  ;;  %v3284_v48 = vpop.trf.xlu2 }
 0x75a   :  { %v2849_v9 = vld [vmem:[#allocation7] sm:$0x7]  ;;  %3454 = vst [vmem:[#allocation8 + $0x12] sm:$0x40] %v3453_v34  ;;  %v3458_v23 = vmul.f32 %v3456_v5, %v2823_v58  ;;  %v3464_v19 = vmul.f32 %v3462_v44, %v3451_v10 }
 0x75b   :  { %3746 = vmatpush.msk.msra.mxu1 %vm1494_vm10, %v2849_v9  ;;  %3034 = vst [vmem:[#allocation7 - $0x2] sm:$0xc] %v3882_v59 }
 0x75c   :  { %3747 = vmatmul.msk.f32.vlgmr.msra.gmra.mxu1 %vm1273_vm6, %v4470_v53  ;;  %v3459_v17 = vmax.f32 %v3458_v23, 1e-05  ;;  %v3465_v11 = vmax.f32 %v3464_v19, 1e-05 }
 0x75e   :  { %v3460_v54 = vmin.f32 %v3459_v17, 0.99999  ;;  %v3466_v25 = vmin.f32 %v3465_v11, 0.99999 }
 0x760   :  { %3461 = vst [vmem:[#allocation8 + $0x12] sm:$0x80] %v3460_v54  ;;  %v3285_v23 = vpop.trf.xlu2 }
 0x761   :  { %3467 = vst [vmem:[#allocation8 + $0x14] sm:$0x40] %v3466_v25 }
 0x762   :  { %v3058_v14 = vld [vmem:[#allocation7] sm:$0x7] }
 0x763   :  { %3243 = vst [vmem:[#allocation7 - $0x4] sm:$0x30] %v3882_v59 }
 0x764   :  { %3748 = vmatmul.msk.f32.gmra.mxu1 %vm1273_vm6, %v4479_v12 }
 0x768   :  { %v3471_v60 = vld [vmem:[#allocation8 + $0x18] sm:$0xff]  ;;  %v3286_v19 = vpop.trf.xlu2 }
 0x769   :  { %3484 = vmatpush.xpose.msra.mxu2 %v3471_v60  ;;  %3808 = vmatpush.xpose.msra.mxu3 %v3471_v60 }
 0x76a   :  { %v3267_v9 = vld [vmem:[#allocation7] sm:$0x7] }
 0x76c   :  { %3749 = vmatmul.msk.f32.gmra.mxu1 %vm1273_vm6, %v4490_v18 }
 0x770   :  { %v3287_v17 = vpop.trf.xlu2 }
 0x774   :  { %3750 = vmatmul.msk.f32.gmra.mxu1 %vm1273_vm6, %v4504_v37 }
 0x778   :  { %v3288_v11 = vpop.trf.xlu2 }
 0x77c   :  { %3751 = vmatmul.msk.f32.gmra.mxu1 %vm1273_vm6, %v4509_v26 }
 0x780   :  { %v3289_v54 = vpop.trf.xlu2 }
 0x784   :  { %3752 = vmatmul.msk.f32.gmra.mxu1 %vm1273_vm6, %v4514_v36 }
 0x78c   :  { %3753 = vmatmul.msk.f32.gmra.mxu1 %vm1273_vm6, %v4519_v39 }
 0x794   :  { %3754 = vmatmul.msk.f32.gmra.mxu1 %vm1273_vm6, %v4524_v56 }
 0x7d9   :  { %v2926_v53 = vpop.f32.mrf.mxu1 }
 0x7da   :  { %v2950_v30 = vmax.f32 %v2926_v53, 0.0 }
 0x7e1   :  { %v2929_v12 = vpop.f32.mrf.mxu1 }
 0x7e2   :  { %v2951_v56 = vmax.f32 %v2929_v12, 0.0 }
 0x7e9   :  { %v2932_v47 = vpop.f32.mrf.mxu1 }
 0x7ea   :  { %v2952_v39 = vmax.f32 %v2932_v47, 0.0 }
 0x7f1   :  { %v2935_v6 = vpop.f32.mrf.mxu1 }
 0x7f2   :  { %v2953_v45 = vmax.f32 %v2935_v6, 0.0 }
 0x7f9   :  { %v2938_v18 = vpop.f32.mrf.mxu1 }
 0x7fa   :  { %v2954_v36 = vmax.f32 %v2938_v18, 0.0 }
 0x801   :  { %v2941_v40 = vpop.f32.mrf.mxu1 }
 0x802   :  { %v2955_v26 = vmax.f32 %v2941_v40, 0.0 }
 0x809   :  { %v2944_v0 = vpop.f32.mrf.mxu1 }
 0x80a   :  { %v2956_v20 = vmax.f32 %v2944_v0, 0.0 }
 0x811   :  { %v2947_v37 = vpop.f32.mrf.mxu1 }
 0x812   :  { %v2957_v51 = vmax.f32 %v2947_v37, 0.0 }
 0x814   :  { %2998 = vmatpush.msrb.mxu0 %v2957_v51 }
 0x816   :  { %2999 = vmatpush.msrb.mxu0 %v2956_v20 }
 0x818   :  { %3000 = vmatpush.msrb.mxu0 %v2955_v26 }
 0x81a   :  { %3001 = vmatpush.msrb.mxu0 %v2954_v36 }
 0x81c   :  { %3002 = vmatpush.msrb.mxu0 %v2953_v45 }
 0x81e   :  { %3003 = vmatpush.msrb.mxu0 %v2952_v39 }
 0x820   :  { %3004 = vmatpush.msrb.mxu0 %v2951_v56 }
 0x822   :  { %3005 = vmatpush.msrb.mxu0 %v2950_v30 }
 0x823   :  { %3755 = vmatmul.msk.f32.vlgmr.msrb.gmra.mxu0 %vm1814_vm11, %v4710_v32 }
 0x824   :  { %3756 = vmatpush.msk.msra.mxu0 %vm1494_vm10, %v3058_v14 }
 0x82b   :  { %3757 = vmatmul.msk.f32.vlgmr.msra.gmra.mxu0 %vm1273_vm6, %v4784_v7 }
 0x833   :  { %3758 = vmatmul.msk.f32.gmra.mxu0 %vm1273_vm6, %v4786_v15 }
 0x83b   :  { %3759 = vmatmul.msk.f32.gmra.mxu0 %vm1273_vm6, %v4788_v24 }
 0x843   :  { %3760 = vmatmul.msk.f32.gmra.mxu0 %vm1273_vm6, %v4790_v3 }
 0x84b   :  { %3761 = vmatmul.msk.f32.gmra.mxu0 %vm1273_vm6, %v4792_v16 }
 0x853   :  { %3762 = vmatmul.msk.f32.gmra.mxu0 %vm1273_vm6, %v4794_v1 }
 0x85b   :  { %3763 = vmatmul.msk.f32.gmra.mxu0 %vm1273_vm6, %v4796_v50 }
 0x863   :  { %3764 = vmatmul.msk.f32.gmra.mxu0 %vm1273_vm6, %v4798_v21 }
 0x8a0   :  { %v3007_v32 = vpop.f32.mrf.mxu0 }
 0x8a1   :  { %3883 = vtanh.f32 %v3007_v32  ;;  %v3017_v7 = vand.u32 2147483647, %v3007_v32  ;;  %v3014_v27 = vmax.f32 %v3007_v32, 0.0  ;;  %vm3015_vm4 = vcmp.ne.f32.partialorder %v3007_v32, %v3007_v32 }
 0x8a3   :  { %v3018_v15 = vsub.f32 0.0, %v3017_v7 }
 0x8a5   :  { %v3019_v24 = vmul.f32 1.442695, %v3018_v15 }
 0x8a7   :  { %v3884_v31 = vpop.eup %3883  ;;  %3885 = vpow2.f32 %v3019_v24 }
 0x8a8   :  { %v3011_v3 = vadd.f32 1.0, %v3884_v31  ;;  %v3135_v22 = vpop.f32.mrf.mxu0 }
 0x8a9   :  { %v3159_v44 = vmax.f32 %v3135_v22, 0.0 }
 0x8aa   :  { %v3012_v4 = vmul.f32 0.5, %v3011_v3 }
 0x8ac   :  { %3013 = vst [vmem:[#allocation8 + $0x6] sm:$0x7] %v3012_v4 }
 0x8ad   :  { %v3886_v16 = vpop.eup %3885 }
 0x8ae   :  { %v3021_v33 = vadd.f32 1.0, %v3886_v16  ;;  %v3024_v1 = vmul.f32 -0.5, %v3886_v16  ;;  %v3027_v29 = vand.u32 2147483647, %v3886_v16 }
 0x8b0   :  { %3887 = vlog2.f32 %v3021_v33  ;;  %v3138_v13 = vpop.f32.mrf.mxu0  ;;  %v3025_v50 = vadd.f32 1.0, %v3024_v1  ;;  %vm3028_vm3 = vcmp.lt.f32.partialorder %v3027_v29, 0.0004427343 }
 0x8b1   :  { %v3160_v5 = vmax.f32 %v3138_v13, 0.0 }
 0x8b2   :  { %v3026_v35 = vmul.f32 %v3886_v16, %v3025_v50 }
 0x8b6   :  { %v3888_v38 = vpop.eup %3887 }
 0x8b7   :  { %v3023_v21 = vmul.f32 0.6931472, %v3888_v38 }
 0x8b8   :  { %v3141_v42 = vpop.f32.mrf.mxu0 }
 0x8b9   :  { %v3029_v46 = vsel %vm3028_vm3, %v3026_v35, %v3023_v21  ;;  %v3161_v34 = vmax.f32 %v3141_v42, 0.0  ;;  %v3961_v42 = vmov 1.0  }
 0x8ba   :  { %v3030_v52 = vadd.f32 %v3029_v46, %v3014_v27  ;;  %v3404_v27 = vld [vmem:[#allocation6] sm:$0x3f]  ;;  %3680 = vmatmul.msk.f32.vlgmr.msrb.gmra.mxu3 %vm1254_vm9, %v3961_v42  ;;  %v4859_v46 = vadd.s32 8, %v4297_v61 }
 0x8bc   :  { %v3031_v55 = vsel %vm3015_vm4, %v3007_v32, %v3030_v52  ;;  %vm2319_vm7 = vcmp.eq.s32.totalorder %v4859_v46, %v4299_v62  ;;  %v4868_v52 = vadd.s32 16, %v4297_v61 }
 0x8bd   :  { %3032 = vst [vmem:[#allocation8 + $0xc] sm:$0x38] %v3031_v55  ;;  %v4877_v55 = vadd.s32 24, %v4297_v61 }
 0x8be   :  { %vm2320_vm8 = vcmp.eq.s32.totalorder %v4868_v52, %v4299_v62 }
 0x8c0   :  { %v3144_v57 = vpop.f32.mrf.mxu0 }
 0x8c1   :  { %v3162_v10 = vmax.f32 %v3144_v57, 0.0  ;;  %v4886_v57 = vadd.s32 32, %v4297_v61 }
 0x8c2   :  { %3681 = vmatmul.msk.f32.gmra.mxu3 %vm2319_vm7, %v3961_v42 }
 0x8c8   :  { %v3147_v43 = vpop.f32.mrf.mxu0 }
 0x8c9   :  { %v3163_v58 = vmax.f32 %v3147_v43, 0.0  ;;  %v4895_v43 = vadd.s32 40, %v4297_v61 }
 0x8ca   :  { %3682 = vmatmul.msk.f32.gmra.mxu3 %vm2320_vm8, %v3961_v42 }
 0x8cb   :  { %vm2323_vm12 = vcmp.eq.s32.totalorder %v4895_v43, %v4299_v62 }
 0x8d0   :  { %v3150_v49 = vpop.f32.mrf.mxu0 }
 0x8d1   :  { %v3164_v8 = vmax.f32 %v3150_v49, 0.0  ;;  %v4904_v49 = vadd.s32 48, %v4297_v61 }
 0x8d3   :  { %vm2324_vm13 = vcmp.eq.s32.totalorder %v4904_v49, %v4299_v62 }
 0x8d8   :  { %v3153_v41 = vpop.f32.mrf.mxu0 }
 0x8d9   :  { %v3165_v59 = vmax.f32 %v3153_v41, 0.0  ;;  %v4913_v41 = vadd.s32 56, %v4297_v61 }
 0x8db   :  { %vm2325_vm14 = vcmp.eq.s32.totalorder %v4913_v41, %v4299_v62 }
 0x8e0   :  { %v3156_v2 = vpop.f32.mrf.mxu0 }
 0x8e1   :  { %v3166_v63 = vmax.f32 %v3156_v2, 0.0  ;;  %v4922_v2 = vadd.s32 64, %v4297_v61 }
 0x8e3   :  { %3207 = vmatpush.msrb.mxu1 %v3166_v63  ;;  %vm2326_vm15 = vcmp.eq.s32.totalorder %v4922_v2, %v4299_v62  ;;  %v4931_v63 = vadd.s32 72, %v4297_v61 }
 0x8e5   :  { %3208 = vmatpush.msrb.mxu1 %v3165_v59  ;;  %vm2327_vm0 = vcmp.eq.s32.totalorder %v4931_v63, %v4299_v62  ;;  %v4940_v59 = vadd.s32 80, %v4297_v61 }
 0x8e7   :  { %3209 = vmatpush.msrb.mxu1 %v3164_v8  ;;  %vm2328_vm2 = vcmp.eq.s32.totalorder %v4940_v59, %v4299_v62  ;;  %v4949_v8 = vadd.s32 88, %v4297_v61 }
 0x8e9   :  { %3210 = vmatpush.msrb.mxu1 %v3163_v58  ;;  %vm2329_vm3 = vcmp.eq.s32.totalorder %v4949_v8, %v4299_v62  ;;  %v4958_v58 = vadd.s32 96, %v4297_v61 }
 0x8eb   :  { %3211 = vmatpush.msrb.mxu1 %v3162_v10  ;;  %vm5194_vm4 = vcmp.eq.s32.totalorder %v4958_v58, %v4299_v62  ;;  %v4967_v10 = vadd.s32 104, %v4297_v61 }
 0x8ed   :  { %3212 = vmatpush.msrb.mxu1 %v3161_v34 }
 0x8ef   :  { %3213 = vmatpush.msrb.mxu1 %v3160_v5 }
 0x8f1   :  { %3214 = vmatpush.msrb.mxu1 %v3159_v44  ;;  %v4976_v44 = vadd.s32 112, %v4297_v61 }
 0x8f2   :  { %3765 = vmatmul.msk.f32.vlgmr.msrb.gmra.mxu1 %vm1814_vm11, %v4737_v28  ;;  %v3290_v28 = vpop.trf.xlu2 }
 0x8f3   :  { %3766 = vmatpush.msk.msra.mxu1 %vm1494_vm10, %v3267_v9  ;;  %vm2321_vm10 = vcmp.eq.s32.totalorder %v4877_v55, %v4299_v62 }
 0x8f4   :  { %3683 = vmatmul.msk.f32.gmra.mxu3 %vm2321_vm10, %v3961_v42 }
 0x8fa   :  { %3767 = vmatmul.msk.f32.vlgmr.msra.gmra.mxu1 %vm1273_vm6, %v3284_v48  ;;  %v3291_v25 = vpop.trf.xlu2 }
 0x902   :  { %3768 = vmatmul.msk.f32.gmra.mxu1 %vm1273_vm6, %v3285_v23 }
 0x90a   :  { %3769 = vmatmul.msk.f32.gmra.mxu1 %vm1273_vm6, %v3286_v19 }
 0x912   :  { %3770 = vmatmul.msk.f32.gmra.mxu1 %vm1273_vm6, %v3287_v17 }
 0x91a   :  { %3771 = vmatmul.msk.f32.gmra.mxu1 %vm1273_vm6, %v3288_v11  ;;  %v4985_v11 = vadd.s32 120, %v4297_v61 }
 0x922   :  { %3772 = vmatmul.msk.f32.gmra.mxu1 %vm1273_vm6, %v3289_v54 }
 0x92a   :  { %3773 = vmatmul.msk.f32.gmra.mxu1 %vm1273_vm6, %v3290_v28 }
 0x932   :  { %3774 = vmatmul.msk.f32.gmra.mxu1 %vm1273_vm6, %v3291_v25 }
 0x96f   :  { %v3216_v14 = vpop.f32.mrf.mxu1 }
 0x970   :  { %3889 = vtanh.f32 %v3216_v14  ;;  %v3226_v60 = vand.u32 2147483647, %v3216_v14  ;;  %v3223_v30 = vmax.f32 %v3216_v14, 0.0  ;;  %vm3224_vm6 = vcmp.ne.f32.partialorder %v3216_v14, %v3216_v14 }
 0x972   :  { %v3227_v53 = vsub.f32 0.0, %v3226_v60 }
 0x974   :  { %v3228_v12 = vmul.f32 1.442695, %v3227_v53 }
 0x976   :  { %v3890_v47 = vpop.eup %3889  ;;  %3891 = vpow2.f32 %v3228_v12 }
 0x977   :  { %v3220_v6 = vadd.f32 1.0, %v3890_v47  ;;  %v3344_v18 = vpop.f32.mrf.mxu1 }
 0x978   :  { %v3368_v35 = vmax.f32 %v3344_v18, 0.0 }
 0x979   :  { %v3221_v40 = vmul.f32 0.5, %v3220_v6 }
 0x97b   :  { %3222 = vst [vmem:[#allocation8 + $0x9] sm:$0x7] %v3221_v40 }
 0x97c   :  { %v3892_v0 = vpop.eup %3891 }
 0x97d   :  { %v3230_v37 = vadd.f32 1.0, %v3892_v0  ;;  %v3233_v51 = vmul.f32 -0.5, %v3892_v0  ;;  %v3236_v36 = vand.u32 2147483647, %v3892_v0 }
 0x97f   :  { %3893 = vlog2.f32 %v3230_v37  ;;  %v3347_v20 = vpop.f32.mrf.mxu1  ;;  %v3234_v26 = vadd.f32 1.0, %v3233_v51  ;;  %vm3237_vm5 = vcmp.lt.f32.partialorder %v3236_v36, 0.0004427343 }
 0x980   :  { %v3369_v21 = vmax.f32 %v3347_v20, 0.0 }
 0x981   :  { %v3235_v56 = vmul.f32 %v3892_v0, %v3234_v26  ;;  %v2385_v0 = vpop.f32.mrf.mxu3 }
 0x982   :  { %2433 = vst.msk [vmem:[%s5191_s6] sm:$0xff] %vm769_vm1, %v2385_v0 }
 0x985   :  { %v3894_v45 = vpop.eup %3893 }
 0x986   :  { %v3232_v39 = vmul.f32 0.6931472, %v3894_v45  ;;  %v3468_v45 = vld [vmem:[#allocation8] sm:$0xff] }
 0x987   :  { %v3350_v32 = vpop.f32.mrf.mxu1 }
 0x988   :  { %v3238_v7 = vsel %vm3237_vm5, %v3235_v56, %v3232_v39  ;;  %v3370_v38 = vmax.f32 %v3350_v32, 0.0  ;;  %vm5192_vm5 = vcmp.eq.s32.totalorder %v4967_v10, %v4299_v62 }
 0x989   :  { %v3239_v15 = vadd.f32 %v3238_v7, %v3223_v30  ;;  %v2388_v51 = vpop.f32.mrf.mxu3 }
 0x98a   :  { %2434 = vst.msk [vmem:[%s5191_s6 + $0x8] sm:$0xff] %vm769_vm1, %v2388_v51 }
 0x98b   :  { %v3240_v24 = vsel %vm3224_vm6, %v3216_v14, %v3239_v15  ;;  %vm5193_vm6 = vcmp.eq.s32.totalorder %v4976_v44, %v4299_v62 }
 0x98c   :  { %3241 = vst [vmem:[#allocation8 + $0xf] sm:$0x38] %v3240_v24 }
 0x98f   :  { %v3353_v31 = vpop.f32.mrf.mxu1 }
 0x990   :  { %v3371_v29 = vmax.f32 %v3353_v31, 0.0 }
 0x991   :  { %v2391_v36 = vpop.f32.mrf.mxu3 }
 0x992   :  { %2435 = vst.msk [vmem:[%s5191_s6 + $0x10] sm:$0xff] %vm769_vm1, %v2391_v36 }
 0x997   :  { %v3356_v3 = vpop.f32.mrf.mxu1 }
 0x998   :  { %v3372_v50 = vmax.f32 %v3356_v3, 0.0 }
 0x999   :  { %v2394_v39 = vpop.f32.mrf.mxu3 }
 0x99a   :  { %2436 = vst.msk [vmem:[%s5191_s6 + $0x18] sm:$0xff] %vm769_vm1, %v2394_v39 }
 0x99f   :  { %v3359_v22 = vpop.f32.mrf.mxu1 }
 0x9a0   :  { %v3373_v13 = vmax.f32 %v3359_v22, 0.0 }
 0x9a7   :  { %v3362_v4 = vpop.f32.mrf.mxu1 }
 0x9a8   :  { %v3374_v1 = vmax.f32 %v3362_v4, 0.0 }
 0x9af   :  { %v3365_v16 = vpop.f32.mrf.mxu1 }
 0x9b0   :  { %v3375_v33 = vmax.f32 %v3365_v16, 0.0 }
 0x9b2   :  { %3416 = vmatpush.msrb.mxu0 %v3375_v33 }
 0x9b4   :  { %3417 = vmatpush.msrb.mxu0 %v3374_v1 }
 0x9b6   :  { %3418 = vmatpush.msrb.mxu0 %v3373_v13 }
 0x9b8   :  { %3419 = vmatpush.msrb.mxu0 %v3372_v50 }
 0x9ba   :  { %3420 = vmatpush.msrb.mxu0 %v3371_v29 }
 0x9bc   :  { %3421 = vmatpush.msrb.mxu0 %v3370_v38 }
 0x9be   :  { %3422 = vmatpush.msrb.mxu0 %v3369_v21 }
 0x9c0   :  { %3423 = vmatpush.msrb.mxu0 %v3368_v35 }
 0x9c1   :  { %3775 = vmatmul.msk.f32.vlgmr.msrb.gmra.mxu0 %vm1814_vm11, %v3404_v27  ;;  %vm2322_vm11 = vcmp.eq.s32.totalorder %v4886_v57, %v4299_v62 }
 0x9c2   :  { %3684 = vmatmul.msk.f32.gmra.mxu3 %vm2322_vm11, %v3961_v42 }
 0x9ca   :  { %3685 = vmatmul.msk.f32.gmra.mxu3 %vm2323_vm12, %v3961_v42 }
 0x9d2   :  { %3686 = vmatmul.msk.f32.gmra.mxu3 %vm2324_vm13, %v3961_v42 }
 0x9da   :  { %3687 = vmatmul.msk.f32.gmra.mxu3 %vm2325_vm14, %v3961_v42 }
 0x9e2   :  { %3688 = vmatmul.msk.f32.gmra.mxu3 %vm2326_vm15, %v3961_v42 }
 0x9ea   :  { %3689 = vmatmul.msk.f32.gmra.mxu3 %vm2327_vm0, %v3961_v42 }
 0x9f2   :  { %3690 = vmatmul.msk.f32.gmra.mxu3 %vm2328_vm2, %v3961_v42 }
 0x9fa   :  { %3691 = vmatmul.msk.f32.gmra.mxu3 %vm2329_vm3, %v3961_v42 }
 0xa02   :  { %3692 = vmatmul.msk.f32.gmra.mxu3 %vm5194_vm4, %v3961_v42 }
 0xa0a   :  { %3693 = vmatmul.msk.f32.gmra.mxu3 %vm5192_vm5, %v3961_v42  ;;  %vm2333_vm5 = vcmp.eq.s32.totalorder %v4985_v11, %v4299_v62 }
 0xa12   :  { %3694 = vmatmul.msk.f32.gmra.mxu3 %vm5193_vm6, %v3961_v42 }
 0xa1a   :  { %3695 = vmatmul.msk.f32.gmra.mxu3 %vm2333_vm5, %v3961_v42 }
 0xa3e   :  { %v3425_v48 = vpop.f32.mrf.mxu0 }
 0xa3f   :  { %3895 = vtanh.f32 %v3425_v48  ;;  %v3435_v34 = vand.u32 2147483647, %v3425_v48  ;;  %v3432_v6 = vmax.f32 %v3425_v48, 0.0  ;;  %vm3433_vm4 = vcmp.ne.f32.partialorder %v3425_v48, %v3425_v48 }
 0xa41   :  { %v3436_v5 = vsub.f32 0.0, %v3435_v34 }
 0xa43   :  { %v3437_v9 = vmul.f32 1.442695, %v3436_v5 }
 0xa45   :  { %v3896_v23 = vpop.eup %3895  ;;  %3897 = vpow2.f32 %v3437_v9  ;;  %v2397_v56 = vpop.f32.mrf.mxu3 }
 0xa46   :  { %v3429_v19 = vadd.f32 1.0, %v3896_v23  ;;  %2437 = vst.msk [vmem:[%s5191_s6 + $0x20] sm:$0xff] %vm769_vm1, %v2397_v56 }
 0xa48   :  { %v3430_v17 = vmul.f32 0.5, %v3429_v19 }
 0xa4a   :  { %3431 = vst [vmem:[#allocation8 + $0xc] sm:$0x7] %v3430_v17 }
 0xa4b   :  { %v3898_v54 = vpop.eup %3897 }
 0xa4c   :  { %v3439_v28 = vadd.f32 1.0, %v3898_v54  ;;  %v3442_v25 = vmul.f32 -0.5, %v3898_v54  ;;  %v3445_v60 = vand.u32 2147483647, %v3898_v54 }
 0xa4d   :  { %v2400_v61 = vpop.f32.mrf.mxu3 }
 0xa4e   :  { %3899 = vlog2.f32 %v3439_v28  ;;  %v3443_v14 = vadd.f32 1.0, %v3442_v25  ;;  %vm3446_vm6 = vcmp.lt.f32.partialorder %v3445_v60, 0.0004427343  ;;  %2438 = vst.msk [vmem:[%s5191_s6 + $0x28] sm:$0xff] %vm769_vm1, %v2400_v61 }
 0xa50   :  { %v3444_v47 = vmul.f32 %v3898_v54, %v3443_v14 }
 0xa51   :  { %v3469_v26 = vld [vmem:[#allocation8 + $0x8] sm:$0xff] }
 0xa54   :  { %v3900_v53 = vpop.eup %3899 }
 0xa55   :  { %v3441_v12 = vmul.f32 0.6931472, %v3900_v53  ;;  %v2403_v30 = vpop.f32.mrf.mxu3 }
 0xa56   :  { %2439 = vst.msk [vmem:[%s5191_s6 + $0x30] sm:$0xff] %vm769_vm1, %v2403_v30 }
 0xa57   :  { %v3447_v18 = vsel %vm3446_vm6, %v3444_v47, %v3441_v12 }
 0xa58   :  { %v3448_v40 = vadd.f32 %v3447_v18, %v3432_v6 }
 0xa5a   :  { %v3449_v37 = vsel %vm3433_vm4, %v3425_v48, %v3448_v40 }
 0xa5b   :  { %3450 = vst [vmem:[#allocation8 + $0x12] sm:$0x38] %v3449_v37 }
 0xa5d   :  { %v2406_v32 = vpop.f32.mrf.mxu3 }
 0xa5e   :  { %2440 = vst.msk [vmem:[%s5191_s6 + $0x38] sm:$0xff] %vm769_vm1, %v2406_v32 }
 0xa62   :  { %v3470_v20 = vld [vmem:[#allocation8 + $0x10] sm:$0xff] }
 0xa63   :  { %3485 = vmatpush.xpose.msra.mxu2 %v3470_v20  ;;  %3809 = vmatpush.xpose.msra.mxu3 %v3470_v20 }
 0xa65   :  { %v2409_v7 = vpop.f32.mrf.mxu3 }
 0xa66   :  { %2441 = vst.msk [vmem:[%s5191_s6 + $0x40] sm:$0xff] %vm769_vm1, %v2409_v7 }
 0xa67   :  { %3486 = vmatpush.xpose.msra.mxu2 %v3469_v26  ;;  %3810 = vmatpush.xpose.msra.mxu3 %v3469_v26 }
 0xa6b   :  { %3487 = vmatpush.xpose.msra.mxu2 %v3468_v45  ;;  %3811 = vmatpush.xpose.msra.mxu3 %v3468_v45 }
 0xa6d   :  { %v2412_v15 = vpop.f32.mrf.mxu3 }
 0xa6e   :  { %3778 = vmatmul.msk.f32.vlgmr.msra.gmra.mxu3 %vm2320_vm8, %v3961_v42  ;;  %3776 = vmatmul.msk.f32.vlgmr.msra.gmra.mxu2 %vm1254_vm9, %v3961_v42  ;;  %2442 = vst.msk [vmem:[%s5191_s6 + $0x48] sm:$0xff] %vm769_vm1, %v2412_v15  ;;  %vm5195_vm9 = vcmp.eq.s32.totalorder %v4958_v58, %v4299_v62  ;;  %vm5197_vm8 = vcmp.eq.s32.totalorder %v4976_v44, %v4299_v62 }
 0xa75   :  { %v2415_v24 = vpop.f32.mrf.mxu3 }
 0xa76   :  { %3779 = vmatmul.msk.f32.gmra.mxu3 %vm2321_vm10, %v3961_v42  ;;  %3777 = vmatmul.msk.f32.gmra.mxu2 %vm2319_vm7, %v3961_v42  ;;  %2443 = vst.msk [vmem:[%s5191_s6 + $0x50] sm:$0xff] %vm769_vm1, %v2415_v24  ;;  %vm5196_vm7 = vcmp.eq.s32.totalorder %v4967_v10, %v4299_v62 }
 0xa7d   :  { %v2418_v31 = vpop.f32.mrf.mxu3 }
 0xa7e   :  { %3780 = vmatmul.msk.f32.gmra.mxu3 %vm2322_vm11, %v3961_v42  ;;  %2444 = vst.msk [vmem:[%s5191_s6 + $0x58] sm:$0xff] %vm769_vm1, %v2418_v31 }
 0xa85   :  { %v2421_v3 = vpop.f32.mrf.mxu3 }
 0xa86   :  { %3781 = vmatmul.msk.f32.gmra.mxu3 %vm2323_vm12, %v3961_v42  ;;  %2445 = vst.msk [vmem:[%s5191_s6 + $0x60] sm:$0xff] %vm769_vm1, %v2421_v3 }
 0xa8d   :  { %v2424_v22 = vpop.f32.mrf.mxu3 }
 0xa8e   :  { %3782 = vmatmul.msk.f32.gmra.mxu3 %vm2324_vm13, %v3961_v42  ;;  %2446 = vst.msk [vmem:[%s5191_s6 + $0x68] sm:$0xff] %vm769_vm1, %v2424_v22 }
 0xa95   :  { %v2427_v4 = vpop.f32.mrf.mxu3 }
 0xa96   :  { %3783 = vmatmul.msk.f32.gmra.mxu3 %vm2325_vm14, %v3961_v42  ;;  %2447 = vst.msk [vmem:[%s5191_s6 + $0x70] sm:$0xff] %vm769_vm1, %v2427_v4 }
 0xa9d   :  { %v2430_v16 = vpop.f32.mrf.mxu3 }
 0xa9e   :  { %3784 = vmatmul.msk.f32.gmra.mxu3 %vm2326_vm15, %v3961_v42  ;;  %2448 = vst.msk [vmem:[%s5191_s6 + $0x78] sm:$0xff] %vm769_vm1, %v2430_v16 }
 0xaa6   :  { %3785 = vmatmul.msk.f32.gmra.mxu3 %vm2327_vm0, %v3961_v42 }
 0xaae   :  { %3786 = vmatmul.msk.f32.gmra.mxu3 %vm2328_vm2, %v3961_v42 }
 0xab6   :  { %3787 = vmatmul.msk.f32.gmra.mxu3 %vm2329_vm3, %v3961_v42 }
 0xabe   :  { %3788 = vmatmul.msk.f32.gmra.mxu3 %vm5195_vm9, %v3961_v42 }
 0xac6   :  { %3789 = vmatmul.msk.f32.gmra.mxu3 %vm5196_vm7, %v3961_v42 }
 0xace   :  { %3790 = vmatmul.msk.f32.gmra.mxu3 %vm5197_vm8, %v3961_v42 }
 0xad6   :  { %3791 = vmatmul.msk.f32.gmra.mxu3 %vm2333_vm5, %v3961_v42 }
 0xaf1   :  { %v3495_v33 = vpop.f32.mrf.mxu3  ;;  %v3489_v35 = vpop.f32.mrf.mxu2 }
 0xaf2   :  { %3794 = vst.msk [vmem:[%s5191_s6 + $0x90] sm:$0xff] %vm769_vm1, %v3495_v33 }
 0xaf3   :  { %3792 = vst.msk [vmem:[%s5191_s6 + $0x80] sm:$0xff] %vm769_vm1, %v3489_v35 }
 0xaf9   :  { %v3498_v1 = vpop.f32.mrf.mxu3  ;;  %v3492_v42 = vpop.f32.mrf.mxu2 }
 0xafa   :  { %3795 = vst.msk [vmem:[%s5191_s6 + $0x98] sm:$0xff] %vm769_vm1, %v3498_v1 }
 0xafb   :  { %3793 = vst.msk [vmem:[%s5191_s6 + $0x88] sm:$0xff] %vm769_vm1, %v3492_v42 }
 0xb01   :  { %v3501_v13 = vpop.f32.mrf.mxu3 }
 0xb02   :  { %3796 = vst.msk [vmem:[%s5191_s6 + $0xa0] sm:$0xff] %vm769_vm1, %v3501_v13 }
 0xb09   :  { %v3504_v62 = vpop.f32.mrf.mxu3 }
 0xb0a   :  { %3797 = vst.msk [vmem:[%s5191_s6 + $0xa8] sm:$0xff] %vm769_vm1, %v3504_v62 }
 0xb11   :  { %v3507_v50 = vpop.f32.mrf.mxu3 }
 0xb12   :  { %3798 = vst.msk [vmem:[%s5191_s6 + $0xb0] sm:$0xff] %vm769_vm1, %v3507_v50 }
 0xb19   :  { %v3510_v29 = vpop.f32.mrf.mxu3 }
 0xb1a   :  { %3799 = vst.msk [vmem:[%s5191_s6 + $0xb8] sm:$0xff] %vm769_vm1, %v3510_v29 }
 0xb21   :  { %v3513_v38 = vpop.f32.mrf.mxu3 }
 0xb22   :  { %3800 = vst.msk [vmem:[%s5191_s6 + $0xc0] sm:$0xff] %vm769_vm1, %v3513_v38 }
 0xb29   :  { %v3516_v21 = vpop.f32.mrf.mxu3 }
 0xb2a   :  { %3801 = vst.msk [vmem:[%s5191_s6 + $0xc8] sm:$0xff] %vm769_vm1, %v3516_v21 }
 0xb31   :  { %v3519_v27 = vpop.f32.mrf.mxu3 }
 0xb32   :  { %3802 = vst.msk [vmem:[%s5191_s6 + $0xd0] sm:$0xff] %vm769_vm1, %v3519_v27 }
 0xb39   :  { %v3522_v46 = vpop.f32.mrf.mxu3 }
 0xb3a   :  { %3803 = vst.msk [vmem:[%s5191_s6 + $0xd8] sm:$0xff] %vm769_vm1, %v3522_v46 }
 0xb41   :  { %v3525_v52 = vpop.f32.mrf.mxu3 }
 0xb42   :  { %3804 = vst.msk [vmem:[%s5191_s6 + $0xe0] sm:$0xff] %vm769_vm1, %v3525_v52 }
 0xb49   :  { %v3528_v55 = vpop.f32.mrf.mxu3 }
 0xb4a   :  { %3805 = vst.msk [vmem:[%s5191_s6 + $0xe8] sm:$0xff] %vm769_vm1, %v3528_v55 }
 0xb51   :  { %v3531_v57 = vpop.f32.mrf.mxu3 }
 0xb52   :  { %3806 = vst.msk [vmem:[%s5191_s6 + $0xf0] sm:$0xff] %vm769_vm1, %v3531_v57 }
 0xb59   :  { %v3534_v43 = vpop.f32.mrf.mxu3 }
 0xb5a   :  { %3807 = vst.msk [vmem:[%s5191_s6 + $0xf8] sm:$0xff] %vm769_vm1, %v3534_v43 }
 0xb5b   :  { %3558 = vsyncpa [#allocation10], 1 }
 0xb5c   :  { %3559 = vsyncpa [#allocation12], 1 }

</bundles_post_ra>
